<compile_context>
chip_gen: v5e
topology: v5e:2x2
jax: 0.10.0
libtpu: 0.0.40
codegen_flags: <defaults>
</compile_context>

<pallas_src>
import jax
import jax.numpy as jnp
from jax import lax
from jax.experimental import pallas as pl
from jax.experimental.pallas import tpu as pltpu


# ----------------------------------------------------------------------------- kernel
def _make_fused_attn_kernel(N, C, num_heads, scale):
    """q/kv projection + multi-head softmax attention + output projection."""
    D = C // num_heads

    def kernel(xq_ref, xfull_ref, wq_ref, wk_ref, wv_ref, wp_ref, bp_ref,
               o_ref, k_sc, v_sc):
        i = pl.program_id(1)

        # ---- K/V projection for this batch, computed once per batch (q-tile 0),
        #      kept resident in bf16 VMEM scratch for all q-tiles.
        @pl.when(i == 0)
        def _():
            xb = xfull_ref[0].astype(jnp.bfloat16)                     # (N, C)
            k_sc[...] = jnp.dot(xb, wk_ref[...],
                                preferred_element_type=jnp.float32
                                ).astype(jnp.bfloat16)                 # (N, C)
            v_sc[...] = jnp.dot(xb, wv_ref[...],
                                preferred_element_type=jnp.float32
                                ).astype(jnp.bfloat16)                 # (N, C)

        # ---- q projection for this q-tile; softmax scale folded into q in f32.
        xq = xq_ref[0].astype(jnp.bfloat16)                            # (tq, C)
        q_f32 = jnp.dot(xq, wq_ref[...], preferred_element_type=jnp.float32)
        q = (q_f32 * scale).astype(jnp.bfloat16)                       # (tq, C)

        k = k_sc[...]                                                  # (N, C) bf16
        v = v_sc[...]                                                  # (N, C) bf16

        # ---- all heads in this grid step; per-head (tq,D)x(N,D)^T matmuls.
        # TODO(synk): for large N (PVTv2 stage 1, N~3136) switch to a flash-style
        # K-tile loop with online softmax to bound VMEM on v7x.
        head_outs = []
        for h in range(num_heads):
            sl = slice(h * D, (h + 1) * D)
            qh, kh, vh = q[:, sl], k[:, sl], v[:, sl]
            s = lax.dot_general(qh, kh, (((1,), (1,)), ((), ())),
                                preferred_element_type=jnp.float32)    # (tq, N)
            m = jnp.max(s, axis=-1, keepdims=True)
            p = jnp.exp(s - m)
            l = jnp.sum(p, axis=-1, keepdims=True)
            p = p * pl.reciprocal(l, approx=True)
            oh = jnp.dot(p.astype(jnp.bfloat16), vh,
                         preferred_element_type=jnp.float32)           # (tq, D)
            head_outs.append(oh)
        o = jnp.concatenate(head_outs, axis=-1).astype(jnp.bfloat16)   # (tq, C)

        # ---- fused output projection (lane-dense (tq, C) store).
        y = jnp.dot(o, wp_ref[...], preferred_element_type=jnp.float32) + bp_ref[...]
        o_ref[0] = y.astype(o_ref.dtype)

    return kernel


# ----------------------------------------------------------------------------- helpers
def _pick_tile(n, cap=256):
    """Largest tile <= cap that divides n (multiple of 8 for sublane alignment)."""
    for t in (cap, 256, 128, 64, 32, 16, 8):
        if t <= n and n % t == 0:
            return t
    return n


def _topk_keep_tokens(x, frac=0.7):
    # TODO(synk): torch.topk+scatter_ along the token axis has no clean Pallas TPU
    # primitive (needs a per-column sort/selection); computed with plain JAX here.
    B, N, C = x.shape
    k = int(frac * N)
    xt = jnp.swapaxes(x, 1, 2)                                 # (B, C, N)
    vals, idx = lax.top_k(xt, k)                               # (B, C, k)
    bi = jnp.arange(B)[:, None, None]
    ci = jnp.arange(C)[None, :, None]
    out = jnp.zeros_like(xt).at[bi, ci, idx].set(vals)
    return jnp.swapaxes(out, 1, 2)


# ----------------------------------------------------------------------------- forward
def attention_forward(x, params, H, W, num_heads, exp_lay, *, sr_ratio=1, linear=False):
    """Pallas forward of Attention (x1=None path, linear=False, sr_ratio=1)."""
    wq, wkv, wp, bp = params
    B, N, C = x.shape
    assert N == H * W
    assert C % num_heads == 0
    # TODO(synk): sr_ratio>1 (strided Conv2d + LayerNorm) and linear=True
    # (AdaptiveAvgPool + 1x1 conv + LayerNorm + GELU) KV reductions not implemented.
    assert sr_ratio == 1 and not linear
    D = C // num_heads
    scale = float(D) ** -0.5

    tq = _pick_tile(N, cap=256)
    nqt = N // tq

    # One-time bf16 weight layout (halves weight DMA + resident VMEM).
    wq_b = wq.astype(jnp.bfloat16)
    wk_b = wkv[:, :C].astype(jnp.bfloat16)
    wv_b = wkv[:, C:].astype(jnp.bfloat16)
    wp_b = wp.astype(jnp.bfloat16)

    kernel = _make_fused_attn_kernel(N, C, num_heads, scale)

    y = pl.pallas_call(
        kernel,
        out_shape=jax.ShapeDtypeStruct((B, N, C), x.dtype),
        grid_spec=pltpu.PrefetchScalarGridSpec(
            num_scalar_prefetch=0,
            grid=(B, nqt),
            in_specs=[
                pl.BlockSpec((1, tq, C), lambda b, i: (b, i, 0)),   # x q-tile
                pl.BlockSpec((1, N, C), lambda b, i: (b, 0, 0)),    # x full (for K/V)
                pl.BlockSpec((C, C), lambda b, i: (0, 0)),          # Wq (bf16)
                pl.BlockSpec((C, C), lambda b, i: (0, 0)),          # Wk (bf16)
                pl.BlockSpec((C, C), lambda b, i: (0, 0)),          # Wv (bf16)
                pl.BlockSpec((C, C), lambda b, i: (0, 0)),          # Wp (bf16)
                pl.BlockSpec((1, C), lambda b, i: (0, 0)),          # proj bias (f32)
            ],
            out_specs=pl.BlockSpec((1, tq, C), lambda b, i: (b, i, 0)),
            scratch_shapes=[
                pltpu.VMEM((N, C), jnp.bfloat16),   # K scratch (per batch)
                pltpu.VMEM((N, C), jnp.bfloat16),   # V scratch (per batch)
            ],
        ),
        compiler_params=pltpu.CompilerParams(
            dimension_semantics=("parallel", "arbitrary")),
    )(x, x, wq_b, wk_b, wv_b, wp_b, bp)

    if exp_lay % 3 == 0:
        y = _topk_keep_tokens(y, 0.7)
    return y


# ----------------------------------------------------------------------------- reference
def attention_reference(x, params, H, W, num_heads, exp_lay):
    """Pure-JAX (f32 HIGHEST) reference mirroring the PyTorch forward."""
    wq, wkv, wp, bp = params
    B, N, C = x.shape
    D = C // num_heads
    scale = float(D) ** -0.5
    hp = lax.Precision.HIGHEST
    q = jnp.dot(x, wq, precision=hp).reshape(B, N, num_heads, D).transpose(0, 2, 1, 3)
    kv = jnp.dot(x, wkv, precision=hp).reshape(B, N, 2, num_heads, D)
    kv = kv.transpose(2, 0, 3, 1, 4)
    k, v = kv[0], kv[1]
    attn = jnp.einsum('bhqd,bhkd->bhqk', q, k, precision=hp) * scale
    attn = jax.nn.softmax(attn, axis=-1)
    o = jnp.einsum('bhqk,bhkd->bhqd', attn, v, precision=hp)
    o = o.transpose(0, 2, 1, 3).reshape(B, N, C)
    y = jnp.dot(o, wp, precision=hp) + bp
    if exp_lay % 3 == 0:
        y = _topk_keep_tokens(y, 0.7)
    return y


def make_params(key, dim):
    # Linear weights: trunc_normal_(std=0.02) (stored pre-transposed as (in, out));
    # qkv_bias=False -> no q/kv bias; proj bias = 0.
    k1, k2, k3 = jax.random.split(key, 3)
    wq = 0.02 * jax.random.normal(k1, (dim, dim), jnp.float32)
    wkv = 0.02 * jax.random.normal(k2, (dim, 2 * dim), jnp.float32)
    wp = 0.02 * jax.random.normal(k3, (dim, dim), jnp.float32)
    bp = jnp.zeros((1, dim), jnp.float32)
    return (wq, wkv, wp, bp)


if __name__ == "__main__":
    B, H, W = 2, 8, 8
    N = H * W
    dim, num_heads = 128, 8          # lane-dense channel dim (multiple of 128)
    exp_lay = 1                      # exp_lay % 3 != 0 -> no top-k sparsification

    key = jax.random.PRNGKey(0)
    kx, kp = jax.random.split(key)
    x = jax.random.normal(kx, (B, N, dim), jnp.float32)
    params = make_params(kp, dim)

    out = attention_forward(x, params, H, W, num_heads, exp_lay)
    out = jax.block_until_ready(out)

    ref = attention_reference(x, params, H, W, num_heads, exp_lay)
    assert out.shape == (B, N, dim)
    err = float(jnp.max(jnp.abs(out - ref)))
    # bf16 MXU operands + approx reciprocal vs f32-HIGHEST reference -> loosened tolerance.
    assert jnp.allclose(out, ref, atol=2e-3, rtol=2e-2), err

    print("KERNEL_OK")
</pallas_src>

<mosaic_0001>
module attributes {stable_mosaic.version = 11 : i64} {
  func.func @kernel(%arg0: i32, %arg1: i32, %arg2: memref<1x64x128xf32, #tpu.memory_space<vmem>>, %arg3: memref<1x64x128xf32, #tpu.memory_space<vmem>>, %arg4: memref<128x128xbf16, #tpu.memory_space<vmem>>, %arg5: memref<128x128xbf16, #tpu.memory_space<vmem>>, %arg6: memref<128x128xbf16, #tpu.memory_space<vmem>>, %arg7: memref<128x128xbf16, #tpu.memory_space<vmem>>, %arg8: memref<1x128xf32, #tpu.memory_space<vmem>>, %arg9: memref<1x64x128xf32, #tpu.memory_space<vmem>>, %arg10: memref<64x128xbf16, #tpu.memory_space<vmem>>, %arg11: memref<64x128xbf16, #tpu.memory_space<vmem>>) attributes {dimension_semantics = [#tpu.dimension_semantics<parallel>, #tpu.dimension_semantics<arbitrary>], iteration_bounds = array<i64: 2, 1>, scalar_prefetch = 0 : i64, scratch_operands = 2 : i64, tpu.core_type = #tpu.core_type<tc>, window_params = [{transform_indices = @transform_0, window_bounds = array<i64: 1, 64, 128>}, {transform_indices = @transform_1, window_bounds = array<i64: 1, 64, 128>}, {pipeline_mode = #tpu.pipeline_mode<synchronous>, transform_indices = @transform_2, window_bounds = array<i64: 128, 128>}, {pipeline_mode = #tpu.pipeline_mode<synchronous>, transform_indices = @transform_3, window_bounds = array<i64: 128, 128>}, {pipeline_mode = #tpu.pipeline_mode<synchronous>, transform_indices = @transform_4, window_bounds = array<i64: 128, 128>}, {pipeline_mode = #tpu.pipeline_mode<synchronous>, transform_indices = @transform_5, window_bounds = array<i64: 128, 128>}, {pipeline_mode = #tpu.pipeline_mode<synchronous>, transform_indices = @transform_6, window_bounds = array<i64: 1, 128>}, {transform_indices = @transform_7, window_bounds = array<i64: 1, 64, 128>}]} {
    %c0_i32 = arith.constant 0 : i32
    %0 = arith.cmpi eq, %arg1, %c0_i32 : i32
    %1 = arith.extui %0 : i1 to i32
    %c0_i32_0 = arith.constant 0 : i32
    %2 = arith.cmpi ne, %1, %c0_i32_0 : i32
    scf.if %2 {
      %c0_50 = arith.constant 0 : index
      %c0_51 = arith.constant 0 : index
      %c0_52 = arith.constant 0 : index
      %151 = vector.load %arg3[%c0_50, %c0_51, %c0_52] : memref<1x64x128xf32, #tpu.memory_space<vmem>>, vector<1x64x128xf32>
      %152 = vector.shape_cast %151 : vector<1x64x128xf32> to vector<64x128xf32>
      %153 = arith.truncf %152 : vector<64x128xf32> to vector<64x128xbf16>
      %c0_53 = arith.constant 0 : index
      %c0_54 = arith.constant 0 : index
      %154 = vector.load %arg5[%c0_53, %c0_54] : memref<128x128xbf16, #tpu.memory_space<vmem>>, vector<128x128xbf16>
      %cst_55 = arith.constant dense<0.000000e+00> : vector<64x128xf32>
      %155 = tpu.matmul %153, %154, %cst_55 {dimension_numbers = #tpu.dot_dimension_numbers<[1], [0], [0], [1], [0, 0, 1, 1], [], []>} : vector<64x128xbf16>, vector<128x128xbf16>, vector<64x128xf32> -> vector<64x128xf32>
      %156 = arith.truncf %155 : vector<64x128xf32> to vector<64x128xbf16>
      %c0_56 = arith.constant 0 : index
      %c0_57 = arith.constant 0 : index
      %157 = vector.load %arg10[%c0_56, %c0_57] : memref<64x128xbf16, #tpu.memory_space<vmem>>, vector<64x128xbf16>
      tpu.vector_store %arg10[%c0_56, %c0_57], %156 {strides = array<i32>} : memref<64x128xbf16, #tpu.memory_space<vmem>>, vector<64x128xbf16>,
      %c0_58 = arith.constant 0 : index
      %c0_59 = arith.constant 0 : index
      %158 = vector.load %arg6[%c0_58, %c0_59] : memref<128x128xbf16, #tpu.memory_space<vmem>>, vector<128x128xbf16>
      %cst_60 = arith.constant dense<0.000000e+00> : vector<64x128xf32>
      %159 = tpu.matmul %153, %158, %cst_60 {dimension_numbers = #tpu.dot_dimension_numbers<[1], [0], [0], [1], [0, 0, 1, 1], [], []>} : vector<64x128xbf16>, vector<128x128xbf16>, vector<64x128xf32> -> vector<64x128xf32>
      %160 = arith.truncf %159 : vector<64x128xf32> to vector<64x128xbf16>
      %c0_61 = arith.constant 0 : index
      %c0_62 = arith.constant 0 : index
      %161 = vector.load %arg11[%c0_61, %c0_62] : memref<64x128xbf16, #tpu.memory_space<vmem>>, vector<64x128xbf16>
      tpu.vector_store %arg11[%c0_61, %c0_62], %160 {strides = array<i32>} : memref<64x128xbf16, #tpu.memory_space<vmem>>, vector<64x128xbf16>,
    } else {
    }
    %c0 = arith.constant 0 : index
    %c0_1 = arith.constant 0 : index
    %c0_2 = arith.constant 0 : index
    %3 = vector.load %arg2[%c0, %c0_1, %c0_2] : memref<1x64x128xf32, #tpu.memory_space<vmem>>, vector<1x64x128xf32>
    %4 = vector.shape_cast %3 : vector<1x64x128xf32> to vector<64x128xf32>
    %5 = arith.truncf %4 : vector<64x128xf32> to vector<64x128xbf16>
    %c0_3 = arith.constant 0 : index
    %c0_4 = arith.constant 0 : index
    %6 = vector.load %arg4[%c0_3, %c0_4] : memref<128x128xbf16, #tpu.memory_space<vmem>>, vector<128x128xbf16>
    %cst = arith.constant dense<0.000000e+00> : vector<64x128xf32>
    %7 = tpu.matmul %5, %6, %cst {dimension_numbers = #tpu.dot_dimension_numbers<[1], [0], [0], [1], [0, 0, 1, 1], [], []>} : vector<64x128xbf16>, vector<128x128xbf16>, vector<64x128xf32> -> vector<64x128xf32>
    %cst_5 = arith.constant 2.500000e-01 : f32
    %8 = vector.broadcast %cst_5 : f32 to vector<64x128xf32>
    %9 = arith.mulf %7, %8 : vector<64x128xf32>
    %10 = arith.truncf %9 : vector<64x128xf32> to vector<64x128xbf16>
    %c0_6 = arith.constant 0 : index
    %c0_7 = arith.constant 0 : index
    %11 = vector.load %arg10[%c0_6, %c0_7] : memref<64x128xbf16, #tpu.memory_space<vmem>>, vector<64x128xbf16>
    %c0_8 = arith.constant 0 : index
    %c0_9 = arith.constant 0 : index
    %12 = vector.load %arg11[%c0_8, %c0_9] : memref<64x128xbf16, #tpu.memory_space<vmem>>, vector<64x128xbf16>
    %13 = vector.extract_strided_slice %10 {offsets = [0, 0], sizes = [64, 16], strides = [1, 1]} : vector<64x128xbf16> to vector<64x16xbf16>
    %14 = vector.extract_strided_slice %11 {offsets = [0, 0], sizes = [64, 16], strides = [1, 1]} : vector<64x128xbf16> to vector<64x16xbf16>
    %15 = vector.extract_strided_slice %12 {offsets = [0, 0], sizes = [64, 16], strides = [1, 1]} : vector<64x128xbf16> to vector<64x16xbf16>
    %cst_10 = arith.constant dense<0.000000e+00> : vector<64x64xf32>
    %16 = tpu.matmul %13, %14, %cst_10 {dimension_numbers = #tpu.dot_dimension_numbers<[1], [1], [0], [0], [0, 0, 1, 0], [], []>} : vector<64x16xbf16>, vector<64x16xbf16>, vector<64x64xf32> -> vector<64x64xf32>
    %cst_11 = arith.constant dense<0xFF800000> : vector<64xf32>
    %17 = vector.multi_reduction <maximumf>, %16, %cst_11 [1] : vector<64x64xf32> to vector<64xf32>
    %18 = vector.shape_cast %17 : vector<64xf32> to vector<64x1xf32>
    %19 = vector.broadcast %18 : vector<64x1xf32> to vector<64x64xf32>
    %20 = arith.subf %16, %19 : vector<64x64xf32>
    %21 = math.exp %20 : vector<64x64xf32>
    %cst_12 = arith.constant dense<0.000000e+00> : vector<64xf32>
    %22 = vector.multi_reduction <add>, %21, %cst_12 [1] : vector<64x64xf32> to vector<64xf32>
    %23 = vector.shape_cast %22 : vector<64xf32> to vector<64x1xf32>
    %24 = tpu.reciprocal %23 {approx = true} : vector<64x1xf32> -> vector<64x1xf32>
    %25 = vector.broadcast %24 : vector<64x1xf32> to vector<64x64xf32>
    %26 = arith.mulf %21, %25 : vector<64x64xf32>
    %27 = arith.truncf %26 : vector<64x64xf32> to vector<64x64xbf16>
    %cst_13 = arith.constant dense<0.000000e+00> : vector<64x16xf32>
    %28 = tpu.matmul %27, %15, %cst_13 {dimension_numbers = #tpu.dot_dimension_numbers<[1], [0], [0], [1], [0, 0, 1, 1], [], []>} : vector<64x64xbf16>, vector<64x16xbf16>, vector<64x16xf32> -> vector<64x16xf32>
    %29 = vector.extract_strided_slice %10 {offsets = [0, 16], sizes = [64, 16], strides = [1, 1]} : vector<64x128xbf16> to vector<64x16xbf16>
    %30 = vector.extract_strided_slice %11 {offsets = [0, 16], sizes = [64, 16], strides = [1, 1]} : vector<64x128xbf16> to vector<64x16xbf16>
    %31 = vector.extract_strided_slice %12 {offsets = [0, 16], sizes = [64, 16], strides = [1, 1]} : vector<64x128xbf16> to vector<64x16xbf16>
    %cst_14 = arith.constant dense<0.000000e+00> : vector<64x64xf32>
    %32 = tpu.matmul %29, %30, %cst_14 {dimension_numbers = #tpu.dot_dimension_numbers<[1], [1], [0], [0], [0, 0, 1, 0], [], []>} : vector<64x16xbf16>, vector<64x16xbf16>, vector<64x64xf32> -> vector<64x64xf32>
    %cst_15 = arith.constant dense<0xFF800000> : vector<64xf32>
    %33 = vector.multi_reduction <maximumf>, %32, %cst_15 [1] : vector<64x64xf32> to vector<64xf32>
    %34 = vector.shape_cast %33 : vector<64xf32> to vector<64x1xf32>
    %35 = vector.broadcast %34 : vector<64x1xf32> to vector<64x64xf32>
    %36 = arith.subf %32, %35 : vector<64x64xf32>
    %37 = math.exp %36 : vector<64x64xf32>
    %cst_16 = arith.constant dense<0.000000e+00> : vector<64xf32>
    %38 = vector.multi_reduction <add>, %37, %cst_16 [1] : vector<64x64xf32> to vector<64xf32>
    %39 = vector.shape_cast %38 : vector<64xf32> to vector<64x1xf32>
    %40 = tpu.reciprocal %39 {approx = true} : vector<64x1xf32> -> vector<64x1xf32>
    %41 = vector.broadcast %40 : vector<64x1xf32> to vector<64x64xf32>
    %42 = arith.mulf %37, %41 : vector<64x64xf32>
    %43 = arith.truncf %42 : vector<64x64xf32> to vector<64x64xbf16>
    %cst_17 = arith.constant dense<0.000000e+00> : vector<64x16xf32>
    %44 = tpu.matmul %43, %31, %cst_17 {dimension_numbers = #tpu.dot_dimension_numbers<[1], [0], [0], [1], [0, 0, 1, 1], [], []>} : vector<64x64xbf16>, vector<64x16xbf16>, vector<64x16xf32> -> vector<64x16xf32>
    %45 = vector.extract_strided_slice %10 {offsets = [0, 32], sizes = [64, 16], strides = [1, 1]} : vector<64x128xbf16> to vector<64x16xbf16>
    %46 = vector.extract_strided_slice %11 {offsets = [0, 32], sizes = [64, 16], strides = [1, 1]} : vector<64x128xbf16> to vector<64x16xbf16>
    %47 = vector.extract_strided_slice %12 {offsets = [0, 32], sizes = [64, 16], strides = [1, 1]} : vector<64x128xbf16> to vector<64x16xbf16>
    %cst_18 = arith.constant dense<0.000000e+00> : vector<64x64xf32>
    %48 = tpu.matmul %45, %46, %cst_18 {dimension_numbers = #tpu.dot_dimension_numbers<[1], [1], [0], [0], [0, 0, 1, 0], [], []>} : vector<64x16xbf16>, vector<64x16xbf16>, vector<64x64xf32> -> vector<64x64xf32>
    %cst_19 = arith.constant dense<0xFF800000> : vector<64xf32>
    %49 = vector.multi_reduction <maximumf>, %48, %cst_19 [1] : vector<64x64xf32> to vector<64xf32>
    %50 = vector.shape_cast %49 : vector<64xf32> to vector<64x1xf32>
    %51 = vector.broadcast %50 : vector<64x1xf32> to vector<64x64xf32>
    %52 = arith.subf %48, %51 : vector<64x64xf32>
    %53 = math.exp %52 : vector<64x64xf32>
    %cst_20 = arith.constant dense<0.000000e+00> : vector<64xf32>
    %54 = vector.multi_reduction <add>, %53, %cst_20 [1] : vector<64x64xf32> to vector<64xf32>
    %55 = vector.shape_cast %54 : vector<64xf32> to vector<64x1xf32>
    %56 = tpu.reciprocal %55 {approx = true} : vector<64x1xf32> -> vector<64x1xf32>
    %57 = vector.broadcast %56 : vector<64x1xf32> to vector<64x64xf32>
    %58 = arith.mulf %53, %57 : vector<64x64xf32>
    %59 = arith.truncf %58 : vector<64x64xf32> to vector<64x64xbf16>
    %cst_21 = arith.constant dense<0.000000e+00> : vector<64x16xf32>
    %60 = tpu.matmul %59, %47, %cst_21 {dimension_numbers = #tpu.dot_dimension_numbers<[1], [0], [0], [1], [0, 0, 1, 1], [], []>} : vector<64x64xbf16>, vector<64x16xbf16>, vector<64x16xf32> -> vector<64x16xf32>
    %61 = vector.extract_strided_slice %10 {offsets = [0, 48], sizes = [64, 16], strides = [1, 1]} : vector<64x128xbf16> to vector<64x16xbf16>
    %62 = vector.extract_strided_slice %11 {offsets = [0, 48], sizes = [64, 16], strides = [1, 1]} : vector<64x128xbf16> to vector<64x16xbf16>
    %63 = vector.extract_strided_slice %12 {offsets = [0, 48], sizes = [64, 16], strides = [1, 1]} : vector<64x128xbf16> to vector<64x16xbf16>
    %cst_22 = arith.constant dense<0.000000e+00> : vector<64x64xf32>
    %64 = tpu.matmul %61, %62, %cst_22 {dimension_numbers = #tpu.dot_dimension_numbers<[1], [1], [0], [0], [0, 0, 1, 0], [], []>} : vector<64x16xbf16>, vector<64x16xbf16>, vector<64x64xf32> -> vector<64x64xf32>
    %cst_23 = arith.constant dense<0xFF800000> : vector<64xf32>
    %65 = vector.multi_reduction <maximumf>, %64, %cst_23 [1] : vector<64x64xf32> to vector<64xf32>
    %66 = vector.shape_cast %65 : vector<64xf32> to vector<64x1xf32>
    %67 = vector.broadcast %66 : vector<64x1xf32> to vector<64x64xf32>
    %68 = arith.subf %64, %67 : vector<64x64xf32>
    %69 = math.exp %68 : vector<64x64xf32>
    %cst_24 = arith.constant dense<0.000000e+00> : vector<64xf32>
    %70 = vector.multi_reduction <add>, %69, %cst_24 [1] : vector<64x64xf32> to vector<64xf32>
    %71 = vector.shape_cast %70 : vector<64xf32> to vector<64x1xf32>
    %72 = tpu.reciprocal %71 {approx = true} : vector<64x1xf32> -> vector<64x1xf32>
    %73 = vector.broadcast %72 : vector<64x1xf32> to vector<64x64xf32>
    %74 = arith.mulf %69, %73 : vector<64x64xf32>
    %75 = arith.truncf %74 : vector<64x64xf32> to vector<64x64xbf16>
    %cst_25 = arith.constant dense<0.000000e+00> : vector<64x16xf32>
    %76 = tpu.matmul %75, %63, %cst_25 {dimension_numbers = #tpu.dot_dimension_numbers<[1], [0], [0], [1], [0, 0, 1, 1], [], []>} : vector<64x64xbf16>, vector<64x16xbf16>, vector<64x16xf32> -> vector<64x16xf32>
    %77 = vector.extract_strided_slice %10 {offsets = [0, 64], sizes = [64, 16], strides = [1, 1]} : vector<64x128xbf16> to vector<64x16xbf16>
    %78 = vector.extract_strided_slice %11 {offsets = [0, 64], sizes = [64, 16], strides = [1, 1]} : vector<64x128xbf16> to vector<64x16xbf16>
    %79 = vector.extract_strided_slice %12 {offsets = [0, 64], sizes = [64, 16], strides = [1, 1]} : vector<64x128xbf16> to vector<64x16xbf16>
    %cst_26 = arith.constant dense<0.000000e+00> : vector<64x64xf32>
    %80 = tpu.matmul %77, %78, %cst_26 {dimension_numbers = #tpu.dot_dimension_numbers<[1], [1], [0], [0], [0, 0, 1, 0], [], []>} : vector<64x16xbf16>, vector<64x16xbf16>, vector<64x64xf32> -> vector<64x64xf32>
    %cst_27 = arith.constant dense<0xFF800000> : vector<64xf32>
    %81 = vector.multi_reduction <maximumf>, %80, %cst_27 [1] : vector<64x64xf32> to vector<64xf32>
    %82 = vector.shape_cast %81 : vector<64xf32> to vector<64x1xf32>
    %83 = vector.broadcast %82 : vector<64x1xf32> to vector<64x64xf32>
    %84 = arith.subf %80, %83 : vector<64x64xf32>
    %85 = math.exp %84 : vector<64x64xf32>
    %cst_28 = arith.constant dense<0.000000e+00> : vector<64xf32>
    %86 = vector.multi_reduction <add>, %85, %cst_28 [1] : vector<64x64xf32> to vector<64xf32>
    %87 = vector.shape_cast %86 : vector<64xf32> to vector<64x1xf32>
    %88 = tpu.reciprocal %87 {approx = true} : vector<64x1xf32> -> vector<64x1xf32>
    %89 = vector.broadcast %88 : vector<64x1xf32> to vector<64x64xf32>
    %90 = arith.mulf %85, %89 : vector<64x64xf32>
    %91 = arith.truncf %90 : vector<64x64xf32> to vector<64x64xbf16>
    %cst_29 = arith.constant dense<0.000000e+00> : vector<64x16xf32>
    %92 = tpu.matmul %91, %79, %cst_29 {dimension_numbers = #tpu.dot_dimension_numbers<[1], [0], [0], [1], [0, 0, 1, 1], [], []>} : vector<64x64xbf16>, vector<64x16xbf16>, vector<64x16xf32> -> vector<64x16xf32>
    %93 = vector.extract_strided_slice %10 {offsets = [0, 80], sizes = [64, 16], strides = [1, 1]} : vector<64x128xbf16> to vector<64x16xbf16>
    %94 = vector.extract_strided_slice %11 {offsets = [0, 80], sizes = [64, 16], strides = [1, 1]} : vector<64x128xbf16> to vector<64x16xbf16>
    %95 = vector.extract_strided_slice %12 {offsets = [0, 80], sizes = [64, 16], strides = [1, 1]} : vector<64x128xbf16> to vector<64x16xbf16>
    %cst_30 = arith.constant dense<0.000000e+00> : vector<64x64xf32>
    %96 = tpu.matmul %93, %94, %cst_30 {dimension_numbers = #tpu.dot_dimension_numbers<[1], [1], [0], [0], [0, 0, 1, 0], [], []>} : vector<64x16xbf16>, vector<64x16xbf16>, vector<64x64xf32> -> vector<64x64xf32>
    %cst_31 = arith.constant dense<0xFF800000> : vector<64xf32>
    %97 = vector.multi_reduction <maximumf>, %96, %cst_31 [1] : vector<64x64xf32> to vector<64xf32>
    %98 = vector.shape_cast %97 : vector<64xf32> to vector<64x1xf32>
    %99 = vector.broadcast %98 : vector<64x1xf32> to vector<64x64xf32>
    %100 = arith.subf %96, %99 : vector<64x64xf32>
    %101 = math.exp %100 : vector<64x64xf32>
    %cst_32 = arith.constant dense<0.000000e+00> : vector<64xf32>
    %102 = vector.multi_reduction <add>, %101, %cst_32 [1] : vector<64x64xf32> to vector<64xf32>
    %103 = vector.shape_cast %102 : vector<64xf32> to vector<64x1xf32>
    %104 = tpu.reciprocal %103 {approx = true} : vector<64x1xf32> -> vector<64x1xf32>
    %105 = vector.broadcast %104 : vector<64x1xf32> to vector<64x64xf32>
    %106 = arith.mulf %101, %105 : vector<64x64xf32>
    %107 = arith.truncf %106 : vector<64x64xf32> to vector<64x64xbf16>
    %cst_33 = arith.constant dense<0.000000e+00> : vector<64x16xf32>
    %108 = tpu.matmul %107, %95, %cst_33 {dimension_numbers = #tpu.dot_dimension_numbers<[1], [0], [0], [1], [0, 0, 1, 1], [], []>} : vector<64x64xbf16>, vector<64x16xbf16>, vector<64x16xf32> -> vector<64x16xf32>
    %109 = vector.extract_strided_slice %10 {offsets = [0, 96], sizes = [64, 16], strides = [1, 1]} : vector<64x128xbf16> to vector<64x16xbf16>
    %110 = vector.extract_strided_slice %11 {offsets = [0, 96], sizes = [64, 16], strides = [1, 1]} : vector<64x128xbf16> to vector<64x16xbf16>
    %111 = vector.extract_strided_slice %12 {offsets = [0, 96], sizes = [64, 16], strides = [1, 1]} : vector<64x128xbf16> to vector<64x16xbf16>
    %cst_34 = arith.constant dense<0.000000e+00> : vector<64x64xf32>
    %112 = tpu.matmul %109, %110, %cst_34 {dimension_numbers = #tpu.dot_dimension_numbers<[1], [1], [0], [0], [0, 0, 1, 0], [], []>} : vector<64x16xbf16>, vector<64x16xbf16>, vector<64x64xf32> -> vector<64x64xf32>
    %cst_35 = arith.constant dense<0xFF800000> : vector<64xf32>
    %113 = vector.multi_reduction <maximumf>, %112, %cst_35 [1] : vector<64x64xf32> to vector<64xf32>
    %114 = vector.shape_cast %113 : vector<64xf32> to vector<64x1xf32>
    %115 = vector.broadcast %114 : vector<64x1xf32> to vector<64x64xf32>
    %116 = arith.subf %112, %115 : vector<64x64xf32>
    %117 = math.exp %116 : vector<64x64xf32>
    %cst_36 = arith.constant dense<0.000000e+00> : vector<64xf32>
    %118 = vector.multi_reduction <add>, %117, %cst_36 [1] : vector<64x64xf32> to vector<64xf32>
    %119 = vector.shape_cast %118 : vector<64xf32> to vector<64x1xf32>
    %120 = tpu.reciprocal %119 {approx = true} : vector<64x1xf32> -> vector<64x1xf32>
    %121 = vector.broadcast %120 : vector<64x1xf32> to vector<64x64xf32>
    %122 = arith.mulf %117, %121 : vector<64x64xf32>
    %123 = arith.truncf %122 : vector<64x64xf32> to vector<64x64xbf16>
    %cst_37 = arith.constant dense<0.000000e+00> : vector<64x16xf32>
    %124 = tpu.matmul %123, %111, %cst_37 {dimension_numbers = #tpu.dot_dimension_numbers<[1], [0], [0], [1], [0, 0, 1, 1], [], []>} : vector<64x64xbf16>, vector<64x16xbf16>, vector<64x16xf32> -> vector<64x16xf32>
    %125 = vector.extract_strided_slice %10 {offsets = [0, 112], sizes = [64, 16], strides = [1, 1]} : vector<64x128xbf16> to vector<64x16xbf16>
    %126 = vector.extract_strided_slice %11 {offsets = [0, 112], sizes = [64, 16], strides = [1, 1]} : vector<64x128xbf16> to vector<64x16xbf16>
    %127 = vector.extract_strided_slice %12 {offsets = [0, 112], sizes = [64, 16], strides = [1, 1]} : vector<64x128xbf16> to vector<64x16xbf16>
    %cst_38 = arith.constant dense<0.000000e+00> : vector<64x64xf32>
    %128 = tpu.matmul %125, %126, %cst_38 {dimension_numbers = #tpu.dot_dimension_numbers<[1], [1], [0], [0], [0, 0, 1, 0], [], []>} : vector<64x16xbf16>, vector<64x16xbf16>, vector<64x64xf32> -> vector<64x64xf32>
    %cst_39 = arith.constant dense<0xFF800000> : vector<64xf32>
    %129 = vector.multi_reduction <maximumf>, %128, %cst_39 [1] : vector<64x64xf32> to vector<64xf32>
    %130 = vector.shape_cast %129 : vector<64xf32> to vector<64x1xf32>
    %131 = vector.broadcast %130 : vector<64x1xf32> to vector<64x64xf32>
    %132 = arith.subf %128, %131 : vector<64x64xf32>
    %133 = math.exp %132 : vector<64x64xf32>
    %cst_40 = arith.constant dense<0.000000e+00> : vector<64xf32>
    %134 = vector.multi_reduction <add>, %133, %cst_40 [1] : vector<64x64xf32> to vector<64xf32>
    %135 = vector.shape_cast %134 : vector<64xf32> to vector<64x1xf32>
    %136 = tpu.reciprocal %135 {approx = true} : vector<64x1xf32> -> vector<64x1xf32>
    %137 = vector.broadcast %136 : vector<64x1xf32> to vector<64x64xf32>
    %138 = arith.mulf %133, %137 : vector<64x64xf32>
    %139 = arith.truncf %138 : vector<64x64xf32> to vector<64x64xbf16>
    %cst_41 = arith.constant dense<0.000000e+00> : vector<64x16xf32>
    %140 = tpu.matmul %139, %127, %cst_41 {dimension_numbers = #tpu.dot_dimension_numbers<[1], [0], [0], [1], [0, 0, 1, 1], [], []>} : vector<64x64xbf16>, vector<64x16xbf16>, vector<64x16xf32> -> vector<64x16xf32>
    %141 = tpu.concatenate %28, %44, %60, %76, %92, %108, %124, %140 in 1 : vector<64x16xf32>, vector<64x16xf32>, vector<64x16xf32>, vector<64x16xf32>, vector<64x16xf32>, vector<64x16xf32>, vector<64x16xf32>, vector<64x16xf32> -> vector<64x128xf32>
    %142 = arith.truncf %141 : vector<64x128xf32> to vector<64x128xbf16>
    %c0_42 = arith.constant 0 : index
    %c0_43 = arith.constant 0 : index
    %143 = vector.load %arg7[%c0_42, %c0_43] : memref<128x128xbf16, #tpu.memory_space<vmem>>, vector<128x128xbf16>
    %cst_44 = arith.constant dense<0.000000e+00> : vector<64x128xf32>
    %144 = tpu.matmul %142, %143, %cst_44 {dimension_numbers = #tpu.dot_dimension_numbers<[1], [0], [0], [1], [0, 0, 1, 1], [], []>} : vector<64x128xbf16>, vector<128x128xbf16>, vector<64x128xf32> -> vector<64x128xf32>
    %c0_45 = arith.constant 0 : index
    %c0_46 = arith.constant 0 : index
    %145 = vector.load %arg8[%c0_45, %c0_46] : memref<1x128xf32, #tpu.memory_space<vmem>>, vector<1x128xf32>
    %146 = vector.broadcast %145 : vector<1x128xf32> to vector<64x128xf32>
    %147 = arith.addf %144, %146 : vector<64x128xf32>
    %c0_47 = arith.constant 0 : index
    %c0_48 = arith.constant 0 : index
    %c0_49 = arith.constant 0 : index
    %148 = vector.load %arg9[%c0_47, %c0_48, %c0_49] : memref<1x64x128xf32, #tpu.memory_space<vmem>>, vector<1x64x128xf32>
    %149 = vector.shape_cast %148 : vector<1x64x128xf32> to vector<64x128xf32>
    %150 = vector.shape_cast %147 : vector<64x128xf32> to vector<1x64x128xf32>
    tpu.vector_store %arg9[%c0_47, %c0_48, %c0_49], %150 {strides = array<i32>} : memref<1x64x128xf32, #tpu.memory_space<vmem>>, vector<1x64x128xf32>,
    return
  }
  func.func @transform_0(%arg0: i32, %arg1: i32) -> (i32, i32, i32) {
    %c0_i32 = arith.constant 0 : i32
    %c0_i32_0 = arith.constant 0 : i32
    return %arg0, %arg1, %c0_i32 : i32, i32, i32
  }
  func.func @transform_1(%arg0: i32, %arg1: i32) -> (i32, i32, i32) {
    %c0_i32 = arith.constant 0 : i32
    %c0_i32_0 = arith.constant 0 : i32
    %c0_i32_1 = arith.constant 0 : i32
    return %arg0, %c0_i32, %c0_i32_0 : i32, i32, i32
  }
  func.func @transform_2(%arg0: i32, %arg1: i32) -> (i32, i32) {
    %c0_i32 = arith.constant 0 : i32
    %c0_i32_0 = arith.constant 0 : i32
    %c0_i32_1 = arith.constant 0 : i32
    return %c0_i32, %c0_i32_0 : i32, i32
  }
  func.func @transform_3(%arg0: i32, %arg1: i32) -> (i32, i32) {
    %c0_i32 = arith.constant 0 : i32
    %c0_i32_0 = arith.constant 0 : i32
    %c0_i32_1 = arith.constant 0 : i32
    return %c0_i32, %c0_i32_0 : i32, i32
  }
  func.func @transform_4(%arg0: i32, %arg1: i32) -> (i32, i32) {
    %c0_i32 = arith.constant 0 : i32
    %c0_i32_0 = arith.constant 0 : i32
    %c0_i32_1 = arith.constant 0 : i32
    return %c0_i32, %c0_i32_0 : i32, i32
  }
  func.func @transform_5(%arg0: i32, %arg1: i32) -> (i32, i32) {
    %c0_i32 = arith.constant 0 : i32
    %c0_i32_0 = arith.constant 0 : i32
    %c0_i32_1 = arith.constant 0 : i32
    return %c0_i32, %c0_i32_0 : i32, i32
  }
  func.func @transform_6(%arg0: i32, %arg1: i32) -> (i32, i32) {
    %c0_i32 = arith.constant 0 : i32
    %c0_i32_0 = arith.constant 0 : i32
    %c0_i32_1 = arith.constant 0 : i32
    return %c0_i32, %c0_i32_0 : i32, i32
  }
  func.func @transform_7(%arg0: i32, %arg1: i32) -> (i32, i32, i32) {
    %c0_i32 = arith.constant 0 : i32
    %c0_i32_0 = arith.constant 0 : i32
    return %arg0, %arg1, %c0_i32 : i32, i32, i32
  }
}

</mosaic_0001>

<bundles_post_ra>
// kernel: tpu_custom_call.1
= control target key start
LH: loop header
LB: loop body
LE: loop exit
PB: predicated region body
PF: predicated region fallthrough
CT: control target
= control target key end

     0   :  { %s5848_s0 = inlined_call_operand.hbm [shape: f32[2,64,128], index: 0, kind: input, shape index: {}]   ;;  %s5849_s1 = inlined_call_operand.hbm [shape: f32[2,64,128], index: 1, kind: input, shape index: {}]   ;;  %s5850_s2 = inlined_call_operand.hbm [shape: bf16[128,128], index: 2, kind: input, shape index: {}]   ;;  %s5851_s3 = inlined_call_operand.hbm [shape: bf16[128,128], index: 3, kind: input, shape index: {}]   ;;  %s5852_s4 = inlined_call_operand.hbm [shape: bf16[128,128], index: 4, kind: input, shape index: {}]   ;;  %s5853_s5 = inlined_call_operand.hbm [shape: bf16[128,128], index: 5, kind: input, shape index: {}]   ;;  %s5854_s6 = inlined_call_operand.vmem [shape: f32[1,128], index: 6, kind: input, shape index: {}]   ;;  %s5855_s7 = inlined_call_operand.hbm [shape: f32[2,64,128], index: 7, kind: output, shape index: {}]  }
   0x1   :  { %5862 = sst [smem:[#allocation28_spill]] %s5850_s2 }
   0x2   :  { %5863 = sst [smem:[#allocation29_spill]] %s5851_s3 }
   0x3   :  { %5864 = sst [smem:[#allocation30_spill]] %s5852_s4 }
   0x4   :  { %5865 = sst [smem:[#allocation31_spill]] %s5853_s5 }
   0x5   :  { %12 = vsyncpa [#allocation5], 0 }
   0x6   :  { %14 = vsyncpa [#allocation5 + $0x1], 0 }
   0x7   :  { %15 = vsyncpa [#allocation8], 0 }
   0x8   :  { %17 = vsyncpa [#allocation8 + $0x1], 0 }
   0x9   :  { %18 = vsyncpa [#allocation11], 0 }
   0xa   :  { %19 = vsyncpa [#allocation14], 0 }
   0xb   :  { %20 = vsyncpa [#allocation6], 0 }
   0xc   :  { %22 = vsyncpa [#allocation6 + $0x1], 0  ;;  %s4308_s24 = smov 0   ;;  %s4310_s25 = smov 0  }
   0xd   :  { %s4312_s26 = smov 0   ;;  %s4314_s27 = smov 0  }
   0xe   :  { %s4316_s28 = smov 0   ;;  %s4318_s29 = smov 0  }
   0xf LB: > { %5866 = sst [smem:[#allocation22_spill]] %s4245_s28  ;;  %s4339_s30 = sadd.s32 4294967295, %s4249_s29   ;;  %s4249_s29 = sphi %s4318_s29, %s28_s29   ;;  %s4245_s28 = sphi %s4316_s28, %s5891_s28   ;;  %s4241_s27 = sphi %s4314_s27, %s5890_s27   ;;  %s4237_s26 = sphi %s4312_s26, %s5894_s26   ;;  %s4233_s25 = sphi %s4310_s25, %s5893_s25   ;;  %s4229_s24 = sphi %s4308_s24, %s5892_s24  }
  0x10   : > { %s3110_s8 = sadd.s32 4294967294, %s4249_s29   ;;  %p62_p0 = scmp.ne.s32.totalorder %s4233_s25, %s4229_s24 }
  0x11   : > { %p63_p1 = scmp.eq.s32.totalorder %s4339_s30, 0  ;;  %p219_p2 = scmp.eq.s32.totalorder %s4339_s30, 1 }
  0x12   : > { %p225_p3 = scmp.eq.s32.totalorder %s3110_s8, 1  ;;  %p3111_p5 = scmp.ge.s32.totalorder %s4249_s29, 1 }
  0x13   : > { %p4348_p4 = por %p63_p1, %p62_p0  ;;  %p232_p7 = scmp.lt.s32.totalorder %s4249_s29, 3 }
  0x14   : > { %p4353_p6 = por %p225_p3, %p62_p0  ;;  %s5869_s2 = sld [smem:[#allocation28_spill]] }
  0x15   : > { %p4361_p8 = pnand %p3111_p5, %p232_p7  ;;  %s4251_s15 = smov [#allocation9]  }
  0x16   : > { %s245_s16 = sshll.u32 %s4251_s15, 4  ;;  %p3116_p11 = scmp.ge.s32.totalorder %s4249_s29, 2  ;;  %s246_s16 = int_to_ptr.vmem [resolvable:$true] %s245_s16 }
  0x17   : > { %p3471_p9 = pneg %p4361_p8  ;;  %s5872_s3 = sld [smem:[#allocation29_spill]] }
  0x18   : > { %s4252_s21 = smov 64   ;;  %s4253_s22 = smov 4  }
  0x19   : > { %p4369_p10 = pnand %p3471_p9, %p63_p1  ;;  %s4254_s23 = smov [#allocation10]  }
  0x1a   : > { %s243_s13 = sshll.u32 %s5869_s2, 4  ;;  %s259_s8 = sshll.u32 %s4254_s23, 4  ;;  %s244_s13 = int_to_ptr.hbm [resolvable:$true] %s243_s13  ;;  %s260_s8 = int_to_ptr.vmem [resolvable:$true] %s259_s8 }
  0x1b   : > { %3474 = dma.hbm_to_vmem [thread:$0]  (!%p4369_p10), %s244_s13, 1024, %s246_s16, [#allocation8], %s4252_s21, %s4252_s21, %s4253_s22  }
  0x1c   : > { %s5873_s4 = sld [smem:[#allocation30_spill]]  ;;  %s4255_s16 = smov [#allocation12]  }
  0x1d   : > { %s257_s20 = sshll.u32 %s5872_s3, 4  ;;  %s5874_s5 = sld [smem:[#allocation31_spill]]  ;;  %s258_s20 = int_to_ptr.hbm [resolvable:$true] %s257_s20 }
  0x1e   : > { %3477 = dma.hbm_to_vmem [thread:$0]  (!%p4369_p10), %s258_s20, 1024, %s260_s8, [#allocation11], %s4252_s21, %s4252_s21, %s4253_s22  }
  0x1f   : > { %s273_s2 = sshll.u32 %s4255_s16, 4  ;;  %s4256_s23 = smov [#allocation13]   ;;  %s274_s2 = int_to_ptr.vmem [resolvable:$true] %s273_s2 }
  0x20   : > { %s287_s11 = sshll.u32 %s4256_s23, 4  ;;  %s40_s20 = sadd.s32 1, %s4245_s28  ;;  %s288_s11 = int_to_ptr.vmem [resolvable:$true] %s287_s11 }
  0x21   : > { %s49_s8 = sadd.s32 1, %s4237_s26  ;;  %p42_p12 = scmp.ge.s32.totalorder %s40_s20, 2 }
  0x22   : > { %s271_s15 = sshll.u32 %s5873_s4, 4  ;;  %p56_p13 = scmp.ne.s32.totalorder %s4237_s26, %s4233_s25  ;;  %s272_s15 = int_to_ptr.hbm [resolvable:$true] %s271_s15 }
  0x23   : > { %s285_s13 = sshll.u32 %s5874_s5, 4  ;;  %p57_p0 = scmp.eq.s32.totalorder %s4249_s29, 0  ;;  %s286_s13 = int_to_ptr.hbm [resolvable:$true] %s285_s13 }
  0x24   : > { %3480 = dma.hbm_to_vmem [thread:$0]  (!%p4369_p10), %s272_s15, 1024, %s274_s2, [#allocation11], %s4252_s21, %s4252_s21, %s4253_s22  }
  0x25   : > { %3483 = dma.hbm_to_vmem [thread:$0]  (!%p4369_p10), %s286_s13, 1024, %s288_s11, [#allocation14], %s4252_s21, %s4252_s21, %s4253_s22  }
  0x26   : > { %p3499_p3 = scmp.lt.s32.totalorder %s4249_s29, 2  ;;  %s5896_s20 = smov (%p42_p12, %s40_s20), 0 }
  0x27   : > { %5875 = sst [smem:[#allocation23_spill]] %s5896_s20  ;;  %p4399_p5 = por %p57_p0, %p56_p13 }
  0x28   : > { %p4405_p7 = por %p219_p2, %p56_p13  ;;  %s44_s17 = ssub.s32 %s4245_s28, %s5896_s20 }
  0x29   : > { %s304_s21 = sand.u32 1, %s4237_s26   ;;  %p47_p9 = scmp.eq.s32.totalorder %s44_s17, 0 }
  0x2a   : > { %s3117_s22 = sshll.u32 %s304_s21, 6  ;;  %s3360_s15 = sshll.u32 %s4245_s28, 6 }
  0x2b   : > { %s4414_s18 = scalar_select %p47_p9, %s4237_s26, %s49_s8  }
  0x2c   : > { %s315_s16 = scalar_lea.hbm %s5848_s0, %s3360_s15  ;;  %s308_s11 = scalar_lea.vmem [#allocation4], %s3117_s22 }
  0x2d   : > { %5878 = sst [smem:[#allocation24_spill]] %s4414_s18  ;;  %s316_s23 = sshll.u32 %s315_s16, 4  ;;  %s317_s23 = int_to_ptr.hbm [resolvable:$true] %s316_s23 }
  0x2e   : > { %s318_s3 = sshll.u32 %s308_s11, 4  ;;  %p3485_p2 = pnand %p3499_p3, %p4399_p5  ;;  %s319_s3 = int_to_ptr.vmem [resolvable:$true] %s318_s3 }
  0x2f   : > { %s337_s17 = scalar_lea.hbm %s5849_s1, %s3360_s15  ;;  %s305_s20 = scalar_lea.sflag [#allocation5], %s304_s21 }
  0x30   : > { %s4257_s8 = smov 128   ;;  %s4258_s28 = smov 8  }
  0x31   : > { %3487 = dma.hbm_to_vmem [thread:$0]  (!%p3485_p2), %s317_s23, 1024, %s319_s3, %s305_s20, %s4257_s8, %s4257_s8, %s4258_s28  }
  0x32   : > { %s338_s18 = sshll.u32 %s337_s17, 4  ;;  %s332_s19 = scalar_lea.vmem [#allocation7], %s3117_s22  ;;  %s339_s18 = int_to_ptr.hbm [resolvable:$true] %s338_s18 }
  0x33   : > { %s340_s13 = sshll.u32 %s332_s19, 4  ;;  %s328_s16 = sand.u32 1, %s4249_s29   ;;  %s341_s13 = int_to_ptr.vmem [resolvable:$true] %s340_s13 }
  0x34   : > { %s329_s11 = scalar_lea.sflag [#allocation8], %s328_s16  ;;  %352 = sbr.rel (%p4361_p8) target bundleno = 1743 (0x6cf), region = 48 }
  0x35   : > { %3490 = dma.hbm_to_vmem [thread:$0]  (!%p3485_p2), %s339_s18, 1024, %s341_s13, %s329_s11, %s4257_s8, %s4257_s8, %s4258_s28  }
  0x39   : > { %s4430_s12 = sand.u32 1, %s4233_s25  }
  0x3a   : > { %s4433_s4 = sshll.u32 %s4430_s12, 6  ;;  %s355_s3 = scalar_lea.sflag [#allocation5], %s4430_s12 }
  0x3b   : > { %s4437_s5 = scalar_lea.vmem [#allocation4], %s4433_s4 }
  0x3c   : > { %4204 = dma.done.wait (%p4348_p4), %s355_s3, 1024  }
  0x3d   : > { %4206 = vsyncadd (%p4348_p4), %s355_s3, 4294966272  ;;  %s364_s28 = sand.u32 1, %s4339_s30   ;;  %s4445_s20 = scalar_lea.vmem [#allocation7], %s4433_s4 }
  0x3e   : > { %s365_s14 = scalar_lea.sflag [#allocation8], %s364_s28 }
  0x3f   : > { %4208 = dma.done.wait (%p4348_p4), %s365_s14, 1024  }
  0x40   : > { %4210 = vsyncadd (%p4348_p4), %s365_s14, 4294966272 }
  0x41   : > { %4212 = dma.done.wait (%p63_p1), [#allocation8], 1024  }
  0x42   : > { %4214 = vsyncadd (%p63_p1), [#allocation8], 4294966272 }
  0x43   : > { %4216 = dma.done.wait (%p63_p1), [#allocation11], 2048  }
  0x44   : > { %4218 = vsyncadd (%p63_p1), [#allocation11], 4294965248 }
  0x45   : > { %4220 = dma.done.wait (%p63_p1), [#allocation14], 1024  }
  0x46   : > { %4222 = vsyncadd (%p63_p1), [#allocation14], 4294966272  ;;  %v3369_v0 = vld [vmem:[#allocation10 + $0x38] sm:$0xff]  ;;  %v3368_v2 = vld [vmem:[#allocation10 + $0x30] sm:$0xff]  ;;  %s4259_s30 = smov 32   ;;  %s4260_s9 = smov 64  }
  0x47   : > { %v3385_v1 = vld [vmem:[#allocation9 + $0x38] sm:$0xff]  ;;  %508 = vmatpush.bf16.msra.mxu0 %v3369_v0  ;;  %v3384_v3 = vld [vmem:[#allocation9 + $0x30] sm:$0xff]  ;;  %v3367_v4 = vld [vmem:[#allocation10 + $0x28] sm:$0xff]  ;;  %s4261_s21 = smov 112   ;;  %s4262_s22 = smov 96   ;;  %vm839_vm0 = vcmask 130048  }
  0x48   : > { %738 = vmatpush.bf16.msra.mxu2 %v3385_v1  ;;  %v3383_v5 = vld [vmem:[#allocation9 + $0x28] sm:$0xff]  ;;  %v3366_v6 = vld [vmem:[#allocation10 + $0x20] sm:$0xff]  ;;  %v3365_v8 = vld [vmem:[#allocation10 + $0x18] sm:$0xff]  ;;  %s4263_s15 = smov 80   ;;  %s4264_s18 = smov 48   ;;  %vm893_vm1 = vcmask 523264  }
  0x49   : > { %v3382_v7 = vld [vmem:[#allocation9 + $0x20] sm:$0xff]  ;;  %v3381_v9 = vld [vmem:[#allocation9 + $0x18] sm:$0xff]  ;;  %v3364_v10 = vld [vmem:[#allocation10 + $0x10] sm:$0xff]  ;;  %s4265_s23 = smov 16   ;;  %vm2781_vm2 = vcmask 261120   ;;  %vm2790_vm3 = vcmask 392192  }
  0x4a   : > { %v3380_v11 = vld [vmem:[#allocation9 + $0x10] sm:$0xff]  ;;  %v3363_v12 = vld [vmem:[#allocation10 + $0x8] sm:$0xff]  ;;  %v3362_v14 = vld [vmem:[#allocation10] sm:$0xff]  ;;  %vm2807_vm4 = vcmask 654336   ;;  %vm2816_vm5 = vcmask 785408   ;;  %vm2825_vm6 = vcmask 916480  }
  0x4b   : > { %509 = vmatpush.bf16.msra.mxu0 %v3368_v2  ;;  %v3379_v13 = vld [vmem:[#allocation9 + $0x8] sm:$0xff]  ;;  %v432_v15 = vld [vmem:[%s4445_s20] sm:$0xff]  ;;  %v434_v22 = vld [vmem:[%s4445_s20 + $0x10] sm:$0xff]  ;;  %s424_s19 = scalar_lea.vmem [#allocation15], %s4433_s4  ;;  %s3402_s13 = sshll.u32 %s4241_s27, 6 }
  0x4c   : > { %739 = vmatpush.bf16.msra.mxu2 %v3384_v3  ;;  %v433_v16 = vld [vmem:[%s4445_s20 + $0x8] sm:$0xff]  ;;  %v3378_v17 = vld [vmem:[#allocation9] sm:$0xff]  ;;  %v435_v23 = vld [vmem:[%s4445_s20 + $0x18] sm:$0xff]  ;;  %s2957_s4 = scalar_lea.hbm %s5855_s7, %s3402_s13  ;;  %s2958_s3 = sshll.u32 %s424_s19, 4  ;;  %s2959_s3 = int_to_ptr.vmem [resolvable:$true] %s2958_s3 }
  0x4d   : > { %v662_v18 = vld [vmem:[%s4437_s5] sm:$0xff]  ;;  %v663_v19 = vld [vmem:[%s4437_s5 + $0x8] sm:$0xff]  ;;  %v440_v20 = vpack.c.bf16 %v433_v16, %v432_v15  ;;  %v441_v24 = vpack.c.bf16 %v435_v23, %v434_v22  ;;  %v664_v25 = vld [vmem:[%s4437_s5 + $0x10] sm:$0xff]  ;;  %s2944_s28 = scalar_lea.sflag [#allocation6], %s4430_s12 }
  0x4e   : > { %v670_v21 = vpack.c.bf16 %v663_v19, %v662_v18  ;;  %v665_v26 = vld [vmem:[%s4437_s5 + $0x18] sm:$0xff]  ;;  %v3376_v29 = vld [vmem:[#allocation12 + $0x30] sm:$0xff]  ;;  %v3375_v30 = vld [vmem:[#allocation12 + $0x28] sm:$0xff] }
  0x4f   : > { %510 = vmatpush.bf16.msra.mxu0 %v3367_v4  ;;  %v3377_v27 = vld [vmem:[#allocation12 + $0x38] sm:$0xff]  ;;  %v671_v28 = vpack.c.bf16 %v665_v26, %v664_v25  ;;  %v436_v31 = vld [vmem:[%s4445_s20 + $0x20] sm:$0xff]  ;;  %v437_v32 = vld [vmem:[%s4445_s20 + $0x28] sm:$0xff] }
  0x50   : > { %740 = vmatpush.bf16.msra.mxu2 %v3383_v5  ;;  %617 = vmatpush.bf16.msra.mxu1 %v3377_v27  ;;  %v3374_v33 = vld [vmem:[#allocation12 + $0x20] sm:$0xff]  ;;  %v442_v34 = vpack.c.bf16 %v437_v32, %v436_v31  ;;  %v667_v36 = vld [vmem:[%s4437_s5 + $0x28] sm:$0xff]  ;;  %v3373_v37 = vld [vmem:[#allocation12 + $0x18] sm:$0xff] }
  0x51   : > { %v666_v35 = vld [vmem:[%s4437_s5 + $0x20] sm:$0xff]  ;;  %v3372_v39 = vld [vmem:[#allocation12 + $0x10] sm:$0xff]  ;;  %v3371_v40 = vld [vmem:[#allocation12 + $0x8] sm:$0xff] }
  0x52   : > { %v672_v38 = vpack.c.bf16 %v667_v36, %v666_v35  ;;  %v438_v41 = vld [vmem:[%s4445_s20 + $0x30] sm:$0xff]  ;;  %v439_v42 = vld [vmem:[%s4445_s20 + $0x38] sm:$0xff]  ;;  %v3370_v43 = vld [vmem:[#allocation12] sm:$0xff] }
  0x53   : > { %511 = vmatpush.bf16.msra.mxu0 %v3366_v6  ;;  %v443_v44 = vpack.c.bf16 %v439_v42, %v438_v41  ;;  %v668_v45 = vld [vmem:[%s4437_s5 + $0x30] sm:$0xff]  ;;  %v669_v46 = vld [vmem:[%s4437_s5 + $0x38] sm:$0xff]  ;;  %s2960_s5 = sshll.u32 %s2957_s4, 4  ;;  %s2961_s5 = int_to_ptr.hbm [resolvable:$true] %s2960_s5 }
  0x54   : > { %741 = vmatpush.bf16.msra.mxu2 %v3382_v7  ;;  %618 = vmatpush.bf16.msra.mxu1 %v3376_v29  ;;  %v673_v47 = vpack.c.bf16 %v669_v46, %v668_v45  ;;  %s4165_s14 = sshra.s32 %s2961_s5, 4  ;;  %s4166_s14 = int_to_ptr.hbm [resolvable:$true] %s4165_s14 }
  0x55   : > { %s4167_s20 = scalar_lea.hbm %s4166_s14, 64  ;;  %p4172_p10 = scmp.lt.s32.totalorder %s4166_s14, %s5855_s7 }
  0x56   : > { %p4168_p1 = scmp.ne.s32.totalorder %s4166_s14, %s4167_s20 }
  0x57   : > { %512 = vmatpush.bf16.msra.mxu0 %v3365_v8 }
  0x58   : > { %742 = vmatpush.bf16.msra.mxu2 %v3381_v9  ;;  %619 = vmatpush.bf16.msra.mxu1 %v3375_v30  ;;  %p4169_p4 = pnand %p4168_p1, %p4405_p7 }
  0x5a   : > { %p4170_p8 = pneg %p4169_p4 }
  0x5b   : > { %513 = vmatpush.bf16.msra.mxu0 %v3364_v10 }
  0x5c   : > { %743 = vmatpush.bf16.msra.mxu2 %v3380_v11  ;;  %620 = vmatpush.bf16.msra.mxu1 %v3374_v33 }
  0x5f   : > { %514 = vmatpush.bf16.msra.mxu0 %v3363_v12 }
  0x60   : > { %744 = vmatpush.bf16.msra.mxu2 %v3379_v13  ;;  %621 = vmatpush.bf16.msra.mxu1 %v3373_v37 }
  0x63   : > { %515 = vmatpush.bf16.msra.mxu0 %v3362_v14 }
  0x64   : > { %745 = vmatpush.bf16.msra.mxu2 %v3378_v17  ;;  %622 = vmatpush.bf16.msra.mxu1 %v3372_v39 }
  0x66   : > { %516 = vmatmul.bf16.vlgmr.msra.gmra.mxu0 %v440_v20 }
  0x67   : > { %746 = vmatmul.bf16.vlgmr.msra.gmra.mxu2 %v670_v21 }
  0x68   : > { %623 = vmatpush.bf16.msra.mxu1 %v3371_v40 }
  0x6c   : > { %624 = vmatpush.bf16.msra.mxu1 %v3370_v43 }
  0x6f   : > { %625 = vmatmul.bf16.vlgmr.msra.gmra.mxu1 %v440_v20 }
  0x76   : > { %521 = vmatmul.bf16.gmra.mxu0 %v441_v24 }
  0x77   : > { %751 = vmatmul.bf16.gmra.mxu2 %v671_v28 }
  0x7f   : > { %630 = vmatmul.bf16.gmra.mxu1 %v441_v24 }
  0x86   : > { %526 = vmatmul.bf16.gmra.mxu0 %v442_v34 }
  0x87   : > { %756 = vmatmul.bf16.gmra.mxu2 %v672_v38 }
  0x8f   : > { %635 = vmatmul.bf16.gmra.mxu1 %v442_v34 }
  0x96   : > { %531 = vmatmul.bf16.gmra.mxu0 %v443_v44 }
  0x97   : > { %761 = vmatmul.bf16.gmra.mxu2 %v673_v47 }
  0x9f   : > { %640 = vmatmul.bf16.gmra.mxu1 %v443_v44 }
  0xe3   : > { %v517_v48 = vpop.f32.mrf.mxu0 }
  0xea   : > { %v747_v49 = vpop.f32.mrf.mxu2 }
  0xeb   : > { %v519_v50 = vpop.f32.mrf.mxu0  ;;  %v767_v52 = vmul.f32 0.25, %v747_v49 }
  0xec   : > { %v3406_v51 = vpack.c.bf16 %v519_v50, %v517_v48  ;;  %v626_v20 = vpop.f32.mrf.mxu1 }
  0xed   : > { %v775_v55 = vpack.c.bf16 %v767_v52, %v767_v52 }
  0xee   : > { %3407 = vst [vmem:[#allocation2 + $0x10] sm:$0xff] %v3406_v51  }
  0xef   : > { %v807_v59 = vunpack.c.l.b16 %v775_v55 }
  0xf2   : > { %v749_v53 = vpop.f32.mrf.mxu2 }
  0xf3   : > { %v768_v54 = vmul.f32 0.25, %v749_v53  ;;  %v522_v56 = vpop.f32.mrf.mxu0 }
  0xf4   : > { %v628_v22 = vpop.f32.mrf.mxu1 }
  0xf5   : > { %v776_v57 = vpack.c.bf16 %v768_v54, %v768_v54  ;;  %v4479_v58 = vld [vmem:[#allocation2 + $0x10] sm:$0xff]  ;;  %v3426_v24 = vpack.c.bf16 %v628_v22, %v626_v20 }
  0xf6   : > { %2129 = vrot.lane.b32.xlu2 %v4479_v58, %s4259_s30  ;;  %1701 = vrot.lane.b32.xlu0 %v4479_v58, %s4260_s9  ;;  %v853_v26 = vsel %vm839_vm0, %v4479_v58, 0 }
  0xf7   : > { %v808_v60 = vunpack.c.l.b16 %v776_v57  ;;  %1059 = vrot.lane.b32.xlu1 %v4479_v58, %s4261_s21  ;;  %3427 = vst [vmem:[#allocation3] sm:$0xff] %v3426_v24  }
  0xf9   : > { %v4487_v61 = vpack.c.b16 %v808_v60, %v807_v59 }
  0xfa   : > { %v752_v0 = vpop.f32.mrf.mxu2 }
  0xfb   : > { %v524_v62 = vpop.f32.mrf.mxu0  ;;  %v769_v6 = vmul.f32 0.25, %v752_v0 }
  0xfc   : > { %v3411_v63 = vpack.c.bf16 %v524_v62, %v522_v56  ;;  %v631_v25 = vpop.f32.mrf.mxu1 }
  0xfd   : > { %v777_v9 = vpack.c.bf16 %v769_v6, %v769_v6 }
  0xfe   : > { %3443 = vst [vmem:[#allocation2] sm:$0xff] %v3411_v63   ;;  %1265 = vrot.lane.b32.xlu2 %v4487_v61, %s4262_s22  ;;  %1051 = vrot.lane.b32.xlu0 %v4487_v61, %s4261_s21 }
  0xff   : > { %1273 = vrot.lane.b32.xlu1 %v4479_v58, %s4262_s22  ;;  %v809_v11 = vunpack.c.l.b16 %v777_v9 }
 0x102   : > { %v754_v5 = vpop.f32.mrf.mxu2 }
 0x103   : > { %v527_v1 = vpop.f32.mrf.mxu0  ;;  %v770_v7 = vmul.f32 0.25, %v754_v5 }
 0x104   : > { %v633_v28 = vpop.f32.mrf.mxu1 }
 0x105   : > { %v3387_v3 = vld [vmem:[#allocation2] sm:$0xff]  ;;  %v778_v10 = vpack.c.bf16 %v770_v7, %v770_v7  ;;  %v3431_v32 = vpack.c.bf16 %v633_v28, %v631_v25 }
 0x106   : > { %1693 = vrot.lane.b32.xlu2 %v4487_v61, %s4260_s9  ;;  %1479 = vrot.lane.b32.xlu0 %v4487_v61, %s4263_s15  ;;  %v856_v23 = vsel %vm839_vm0, %v3387_v3, 0 }
 0x107   : > { %1487 = vrot.lane.b32.xlu1 %v4479_v58, %s4263_s15  ;;  %v810_v12 = vunpack.c.l.b16 %v778_v10  ;;  %3446 = vst [vmem:[#allocation3 + $0x18] sm:$0xff] %v3431_v32  }
 0x109   : > { %v4509_v14 = vpack.c.b16 %v810_v12, %v809_v11 }
 0x10a   : > { %v757_v21 = vpop.f32.mrf.mxu2 }
 0x10b   : > { %v529_v2 = vpop.f32.mrf.mxu0  ;;  %v771_v29 = vmul.f32 0.25, %v757_v21 }
 0x10c   : > { %v3416_v4 = vpack.c.bf16 %v529_v2, %v527_v1  ;;  %v636_v35 = vpop.f32.mrf.mxu1  ;;  %v3390_v1 = vld [vmem:[#allocation3] sm:$0xff] }
 0x10d   : > { %v779_v33 = vpack.c.bf16 %v771_v29, %v771_v29 }
 0x10e   : > { %3444 = vst [vmem:[#allocation2 + $0x18] sm:$0xff] %v3416_v4   ;;  %1061 = vrot.lane.b32.xlu2 %v3387_v3, %s4261_s21  ;;  %2131 = vrot.lane.b32.xlu0 %v3387_v3, %s4259_s30 }
 0x10f   : > { %1915 = vrot.lane.b32.xlu1 %v4479_v58, %s4264_s18  ;;  %v811_v36 = vunpack.c.l.b16 %v779_v33 }
 0x112   : > { %v759_v27 = vpop.f32.mrf.mxu2 }
 0x113   : > { %v532_v8 = vpop.f32.mrf.mxu0  ;;  %v772_v30 = vmul.f32 0.25, %v759_v27 }
 0x114   : > { %v638_v48 = vpop.f32.mrf.mxu1 }
 0x115   : > { %v3388_v18 = vld [vmem:[#allocation2 + $0x18] sm:$0xff]  ;;  %v780_v34 = vpack.c.bf16 %v772_v30, %v772_v30  ;;  %v3436_v50 = vpack.c.bf16 %v638_v48, %v636_v35 }
 0x116   : > { %1275 = vrot.lane.b32.xlu2 %v3387_v3, %s4262_s22  ;;  %2345 = vrot.lane.b32.xlu0 %v3387_v3, %s4265_s23  ;;  %v859_v19 = vsel %vm839_vm0, %v3388_v18, 0 }
 0x117   : > { %2343 = vrot.lane.b32.xlu1 %v4479_v58, %s4265_s23  ;;  %v812_v37 = vunpack.c.l.b16 %v780_v34  ;;  %3447 = vst [vmem:[#allocation3 + $0x8] sm:$0xff] %v3436_v50  }
 0x119   : > { %v4555_v44 = vpack.c.b16 %v812_v37, %v811_v36 }
 0x11a   : > { %v762_v31 = vpop.f32.mrf.mxu2 }
 0x11b   : > { %v534_v13 = vpop.f32.mrf.mxu0  ;;  %v773_v39 = vmul.f32 0.25, %v762_v31 }
 0x11c   : > { %v3421_v15 = vpack.c.bf16 %v534_v13, %v532_v8  ;;  %v641_v51 = vpop.f32.mrf.mxu1 }
 0x11d   : > { %v781_v42 = vpack.c.bf16 %v773_v39, %v773_v39 }
 0x11e   : > { %3445 = vst [vmem:[#allocation2 + $0x8] sm:$0xff] %v3421_v15   ;;  %1703 = vrot.lane.b32.xlu2 %v3387_v3, %s4260_s9  ;;  %1909 = vrot.lane.b32.xlu0 %v4509_v14, %s4264_s18  ;;  %v4589_v59 = vld [vmem:[#allocation3 + $0x8] sm:$0xff] }
 0x11f   : > { %1907 = vrot.lane.b32.xlu1 %v4487_v61, %s4264_s18  ;;  %v813_v45 = vunpack.c.l.b16 %v781_v42 }
 0x122   : > { %v764_v38 = vpop.f32.mrf.mxu2 }
 0x123   : > { %v774_v40 = vmul.f32 0.25, %v764_v38 }
 0x124   : > { %v643_v53 = vpop.f32.mrf.mxu1 }
 0x125   : > { %v4516_v16 = vld [vmem:[#allocation2 + $0x8] sm:$0xff]  ;;  %v782_v43 = vpack.c.bf16 %v774_v40, %v774_v40  ;;  %v3441_v54 = vpack.c.bf16 %v643_v53, %v641_v51 }
 0x126   : > { %1917 = vrot.lane.b32.xlu2 %v3387_v3, %s4264_s18  ;;  %v862_v17 = vsel %vm839_vm0, %v4516_v16, 0  ;;  %2337 = vrot.lane.b32.xlu0 %v4509_v14, %s4265_s23 }
 0x127   : > { %2121 = vrot.lane.b32.xlu1 %v4487_v61, %s4259_s30  ;;  %868 = vmatpush.bf16.xpose.msra.mxu3 %v862_v17  ;;  %v814_v46 = vunpack.c.l.b16 %v782_v43  ;;  %3448 = vst [vmem:[#allocation3 + $0x10] sm:$0xff] %v3441_v54  }
 0x129   : > { %v4557_v47 = vpack.c.b16 %v814_v46, %v813_v45 }
 0x12e   : > { %1481 = vrot.lane.b32.xlu2 %v4509_v14, %s4263_s15  ;;  %1063 = vrot.lane.b32.xlu0 %v3388_v18, %s4261_s21  ;;  %v3393_v57 = vld [vmem:[#allocation3 + $0x10] sm:$0xff] }
 0x12f   : > { %2335 = vrot.lane.b32.xlu1 %v4487_v61, %s4265_s23  ;;  %869 = vmatpush.bf16.xpose.msra.mxu3 %v859_v19 }
 0x130   : > { %1026 = vmatpush.bf16.msrb.mxu0 %v3393_v57 }
 0x134   : > { %1027 = vmatpush.bf16.msrb.mxu0 %v4589_v59 }
 0x136   : > { %1695 = vrot.lane.b32.xlu2 %v4509_v14, %s4260_s9  ;;  %2347 = vrot.lane.b32.xlu0 %v3388_v18, %s4265_s23 }
 0x137   : > { %1489 = vrot.lane.b32.xlu1 %v3387_v3, %s4263_s15  ;;  %870 = vmatpush.bf16.xpose.msra.mxu3 %v856_v23 }
 0x13e   : > { %2123 = vrot.lane.b32.xlu2 %v4509_v14, %s4259_s30  ;;  %2135 = vrot.lane.b32.xlu0 %v4516_v16, %s4259_s30 }
 0x13f   : > { %1053 = vrot.lane.b32.xlu1 %v4509_v14, %s4261_s21  ;;  %871 = vmatpush.bf16.xpose.msra.mxu3 %v853_v26 }
 0x146   : > { %1919 = vrot.lane.b32.xlu2 %v3388_v18, %s4264_s18  ;;  %3243 = vmatmul.msk.bf16.vlgmr.msra.gmra.mxu3 %vm839_vm0, %v4487_v61  ;;  %v3391_v61 = vld [vmem:[#allocation3 + $0x18] sm:$0xff] }
 0x147   : > { %1267 = vrot.lane.b32.xlu1 %v4509_v14, %s4262_s22  ;;  %2349 = vrot.lane.b32.xlu0 %v4516_v16, %s4265_s23 }
 0x148   : > { %1028 = vmatpush.bf16.msrb.mxu0 %v3391_v61 }
 0x14c   : > { %1029 = vmatpush.bf16.msrb.mxu0 %v3390_v1 }
 0x14e   : > { %2133 = vrot.lane.b32.xlu2 %v3388_v18, %s4259_s30 }
 0x14f   : > { %1277 = vrot.lane.b32.xlu1 %v3388_v18, %s4262_s22  ;;  %1057 = vrot.lane.b32.xlu0 %v4557_v47, %s4261_s21 }
 0x150   : > { %v4553_v41 = vpop.permute.xlu2 %2129 }
 0x156   : > { %1697 = vrot.lane.b32.xlu2 %v4555_v44, %s4260_s9  ;;  %3244 = vmatmul.msk.bf16.gmra.mxu3 %vm839_vm0, %v4509_v14 }
 0x157   : > { %1491 = vrot.lane.b32.xlu1 %v3388_v18, %s4263_s15  ;;  %1216 = vrot.lane.b32.xlu0 %v4589_v59, %s4261_s21 }
 0x158   : > { %v4566_v49 = vpop.permute.xlu2 %1265 }
 0x15e   : > { %1911 = vrot.lane.b32.xlu2 %v4555_v44, %s4264_s18 }
 0x15f   : > { %1705 = vrot.lane.b32.xlu1 %v3388_v18, %s4260_s9  ;;  %1432 = vrot.lane.b32.xlu0 %v3393_v57, %s4262_s22 }
 0x160   : > { %v4571_v52 = vpop.permute.xlu2 %1693 }
 0x166   : > { %1707 = vrot.lane.b32.xlu2 %v4516_v16, %s4260_s9  ;;  %3245 = vmatmul.msk.bf16.gmra.mxu3 %vm839_vm0, %v4555_v44 }
 0x167   : > { %1055 = vrot.lane.b32.xlu1 %v4555_v44, %s4261_s21  ;;  %1860 = vrot.lane.b32.xlu0 %v3393_v57, %s4260_s9 }
 0x168   : > { %v4579_v55 = vpop.permute.xlu2 %1061  ;;  %v4606_v0 = vpop.permute.xlu0 %1701 }
 0x169   : > { %v4581_v56 = vpop.permute.xlu1 %1059 }
 0x16e   : > { %1921 = vrot.lane.b32.xlu2 %v4516_v16, %s4264_s18 }
 0x16f   : > { %1269 = vrot.lane.b32.xlu1 %v4555_v44, %s4262_s22 }
 0x170   : > { %v4587_v58 = vpop.permute.xlu2 %1275  ;;  %v4616_v4 = vpop.permute.xlu0 %1051 }
 0x171   : > { %v4591_v60 = vpop.permute.xlu1 %1273 }
 0x176   : > { %2339 = vrot.lane.b32.xlu2 %v4555_v44, %s4265_s23  ;;  %3246 = vmatmul.msk.bf16.gmra.mxu3 %vm839_vm0, %v4557_v47 }
 0x177   : > { %1483 = vrot.lane.b32.xlu1 %v4555_v44, %s4263_s15 }
 0x178   : > { %v4602_v62 = vpop.permute.xlu2 %1703  ;;  %v4626_v7 = vpop.permute.xlu0 %1479 }
 0x179   : > { %v4604_v63 = vpop.permute.xlu1 %1487 }
 0x17e   : > { %1214 = vrot.lane.b32.xlu2 %v3391_v61, %s4261_s21 }
 0x17f   : > { %1065 = vrot.lane.b32.xlu1 %v4516_v16, %s4261_s21 }
 0x180   : > { %v4612_v2 = vpop.permute.xlu2 %1917  ;;  %v4636_v10 = vpop.permute.xlu0 %2131 }
 0x181   : > { %v4614_v3 = vpop.permute.xlu1 %1915 }
 0x186   : > { %1212 = vrot.lane.b32.xlu2 %v3390_v1, %s4261_s21 }
 0x187   : > { %1279 = vrot.lane.b32.xlu1 %v4516_v16, %s4262_s22 }
 0x188   : > { %v4622_v5 = vpop.permute.xlu2 %1481  ;;  %v4649_v13 = vpop.permute.xlu0 %2345 }
 0x189   : > { %v4624_v6 = vpop.permute.xlu1 %2343 }
 0x18e   : > { %1699 = vrot.lane.b32.xlu2 %v4557_v47, %s4260_s9 }
 0x18f   : > { %1493 = vrot.lane.b32.xlu1 %v4516_v16, %s4263_s15 }
 0x190   : > { %v4632_v8 = vpop.permute.xlu2 %1695  ;;  %v4662_v18 = vpop.permute.xlu0 %1909 }
 0x191   : > { %v4634_v9 = vpop.permute.xlu1 %1907 }
 0x196   : > { %1913 = vrot.lane.b32.xlu2 %v4557_v47, %s4264_s18 }
 0x197   : > { %1218 = vrot.lane.b32.xlu1 %v3393_v57, %s4261_s21 }
 0x198   : > { %v4641_v11 = vpop.permute.xlu2 %2123  ;;  %v4672_v21 = vpop.permute.xlu0 %2337 }
 0x199   : > { %v4643_v12 = vpop.permute.xlu1 %2121  ;;  %5880 = vst [vmem:[#allocation26_spill] sm:$0xff] %v4672_v21 }
 0x19e   : > { %1644 = vrot.lane.b32.xlu2 %v4589_v59, %s4263_s15 }
 0x19f   : > { %1271 = vrot.lane.b32.xlu1 %v4557_v47, %s4262_s22 }
 0x1a0   : > { %v4651_v14 = vpop.permute.xlu2 %1919  ;;  %v1064_v24 = vpop.permute.xlu0 %1063 }
 0x1a1   : > { %v4653_v15 = vpop.permute.xlu1 %2335 }
 0x1a2   : > { %5879 = vst [vmem:[#allocation25_spill] sm:$0xff] %v4653_v15 }
 0x1a6   : > { %1642 = vrot.lane.b32.xlu2 %v3391_v61, %s4263_s15 }
 0x1a7   : > { %1485 = vrot.lane.b32.xlu1 %v4557_v47, %s4263_s15 }
 0x1a8   : > { %v4658_v16 = vpop.permute.xlu2 %2133  ;;  %v4688_v27 = vpop.permute.xlu0 %2347 }
 0x1a9   : > { %v4660_v17 = vpop.permute.xlu1 %1489 }
 0x1ae   : > { %1430 = vrot.lane.b32.xlu2 %v4589_v59, %s4262_s22 }
 0x1af   : > { %2125 = vrot.lane.b32.xlu1 %v4555_v44, %s4259_s30 }
 0x1b0   : > { %v4668_v19 = vpop.permute.xlu2 %1697  ;;  %v4701_v33 = vpop.permute.xlu0 %2135 }
 0x1b1   : > { %v4670_v20 = vpop.permute.xlu1 %1053 }
 0x1b6   : > { %1640 = vrot.lane.b32.xlu2 %v3390_v1, %s4263_s15 }
 0x1b7   : > { %2127 = vrot.lane.b32.xlu1 %v4557_v47, %s4259_s30 }
 0x1b8   : > { %v4677_v22 = vpop.permute.xlu2 %1911 }
 0x1b9   : > { %v4679_v23 = vpop.permute.xlu1 %1267  ;;  %v4715_v40 = vpop.permute.xlu0 %2349 }
 0x1be   : > { %1428 = vrot.lane.b32.xlu2 %v3391_v61, %s4262_s22 }
 0x1bf   : > { %2341 = vrot.lane.b32.xlu1 %v4557_v47, %s4265_s23 }
 0x1c0   : > { %v4684_v25 = vpop.permute.xlu2 %1707 }
 0x1c1   : > { %v1278_v26 = vpop.permute.xlu1 %1277  ;;  %v4721_v45 = vpop.permute.xlu0 %1057 }
 0x1c6   : > { %2074 = vrot.lane.b32.xlu2 %v3393_v57, %s4264_s18 }
 0x1c7   : > { %1646 = vrot.lane.b32.xlu1 %v3393_v57, %s4263_s15 }
 0x1c8   : > { %v4690_v28 = vpop.permute.xlu2 %1921 }
 0x1c9   : > { %v4692_v29 = vpop.permute.xlu1 %1491  ;;  %v4694_v30 = vpop.f32.mrf.mxu3 }
 0x1ca   : > { %v894_v31 = vsel %vm893_vm1, %v4694_v30, -inf  ;;  %v1217_v50 = vpop.permute.xlu0 %1216 }
 0x1cb   : > { %895 = vmax.xlane.f32.xlu0 %v894_v31 }
 0x1cf   : > { %1426 = vrot.lane.b32.xlu1 %v3390_v1, %s4262_s22 }
 0x1d0   : > { %v4699_v32 = vpop.permute.xlu2 %2339 }
 0x1d1   : > { %5881 = vst [vmem:[#allocation27_spill] sm:$0xff] %v4699_v32  ;;  %v4703_v34 = vpop.permute.xlu1 %1705  ;;  %v4705_v35 = vpop.f32.mrf.mxu3 }
 0x1d2   : > { %v897_v36 = vsel %vm893_vm1, %v4705_v35, -inf  ;;  %v1433_v61 = vpop.permute.xlu0 %1432 }
 0x1d3   : > { %898 = vmax.xlane.f32.xlu0 %v897_v36  ;;  %1454 = vmatpush.bf16.msra.mxu0 %v1433_v61 }
 0x1d7   : > { %2072 = vrot.lane.b32.xlu1 %v4589_v59, %s4264_s18 }
 0x1d8   : > { %v1215_v37 = vpop.permute.xlu2 %1214 }
 0x1d9   : > { %v4711_v38 = vpop.permute.xlu1 %1055  ;;  %v4713_v39 = vpop.f32.mrf.mxu3 }
 0x1e0   : > { %v1213_v42 = vpop.permute.xlu2 %1212 }
 0x1e1   : > { %v4717_v43 = vpop.permute.xlu1 %1269  ;;  %v4719_v44 = vpop.f32.mrf.mxu3 }
 0x1e8   : > { %v4723_v46 = vpop.permute.xlu2 %1699 }
 0x1e9   : > { %v4725_v47 = vpop.permute.xlu1 %1483  ;;  %v4727_v48 = vpop.f32.mrf.mxu3 }
 0x1ea   : > { %v906_v51 = vsel %vm893_vm1, %v4727_v48, -inf }
 0x1ef   : > { %907 = vmax.xlane.f32.xlu2 %v906_v51  ;;  %v1086_v51 = vsel %vm839_vm0, %v1064_v24, 0  ;;  %v1300_v24 = vsel %vm839_vm0, %v1278_v26, 0 }
 0x1f0   : > { %v4731_v53 = vpop.permute.xlu2 %1913 }
 0x1f1   : > { %v1066_v54 = vpop.permute.xlu1 %1065  ;;  %v4733_v57 = vpop.f32.mrf.mxu3 }
 0x1f2   : > { %v1089_v59 = vsel %vm839_vm0, %v1066_v54, 0  ;;  %v909_v1 = vsel %vm893_vm1, %v4733_v57, -inf  ;;  %v900_v54 = vsel %vm893_vm1, %v4713_v39, -inf }
 0x1f3   : > { %1095 = vmatpush.bf16.xpose.msrb.mxu1 %v1089_v59 }
 0x1f7   : > { %910 = vmax.xlane.f32.xlu2 %v909_v1  ;;  %v1083_v1 = vsel %vm839_vm0, %v4579_v55, 0 }
 0x1f8   : > { %v4738_v31 = vpop.permute.xlu2 %1644 }
 0x1f9   : > { %v1280_v36 = vpop.permute.xlu1 %1279  ;;  %v4740_v32 = vpop.f32.mrf.mxu3 }
 0x1fa   : > { %v1303_v21 = vsel %vm839_vm0, %v1280_v36, 0  ;;  %v912_v15 = vsel %vm893_vm1, %v4740_v32, -inf  ;;  %v903_v36 = vsel %vm893_vm1, %v4719_v44, -inf }
 0x1fb   : > { %1096 = vmatpush.bf16.xpose.msrb.mxu1 %v1086_v51  ;;  %1309 = vmatpush.bf16.xpose.msrb.mxu3 %v1303_v21 }
 0x1fc   : > { %913 = vmax.xlane.f32.xlu0 %v912_v15  ;;  %v1080_v15 = vsel %vm839_vm0, %v4581_v56, 0  ;;  %v1294_v56 = vsel %vm839_vm0, %v4591_v60, 0  ;;  %v1511_v60 = vsel %vm839_vm0, %v4660_v17, 0 }
 0x200   : > { %v4748_v59 = vpop.permute.xlu2 %1642 }
 0x201   : > { %v1494_v61 = vpop.permute.xlu1 %1493  ;;  %901 = vmax.xlane.f32.xlu1 %v900_v54  ;;  %v1297_v54 = vsel %vm839_vm0, %v4587_v58, 0  ;;  %v4760_v26 = vpop.f32.mrf.mxu3  ;;  %v1731_v58 = vsel %vm839_vm0, %v4684_v25, 0 }
 0x202   : > { %v1517_v55 = vsel %vm839_vm0, %v1494_v61, 0 }
 0x203   : > { %1097 = vmatpush.bf16.xpose.msrb.mxu1 %v1083_v1  ;;  %1310 = vmatpush.bf16.xpose.msrb.mxu3 %v1300_v24  ;;  %v915_v1 = vsel %vm893_vm1, %v4760_v26, -inf }
 0x208   : > { %v1431_v51 = vpop.permute.xlu2 %1430 }
 0x209   : > { %v1219_v21 = vpop.permute.xlu1 %1218  ;;  %904 = vmax.xlane.f32.xlu1 %v903_v36  ;;  %1455 = vmatpush.bf16.msra.mxu0 %v1431_v51 }
 0x20a   : > { %1240 = vmatpush.bf16.msrb.mxu2 %v1219_v21 }
 0x20b   : > { %1098 = vmatpush.bf16.xpose.msrb.mxu1 %v1080_v15  ;;  %1311 = vmatpush.bf16.xpose.msrb.mxu3 %v1297_v54 }
 0x20e   : > { %1241 = vmatpush.bf16.msrb.mxu2 %v1217_v50  ;;  %v1514_v50 = vsel %vm839_vm0, %v4692_v29, 0  ;;  %v1508_v29 = vsel %vm839_vm0, %v4604_v63, 0  ;;  %v2159_v63 = vsel %vm839_vm0, %v4701_v33, 0 }
 0x210   : > { %v1641_v24 = vpop.permute.xlu2 %1640 }
 0x211   : > { %v1272_v36 = vpop.permute.xlu1 %1271  ;;  %916 = vmax.xlane.f32.xlu1 %v915_v1 }
 0x212   : > { %3267 = vmatmul.msk.bf16.vlgmr.msrb.gmra.mxu1 %vm839_vm0, %v4616_v4  ;;  %1242 = vmatpush.bf16.msrb.mxu2 %v1215_v37  ;;  %v1728_v4 = vsel %vm839_vm0, %v4703_v34, 0  ;;  %v1725_v37 = vsel %vm839_vm0, %v4602_v62, 0  ;;  %v1942_v62 = vsel %vm839_vm0, %v4651_v14, 0  ;;  %v1936_v14 = vsel %vm839_vm0, %v4614_v3, 0 }
 0x213   : > { %1523 = vmatpush.bf16.xpose.msra.mxu1 %v1517_v55  ;;  %1312 = vmatpush.bf16.xpose.msrb.mxu3 %v1294_v56  ;;  %v2153_v34 = vsel %vm839_vm0, %v4636_v10, 0  ;;  %v2373_v3 = vsel %vm839_vm0, %v4715_v40, 0  ;;  %v2370_v10 = vsel %vm839_vm0, %v4688_v27, 0 }
 0x216   : > { %1243 = vmatpush.bf16.msrb.mxu2 %v1213_v42 }
 0x218   : > { %v1429_v61 = vpop.permute.xlu2 %1428 }
 0x219   : > { %v1486_v51 = vpop.permute.xlu1 %1485  ;;  %1456 = vmatpush.bf16.msra.mxu0 %v1429_v61 }
 0x21a   : > { %3275 = vmatmul.msk.bf16.vlgmr.msrb.gmra.mxu3 %vm839_vm0, %v4566_v49  ;;  %v1945_v49 = vsel %vm839_vm0, %v4690_v28, 0 }
 0x21b   : > { %1524 = vmatpush.bf16.xpose.msra.mxu1 %v1514_v50  ;;  %1737 = vmatpush.bf16.xpose.msra.mxu3 %v1731_v58 }
 0x220   : > { %v4890_v56 = vpop.permute.xlu2 %2074 }
 0x221   : > { %v4778_v25 = vpop.permute.xlu1 %2125 }
 0x222   : > { %3268 = vmatmul.msk.bf16.gmra.mxu1 %vm839_vm0, %v4670_v20  ;;  %v1722_v20 = vsel %vm839_vm0, %v4606_v0, 0  ;;  %v2156_v0 = vsel %vm839_vm0, %v4658_v16, 0  ;;  %v2150_v16 = vsel %vm839_vm0, %v4553_v41, 0  ;;  %v2367_v41 = vsel %vm839_vm0, %v4649_v13, 0 }
 0x223   : > { %1525 = vmatpush.bf16.xpose.msra.mxu1 %v1511_v60  ;;  %1738 = vmatpush.bf16.xpose.msra.mxu3 %v1728_v4 }
 0x229   : > { %v4788_v17 = vpop.permute.xlu1 %2127 }
 0x22a   : > { %3276 = vmatmul.msk.bf16.gmra.mxu3 %vm839_vm0, %v4679_v23  ;;  %v1939_v23 = vsel %vm839_vm0, %v4612_v2, 0 }
 0x22b   : > { %1526 = vmatpush.bf16.xpose.msra.mxu1 %v1508_v29  ;;  %1739 = vmatpush.bf16.xpose.msra.mxu3 %v1725_v37 }
 0x231   : > { %v4798_v28 = vpop.permute.xlu1 %2341 }
 0x232   : > { %3269 = vmatmul.msk.bf16.gmra.mxu1 %vm839_vm0, %v4711_v38 }
 0x233   : > { %1951 = vmatpush.bf16.xpose.msrb.mxu1 %v1945_v49  ;;  %1740 = vmatpush.bf16.xpose.msra.mxu3 %v1722_v20 }
 0x239   : > { %v1647_v33 = vpop.permute.xlu1 %1646 }
 0x23a   : > { %3277 = vmatmul.msk.bf16.gmra.mxu3 %vm839_vm0, %v4717_v43  ;;  %1668 = vmatpush.bf16.msra.mxu2 %v1647_v33 }
 0x23b   : > { %1952 = vmatpush.bf16.xpose.msrb.mxu1 %v1942_v62  ;;  %2165 = vmatpush.bf16.xpose.msrb.mxu3 %v2159_v63 }
 0x23e   : > { %1669 = vmatpush.bf16.msra.mxu2 %v4738_v31 }
 0x241   : > { %v1427_v2 = vpop.permute.xlu1 %1426 }
 0x242   : > { %3270 = vmatmul.msk.bf16.gmra.mxu1 %vm839_vm0, %v4721_v45  ;;  %1457 = vmatpush.bf16.msra.mxu0 %v1427_v2 }
 0x243   : > { %1953 = vmatpush.bf16.xpose.msrb.mxu1 %v1939_v23  ;;  %2166 = vmatpush.bf16.xpose.msrb.mxu3 %v2156_v0 }
 0x244   : > { %1670 = vmatpush.bf16.msra.mxu2 %v4748_v59 }
 0x248   : > { %1671 = vmatpush.bf16.msra.mxu2 %v1641_v24 }
 0x249   : > { %v4853_v27 = vpop.permute.xlu1 %2072 }
 0x24a   : > { %3278 = vmatmul.msk.bf16.gmra.mxu3 %vm839_vm0, %v1272_v36 }
 0x24b   : > { %1954 = vmatpush.bf16.xpose.msrb.mxu1 %v1936_v14  ;;  %2167 = vmatpush.bf16.xpose.msrb.mxu3 %v2153_v34 }
 0x252   : > { %3283 = vmatmul.msk.bf16.vlgmr.msra.gmra.mxu1 %vm839_vm0, %v4626_v7  ;;  %v2364_v7 = vsel %vm839_vm0, %v4624_v6, 0 }
 0x253   : > { %2168 = vmatpush.bf16.xpose.msrb.mxu3 %v2150_v16  ;;  %2379 = vmatpush.bf16.xpose.msra.mxu1 %v2373_v3 }
 0x25a   : > { %3291 = vmatmul.msk.bf16.vlgmr.msra.gmra.mxu3 %vm839_vm0, %v4571_v52  ;;  %v4840_v52 = vpop.permute.xlu0 %1860 }
 0x25b   : > { %2380 = vmatpush.bf16.xpose.msra.mxu1 %v2370_v10 }
 0x262   : > { %3284 = vmatmul.msk.bf16.gmra.mxu1 %vm839_vm0, %v4622_v5  ;;  %v896_v6 = vpop.xlane.xlu0 %895  ;;  %v908_v29 = vpop.xlane.xlu2 %907 }
 0x263   : > { %2381 = vmatpush.bf16.xpose.msra.mxu1 %v2367_v41  ;;  %v918_v13 = vsub.f32 %v4694_v30, %v896_v6 }
 0x265   : > { %v926_v40 = vmul.f32 1.442695, %v918_v13 }
 0x267   : > { %3711 = vpow2.f32 %v926_v40 }
 0x26a   : > { %3292 = vmatmul.msk.bf16.gmra.mxu3 %vm839_vm0, %v4632_v8  ;;  %v899_v45 = vpop.xlane.xlu0 %898  ;;  %v911_v23 = vpop.xlane.xlu2 %910 }
 0x26b   : > { %2382 = vmatpush.bf16.xpose.msra.mxu1 %v2364_v7  ;;  %v923_v33 = vsub.f32 %v4733_v57, %v911_v23 }
 0x272   : > { %3285 = vmatmul.msk.bf16.gmra.mxu1 %vm839_vm0, %v4725_v47  ;;  %v919_v47 = vsub.f32 %v4705_v35, %v899_v45  ;;  %v914_v3 = vpop.xlane.xlu0 %913 }
 0x273   : > { %v924_v57 = vsub.f32 %v4740_v32, %v914_v3 }
 0x274   : > { %v902_v30 = vpop.xlane.xlu1 %901  ;;  %v928_v54 = vmul.f32 1.442695, %v919_v47 }
 0x275   : > { %v920_v21 = vsub.f32 %v4713_v39, %v902_v30  ;;  %v938_v6 = vmul.f32 1.442695, %v924_v57 }
 0x276   : > { %3713 = vpow2.f32 %v928_v54  ;;  %v5883_v54 = vld [vmem:[#allocation26_spill] sm:$0xff] }
 0x277   : > { %v930_v35 = vmul.f32 1.442695, %v920_v21 }
 0x279   : > { %3715 = vpow2.f32 %v930_v35 }
 0x27a   : > { %3293 = vmatmul.msk.bf16.gmra.mxu3 %vm839_vm0, %v4668_v19 }
 0x282   : > { %3286 = vmatmul.msk.bf16.gmra.mxu1 %vm839_vm0, %v1486_v51 }
 0x28a   : > { %3294 = vmatmul.msk.bf16.gmra.mxu3 %vm839_vm0, %v4723_v46  ;;  %v4867_v46 = vpop.eup %3711 }
 0x28f   : > { %v4844_v5 = vpop.f32.mrf.mxu1 }
 0x290   : > { %v1120_v8 = vsel %vm893_vm1, %v4844_v5, -inf }
 0x291   : > { %1121 = vmax.xlane.f32.xlu0 %v1120_v8 }
 0x292   : > { %3299 = vmatmul.msk.bf16.vlgmr.msrb.gmra.mxu1 %vm839_vm0, %v4634_v9 }
 0x297   : > { %v4851_v19 = vpop.f32.mrf.mxu1 }
 0x298   : > { %v1123_v38 = vsel %vm893_vm1, %v4851_v19, -inf }
 0x299   : > { %1124 = vmax.xlane.f32.xlu1 %v1123_v38 }
 0x29a   : > { %3307 = vmatmul.msk.bf16.vlgmr.msrb.gmra.mxu3 %vm839_vm0, %v4643_v12  ;;  %v942_v12 = vsel %vm893_vm1, %v4867_v46, 0.0 }
 0x29d   : > { %v4859_v42 = vpop.f32.mrf.mxu3 }
 0x29e   : > { %v1334_v9 = vsel %vm893_vm1, %v4859_v42, -inf }
 0x29f   : > { %v4863_v43 = vpop.f32.mrf.mxu1  ;;  %1335 = vmax.xlane.f32.xlu2 %v1334_v9 }
 0x2a0   : > { %v1126_v24 = vsel %vm893_vm1, %v4863_v43, -inf }
 0x2a2   : > { %3300 = vmatmul.msk.bf16.gmra.mxu1 %vm839_vm0, %v4662_v18  ;;  %v905_v18 = vpop.xlane.xlu1 %904 }
 0x2a3   : > { %v921_v55 = vsub.f32 %v4719_v44, %v905_v18  ;;  %v4896_v44 = vpop.eup %3713 }
 0x2a4   : > { %v4898_v50 = vpop.eup %3715  ;;  %v945_v51 = vsel %vm893_vm1, %v4896_v44, 0.0 }
 0x2a5   : > { %v4870_v31 = vpop.f32.mrf.mxu3  ;;  %v932_v58 = vmul.f32 1.442695, %v921_v55 }
 0x2a6   : > { %v1337_v59 = vsel %vm893_vm1, %v4870_v31, -inf }
 0x2a7   : > { %v4877_v15 = vpop.f32.mrf.mxu1  ;;  %943 = vadd.xlane.f32.xlu2 %v942_v12  ;;  %1338 = vmax.xlane.f32.xlu0 %v1337_v59  ;;  %3717 = vpow2.f32 %v932_v58 }
 0x2a8   : > { %v1129_v60 = vsel %vm893_vm1, %v4877_v15, -inf }
 0x2aa   : > { %3308 = vmatmul.msk.bf16.gmra.mxu3 %vm839_vm0, %v4641_v11 }
 0x2ad   : > { %v4882_v1 = vpop.f32.mrf.mxu3  ;;  %v4912_v37 = vpop.eup %3717 }
 0x2ae   : > { %v1340_v39 = vsel %vm893_vm1, %v4882_v1, -inf  ;;  %v951_v20 = vsel %vm893_vm1, %v4912_v37, 0.0 }
 0x2af   : > { %v4888_v36 = vpop.f32.mrf.mxu1  ;;  %1127 = vmax.xlane.f32.xlu0 %v1126_v24  ;;  %1341 = vmax.xlane.f32.xlu2 %v1340_v39 }
 0x2b0   : > { %v1132_v11 = vsel %vm893_vm1, %v4888_v36, -inf }
 0x2b1   : > { %1133 = vmax.xlane.f32.xlu1 %v1132_v11  ;;  %v917_v11 = vpop.xlane.xlu1 %916 }
 0x2b2   : > { %3301 = vmatmul.msk.bf16.gmra.mxu1 %vm839_vm0, %v4677_v22  ;;  %v948_v22 = vsel %vm893_vm1, %v4898_v50, 0.0  ;;  %v925_v58 = vsub.f32 %v4760_v26, %v917_v11 }
 0x2b5   : > { %v4900_v61 = vpop.f32.mrf.mxu3 }
 0x2b6   : > { %v1343_v63 = vsel %vm893_vm1, %v4900_v61, -inf }
 0x2b7   : > { %v4906_v4 = vpop.f32.mrf.mxu1  ;;  %946 = vadd.xlane.f32.xlu0 %v945_v51  ;;  %1130 = vmax.xlane.f32.xlu2 %v1129_v60 }
 0x2b8   : > { %v1135_v41 = vsel %vm893_vm1, %v4906_v4, -inf }
 0x2b9   : > { %949 = vadd.xlane.f32.xlu1 %v948_v22 }
 0x2ba   : > { %3309 = vmatmul.msk.bf16.gmra.mxu3 %vm839_vm0, %v4778_v25  ;;  %v922_v25 = vsub.f32 %v4727_v48, %v908_v29  ;;  %v936_v48 = vmul.f32 1.442695, %v923_v33 }
 0x2bd   : > { %v4914_v49 = vpop.f32.mrf.mxu3 }
 0x2be   : > { %v1346_v34 = vsel %vm893_vm1, %v4914_v49, -inf }
 0x2bf   : > { %v4920_v62 = vpop.f32.mrf.mxu1  ;;  %952 = vadd.xlane.f32.xlu2 %v951_v20  ;;  %1344 = vmax.xlane.f32.xlu0 %v1343_v63  ;;  %v940_v20 = vmul.f32 1.442695, %v925_v58  ;;  %v5884_v63 = vld [vmem:[#allocation27_spill] sm:$0xff] }
 0x2c0   : > { %v1138_v0 = vsel %vm893_vm1, %v4920_v62, -inf }
 0x2c2   : > { %3302 = vmatmul.msk.bf16.gmra.mxu1 %vm839_vm0, %v4731_v53  ;;  %v934_v53 = vmul.f32 1.442695, %v922_v25 }
 0x2c4   : > { %3719 = vpow2.f32 %v934_v53 }
 0x2c5   : > { %v4928_v14 = vpop.f32.mrf.mxu3  ;;  %3721 = vpow2.f32 %v936_v48 }
 0x2c6   : > { %v1349_v2 = vsel %vm893_vm1, %v4928_v14, -inf  ;;  %3723 = vpow2.f32 %v938_v6 }
 0x2c7   : > { %v4934_v16 = vpop.f32.mrf.mxu1  ;;  %1139 = vmax.xlane.f32.xlu2 %v1138_v0  ;;  %1347 = vmax.xlane.f32.xlu0 %v1346_v34  ;;  %3725 = vpow2.f32 %v940_v20 }
 0x2c8   : > { %1350 = vmax.xlane.f32.xlu1 %v1349_v2  ;;  %v1141_v12 = vsel %vm893_vm1, %v4934_v16, -inf }
 0x2ca   : > { %3310 = vmatmul.msk.bf16.gmra.mxu3 %vm839_vm0, %v4788_v17  ;;  %v4947_v13 = vpop.eup %3719  ;;  %v5882_v17 = vld [vmem:[#allocation25_spill] sm:$0xff] }
 0x2cb   : > { %v4951_v38 = vpop.eup %3721  ;;  %v954_v40 = vsel %vm893_vm1, %v4947_v13, 0.0 }
 0x2cc   : > { %v957_v9 = vsel %vm893_vm1, %v4951_v38, 0.0  ;;  %v4961_v45 = vpop.eup %3723 }
 0x2cd   : > { %v4939_v10 = vpop.f32.mrf.mxu3  ;;  %v960_v59 = vsel %vm893_vm1, %v4961_v45, 0.0  ;;  %v5002_v33 = vpop.eup %3725 }
 0x2ce   : > { %v1352_v7 = vsel %vm893_vm1, %v4939_v10, -inf  ;;  %v963_v53 = vsel %vm893_vm1, %v5002_v33, 0.0 }
 0x2cf   : > { %v4945_v8 = vpop.f32.mrf.mxu1  ;;  %1136 = vmax.xlane.f32.xlu0 %v1135_v41  ;;  %1353 = vmax.xlane.f32.xlu2 %v1352_v7 }
 0x2d0   : > { %v1548_v29 = vsel %vm893_vm1, %v4945_v8, -inf }
 0x2d2   : > { %3315 = vmatmul.msk.bf16.vlgmr.msra.gmra.mxu1 %vm839_vm0, %v5882_v17 }
 0x2d5   : > { %v4953_v32 = vpop.f32.mrf.mxu3 }
 0x2d6   : > { %v1355_v55 = vsel %vm893_vm1, %v4953_v32, -inf }
 0x2d7   : > { %v4959_v30 = vpop.f32.mrf.mxu1  ;;  %955 = vadd.xlane.f32.xlu0 %v954_v40  ;;  %958 = vadd.xlane.f32.xlu2 %v957_v9 }
 0x2d8   : > { %v1551_v35 = vsel %vm893_vm1, %v4959_v30, -inf }
 0x2dd   : > { %v4963_v47 = vpop.f32.mrf.mxu3 }
 0x2de   : > { %v1762_v25 = vsel %vm893_vm1, %v4963_v47, -inf }
 0x2df   : > { %v4969_v21 = vpop.f32.mrf.mxu1  ;;  %1142 = vmax.xlane.f32.xlu0 %v1141_v12  ;;  %961 = vadd.xlane.f32.xlu2 %v960_v59 }
 0x2e0   : > { %v1554_v60 = vsel %vm893_vm1, %v4969_v21, -inf }
 0x2e2   : > { %3316 = vmatmul.msk.bf16.gmra.mxu1 %vm839_vm0, %v5883_v54 }
 0x2e5   : > { %v4973_v18 = vpop.f32.mrf.mxu3 }
 0x2e6   : > { %v1765_v24 = vsel %vm893_vm1, %v4973_v18, -inf }
 0x2e7   : > { %v4981_v39 = vpop.f32.mrf.mxu1  ;;  %1552 = vmax.xlane.f32.xlu2 %v1551_v35  ;;  %1356 = vmax.xlane.f32.xlu0 %v1355_v55 }
 0x2e8   : > { %1766 = vmax.xlane.f32.xlu1 %v1765_v24  ;;  %v1557_v40 = vsel %vm893_vm1, %v4981_v39, -inf }
 0x2ed   : > { %v4984_v51 = vpop.f32.mrf.mxu3 }
 0x2ee   : > { %v1768_v26 = vsel %vm893_vm1, %v4984_v51, -inf }
 0x2ef   : > { %v4990_v22 = vpop.f32.mrf.mxu1  ;;  %1555 = vmax.xlane.f32.xlu2 %v1554_v60  ;;  %1549 = vmax.xlane.f32.xlu0 %v1548_v29 }
 0x2f0   : > { %v1560_v2 = vsel %vm893_vm1, %v4990_v22, -inf }
 0x2f2   : > { %3317 = vmatmul.msk.bf16.gmra.mxu1 %vm839_vm0, %v5884_v63 }
 0x2f5   : > { %v4994_v23 = vpop.f32.mrf.mxu3 }
 0x2f6   : > { %v1771_v54 = vsel %vm893_vm1, %v4994_v23, -inf }
 0x2f7   : > { %v5000_v0 = vpop.f32.mrf.mxu1  ;;  %1769 = vmax.xlane.f32.xlu2 %v1768_v26  ;;  %1763 = vmax.xlane.f32.xlu0 %v1762_v25 }
 0x2f8   : > { %v1563_v60 = vsel %vm893_vm1, %v5000_v0, -inf }
 0x2fd   : > { %v5004_v34 = vpop.f32.mrf.mxu3 }
 0x2fe   : > { %v1774_v7 = vsel %vm893_vm1, %v5004_v34, -inf }
 0x2ff   : > { %v5010_v48 = vpop.f32.mrf.mxu1  ;;  %1561 = vmax.xlane.f32.xlu2 %v1560_v2  ;;  %964 = vadd.xlane.f32.xlu0 %v963_v53 }
 0x302   : > { %3318 = vmatmul.msk.bf16.gmra.mxu1 %vm839_vm0, %v4798_v28 }
 0x304   : > { %v1122_v3 = vpop.xlane.xlu0 %1121 }
 0x305   : > { %v1144_v57 = vsub.f32 %v4844_v5, %v1122_v3  ;;  %v5015_v41 = vpop.f32.mrf.mxu3  ;;  %v1566_v5 = vsel %vm893_vm1, %v5010_v48, -inf }
 0x306   : > { %v1777_v6 = vsel %vm893_vm1, %v5015_v41, -inf }
 0x307   : > { %v5021_v17 = vpop.f32.mrf.mxu1  ;;  %1775 = vmax.xlane.f32.xlu2 %v1774_v7  ;;  %1778 = vmax.xlane.f32.xlu1 %v1777_v6  ;;  %v1152_v28 = vmul.f32 1.442695, %v1144_v57 }
 0x308   : > { %1558 = vmax.xlane.f32.xlu0 %v1557_v40  ;;  %v1569_v3 = vsel %vm893_vm1, %v5021_v17, -inf }
 0x309   : > { %3727 = vpow2.f32 %v1152_v28 }
 0x30c   : > { %v1125_v25 = vpop.xlane.xlu1 %1124 }
 0x30d   : > { %v5025_v9 = vpop.f32.mrf.mxu3 }
 0x30e   : > { %v1780_v12 = vsel %vm893_vm1, %v5025_v9, -inf }
 0x30f   : > { %v5031_v59 = vpop.f32.mrf.mxu1  ;;  %1567 = vmax.xlane.f32.xlu2 %v1566_v5  ;;  %1781 = vmax.xlane.f32.xlu1 %v1780_v12  ;;  %v5035_v55 = vpop.eup %3727 }
 0x310   : > { %1772 = vmax.xlane.f32.xlu0 %v1771_v54  ;;  %v1168_v11 = vsel %vm893_vm1, %v5035_v55, 0.0  ;;  %v1976_v2 = vsel %vm893_vm1, %v5031_v59, -inf }
 0x312   : > { %v1336_v35 = vpop.xlane.xlu2 %1335 }
 0x313   : > { %v1358_v24 = vsub.f32 %v4859_v42, %v1336_v35  ;;  %v1145_v42 = vsub.f32 %v4851_v19, %v1125_v25 }
 0x315   : > { %v1366_v20 = vmul.f32 1.442695, %v1358_v24  ;;  %v1154_v7 = vmul.f32 1.442695, %v1145_v42  ;;  %v5057_v19 = vpop.f32.mrf.mxu3 }
 0x317   : > { %v5040_v58 = vpop.f32.mrf.mxu1  ;;  %1169 = vadd.xlane.f32.xlu1 %v1168_v11  ;;  %3729 = vpow2.f32 %v1366_v20  ;;  %v1783_v11 = vsel %vm893_vm1, %v5057_v19, -inf }
 0x318   : > { %1564 = vmax.xlane.f32.xlu0 %v1563_v60  ;;  %v1979_v29 = vsel %vm893_vm1, %v5040_v58, -inf  ;;  %3731 = vpow2.f32 %v1154_v7 }
 0x319   : > { %1980 = vmax.xlane.f32.xlu2 %v1979_v29 }
 0x31a   : > { %v944_v63 = vpop.xlane.xlu2 %943  ;;  %v1339_v26 = vpop.xlane.xlu0 %1338 }
 0x31b   : > { %v1359_v54 = vsub.f32 %v4870_v31, %v1339_v26  ;;  %3733 = vrcp.f32 %v944_v63 }
 0x31d   : > { %v5055_v28 = vpop.eup %3729  ;;  %v1368_v60 = vmul.f32 1.442695, %v1359_v54 }
 0x31e   : > { %v1382_v35 = vsel %vm893_vm1, %v5055_v28, 0.0  ;;  %v5066_v25 = vpop.eup %3731 }
 0x31f   : > { %v5049_v53 = vpop.f32.mrf.mxu1  ;;  %1977 = vmax.xlane.f32.xlu1 %v1976_v2  ;;  %v1171_v63 = vsel %vm893_vm1, %v5066_v25, 0.0 }
 0x320   : > { %1570 = vmax.xlane.f32.xlu0 %v1569_v3  ;;  %v1982_v57 = vsel %vm893_vm1, %v5049_v53, -inf }
 0x321   : > { %1983 = vmax.xlane.f32.xlu2 %v1982_v57  ;;  %v3734_v26 = vpop.eup %3733 }
 0x322   : > { %v1128_v6 = vpop.xlane.xlu0 %1127  ;;  %v1342_v40 = vpop.xlane.xlu2 %1341 }
 0x323   : > { %v1146_v42 = vsub.f32 %v4863_v43, %v1128_v6 }
 0x324   : > { %v1134_v5 = vpop.xlane.xlu1 %1133 }
 0x325   : > { %v1148_v12 = vsub.f32 %v4888_v36, %v1134_v5  ;;  %v1156_v7 = vmul.f32 1.442695, %v1146_v42 }
 0x327   : > { %v1160_v24 = vmul.f32 1.442695, %v1148_v12  ;;  %1383 = vadd.xlane.f32.xlu1 %v1382_v35 }
 0x328   : > { %1784 = vmax.xlane.f32.xlu0 %v1783_v11  ;;  %v1360_v11 = vsub.f32 %v4882_v1, %v1342_v40 }
 0x329   : > { %3735 = vpow2.f32 %v1160_v24 }
 0x32a   : > { %v947_v29 = vpop.xlane.xlu0 %946  ;;  %v1131_v20 = vpop.xlane.xlu2 %1130 }
 0x32b   : > { %3737 = vrcp.f32 %v947_v29  ;;  %v1147_v36 = vsub.f32 %v4877_v15, %v1131_v20  ;;  %v974_v15 = vmul.f32 %v3734_v26, %v4867_v46  ;;  %v5085_v46 = vpop.f32.mrf.mxu1  ;;  %v1370_v29 = vmul.f32 1.442695, %v1360_v11 }
 0x32c   : > { %3739 = vpow2.f32 %v1368_v60  ;;  %v950_v43 = vpop.xlane.xlu1 %949 }
 0x32d   : > { %v1158_v31 = vmul.f32 1.442695, %v1147_v36 }
 0x32f   : > { %v5069_v2 = vpop.eup %3735  ;;  %3741 = vpow2.f32 %v1158_v31 }
 0x330   : > { %1172 = vadd.xlane.f32.xlu0 %v1171_v63  ;;  %v1180_v3 = vsel %vm893_vm1, %v5069_v2, 0.0  ;;  %3743 = vpow2.f32 %v1156_v7 }
 0x331   : > { %v3738_v57 = vpop.eup %3737  ;;  %1181 = vadd.xlane.f32.xlu2 %v1180_v3 }
 0x332   : > { %v975_v5 = vmul.f32 %v3738_v57, %v4896_v44  ;;  %v953_v12 = vpop.xlane.xlu2 %952  ;;  %v1345_v54 = vpop.xlane.xlu0 %1344 }
 0x333   : > { %v5077_v6 = vpop.eup %3739  ;;  %3745 = vrcp.f32 %v953_v12 }
 0x334   : > { %v982_v35 = vpack.c.bf16 %v975_v5, %v974_v15  ;;  %v1385_v44 = vsel %vm893_vm1, %v5077_v6, 0.0  ;;  %3747 = vrcp.f32 %v950_v43 }
 0x335   : > { %v5079_v24 = vpop.eup %3741  ;;  %3749 = vpow2.f32 %v1370_v29 }
 0x336   : > { %3263 = vmatmul.msk.bf16.vlgmr.msrb.gmra.mxu0 %vm893_vm1, %v982_v35  ;;  %v1177_v60 = vsel %vm893_vm1, %v5079_v24, 0.0  ;;  %v5091_v31 = vpop.eup %3743 }
 0x337   : > { %1882 = vmatpush.bf16.msrb.mxu0 %v4840_v52  ;;  %1178 = vadd.xlane.f32.xlu1 %v1177_v60  ;;  %v1174_v15 = vsel %vm893_vm1, %v5091_v31, 0.0 }
 0x338   : > { %1386 = vadd.xlane.f32.xlu0 %v1385_v44 }
 0x339   : > { %v3746_v42 = vpop.eup %3745 }
 0x33a   : > { %v1140_v20 = vpop.xlane.xlu2 %1139  ;;  %v1348_v36 = vpop.xlane.xlu0 %1347  ;;  %v977_v7 = vmul.f32 %v3746_v42, %v4912_v37 }
 0x33b   : > { %v1362_v1 = vsub.f32 %v4914_v49, %v1348_v36  ;;  %v1351_v40 = vpop.xlane.xlu1 %1350  ;;  %v3748_v3 = vpop.eup %3747  ;;  %v1150_v57 = vsub.f32 %v4920_v62, %v1140_v20  ;;  %v1361_v62 = vsub.f32 %v4900_v61, %v1345_v54 }
 0x33c   : > { %v1363_v26 = vsub.f32 %v4928_v14, %v1351_v40  ;;  %v5098_v49 = vpop.f32.mrf.mxu1  ;;  %v976_v14 = vmul.f32 %v3748_v3, %v4898_v50  ;;  %v5101_v35 = vpop.eup %3749  ;;  %v1985_v40 = vsel %vm893_vm1, %v5085_v46, -inf }
 0x33d   : > { %v1374_v63 = vmul.f32 1.442695, %v1362_v1  ;;  %v1164_v43 = vmul.f32 1.442695, %v1150_v57  ;;  %v1388_v37 = vsel %vm893_vm1, %v5101_v35, 0.0 }
 0x33e   : > { %v1376_v52 = vmul.f32 1.442695, %v1363_v26  ;;  %v983_v11 = vpack.c.bf16 %v977_v7, %v976_v14  ;;  %v1372_v20 = vmul.f32 1.442695, %v1361_v62 }
 0x33f   : > { %3751 = vpow2.f32 %v1374_v63 }
 0x340   : > { %1175 = vadd.xlane.f32.xlu0 %v1174_v15  ;;  %3753 = vpow2.f32 %v1376_v52 }
 0x341   : > { %3755 = vpow2.f32 %v1164_v43 }
 0x342   : > { %v1137_v5 = vpop.xlane.xlu0 %1136  ;;  %v1354_v12 = vpop.xlane.xlu2 %1353 }
 0x344   : > { %v5115_v54 = vpop.f32.mrf.mxu1 }
 0x345   : > { %v5103_v60 = vpop.eup %3751  ;;  %v1991_v26 = vsel %vm893_vm1, %v5115_v54, -inf }
 0x346   : > { %3264 = vmatmul.msk.bf16.gmra.mxu0 %vm893_vm1, %v983_v11  ;;  %v5107_v44 = vpop.eup %3753  ;;  %v1394_v29 = vsel %vm893_vm1, %v5103_v60, 0.0 }
 0x347   : > { %1395 = vadd.xlane.f32.xlu2 %v1394_v29  ;;  %v1397_v50 = vsel %vm893_vm1, %v5107_v44, 0.0  ;;  %v5117_v1 = vpop.eup %3755  ;;  %v1149_v29 = vsub.f32 %v4906_v4, %v1137_v5  ;;  %v1364_v4 = vsub.f32 %v4939_v10, %v1354_v12 }
 0x348   : > { %1389 = vadd.xlane.f32.xlu0 %v1388_v37  ;;  %1398 = vadd.xlane.f32.xlu1 %v1397_v50  ;;  %v1186_v42 = vsel %vm893_vm1, %v5117_v1, 0.0 }
 0x34a   : > { %v956_v36 = vpop.xlane.xlu0 %955  ;;  %v959_v61 = vpop.xlane.xlu2 %958 }
 0x34b   : > { %3757 = vrcp.f32 %v956_v36 }
 0x34c   : > { %3759 = vrcp.f32 %v959_v61  ;;  %v5130_v11 = vpop.f32.mrf.mxu1 }
 0x34d   : > { %3761 = vpow2.f32 %v1372_v20 }
 0x34f   : > { %1992 = vmax.xlane.f32.xlu2 %v1991_v26  ;;  %v1988_v26 = vsel %vm893_vm1, %v5098_v49, -inf }
 0x350   : > { %1986 = vmax.xlane.f32.xlu0 %v1985_v40  ;;  %1187 = vadd.xlane.f32.xlu1 %v1186_v42  ;;  %v1378_v42 = vmul.f32 1.442695, %v1364_v4 }
 0x351   : > { %v3758_v63 = vpop.eup %3757 }
 0x352   : > { %v3760_v52 = vpop.eup %3759  ;;  %v1143_v3 = vpop.xlane.xlu0 %1142  ;;  %v978_v15 = vmul.f32 %v3758_v63, %v4947_v13  ;;  %v1162_v13 = vmul.f32 1.442695, %v1149_v29 }
 0x353   : > { %v962_v57 = vpop.xlane.xlu2 %961  ;;  %v1151_v7 = vsub.f32 %v4934_v16, %v1143_v3  ;;  %v979_v14 = vmul.f32 %v3760_v52, %v4951_v38  ;;  %v5128_v43 = vpop.eup %3761  ;;  %v1994_v16 = vsel %vm893_vm1, %v5130_v11, -inf }
 0x354   : > { %v1391_v50 = vsel %vm893_vm1, %v5128_v43, 0.0 }
 0x355   : > { %v1166_v62 = vmul.f32 1.442695, %v1151_v7  ;;  %v984_v37 = vpack.c.bf16 %v979_v14, %v978_v15 }
 0x357   : > { %3763 = vpow2.f32 %v1166_v62  ;;  %3265 = vmatmul.msk.bf16.gmra.mxu0 %vm893_vm1, %v984_v37 }
 0x358   : > { %1392 = vadd.xlane.f32.xlu0 %v1391_v50  ;;  %1995 = vmax.xlane.f32.xlu1 %v1994_v16  ;;  %3765 = vpow2.f32 %v1162_v13 }
 0x35a   : > { %v1357_v20 = vpop.xlane.xlu0 %1356 }
 0x35b   : > { %v1553_v38 = vpop.xlane.xlu2 %1552  ;;  %v1365_v36 = vsub.f32 %v4953_v32, %v1357_v20 }
 0x35c   : > { %v1573_v16 = vsub.f32 %v4959_v30, %v1553_v38  ;;  %v5172_v38 = vpop.f32.mrf.mxu1 }
 0x35d   : > { %v5139_v61 = vpop.eup %3763  ;;  %v1380_v40 = vmul.f32 1.442695, %v1365_v36 }
 0x35e   : > { %v1189_v5 = vsel %vm893_vm1, %v5139_v61, 0.0  ;;  %v5147_v3 = vpop.eup %3765  ;;  %v1582_v36 = vmul.f32 1.442695, %v1573_v16 }
 0x35f   : > { %1190 = vadd.xlane.f32.xlu2 %v1189_v5  ;;  %3767 = vpow2.f32 %v1380_v40  ;;  %v1183_v10 = vsel %vm893_vm1, %v5147_v3, 0.0  ;;  %v5167_v40 = vld [vmem:[#allocation3 + $0x18] sm:$0xff]  ;;  %v1767_v5 = vpop.xlane.xlu1 %1766 }
 0x360   : > { %1989 = vmax.xlane.f32.xlu0 %v1988_v26  ;;  %3769 = vpow2.f32 %v1378_v42  ;;  %5885 = vst [vmem:[#allocation25_spill] sm:$0xff] %v5167_v40 }
 0x362   : > { %v1550_v52 = vpop.xlane.xlu0 %1549 }
 0x363   : > { %v1556_v63 = vpop.xlane.xlu2 %1555  ;;  %v1572_v32 = vsub.f32 %v4945_v8, %v1550_v52 }
 0x365   : > { %v1580_v15 = vmul.f32 1.442695, %v1572_v32  ;;  %v5149_v7 = vpop.eup %3767  ;;  %v1997_v32 = vsel %vm893_vm1, %v5172_v38, -inf }
 0x366   : > { %v1403_v12 = vsel %vm893_vm1, %v5149_v7, 0.0  ;;  %v5158_v37 = vpop.eup %3769 }
 0x367   : > { %3771 = vpow2.f32 %v1580_v15  ;;  %1404 = vadd.xlane.f32.xlu2 %v1403_v12  ;;  %v1400_v13 = vsel %vm893_vm1, %v5158_v37, 0.0  ;;  %v5181_v12 = vld [vmem:[#allocation3 + $0x8] sm:$0xff] }
 0x368   : > { %1184 = vadd.xlane.f32.xlu0 %v1183_v10 }
 0x36a   : > { %v1764_v62 = vpop.xlane.xlu0 %1763 }
 0x36b   : > { %v5155_v14 = vpop.xlane.xlu2 %1769  ;;  %v1786_v8 = vsub.f32 %v4963_v47, %v1764_v62 }
 0x36d   : > { %v1794_v29 = vmul.f32 1.442695, %v1786_v8  ;;  %v5160_v50 = vpop.eup %3771 }
 0x36e   : > { %v1596_v20 = vsel %vm893_vm1, %v5160_v50, 0.0 }
 0x36f   : > { %3773 = vpow2.f32 %v1794_v29  ;;  %1597 = vadd.xlane.f32.xlu2 %v1596_v20  ;;  %v1574_v20 = vsub.f32 %v4969_v21, %v1556_v63 }
 0x370   : > { %1401 = vadd.xlane.f32.xlu0 %v1400_v13  ;;  %3775 = vrcp.f32 %v962_v57  ;;  %v1787_v57 = vsub.f32 %v4973_v18, %v1767_v5 }
 0x371   : > { %2070 = vrot.lane.b32.xlu1 %v5167_v40, %s4264_s18 }
 0x372   : > { %v965_v4 = vpop.xlane.xlu0 %964  ;;  %v1796_v10 = vmul.f32 1.442695, %v1787_v57 }
 0x373   : > { %v1562_v47 = vpop.xlane.xlu2 %1561  ;;  %3777 = vrcp.f32 %v965_v4  ;;  %v5199_v4 = vld [vmem:[#allocation3] sm:$0xff] }
 0x374   : > { %v1576_v30 = vsub.f32 %v4990_v22, %v1562_v47  ;;  %3779 = vpow2.f32 %v1582_v36  ;;  %5886 = vst [vmem:[#allocation26_spill] sm:$0xff] %v5199_v4 }
 0x375   : > { %v5174_v42 = vpop.eup %3773 }
 0x376   : > { %v1588_v26 = vmul.f32 1.442695, %v1576_v30  ;;  %v3776_v52 = vpop.eup %3775  ;;  %v1810_v15 = vsel %vm893_vm1, %v5174_v42, 0.0 }
 0x377   : > { %1811 = vadd.xlane.f32.xlu2 %v1810_v15  ;;  %v980_v62 = vmul.f32 %v3776_v52, %v4961_v45 }
 0x378   : > { %3781 = vpow2.f32 %v1588_v26  ;;  %1998 = vmax.xlane.f32.xlu0 %v1997_v32 }
 0x379   : > { %v3778_v22 = vpop.eup %3777  ;;  %1858 = vrot.lane.b32.xlu1 %v5181_v12, %s4260_s9  ;;  %3783 = vpow2.f32 %v1796_v10 }
 0x37a   : > { %v981_v18 = vmul.f32 %v3778_v22, %v5002_v33  ;;  %v5187_v29 = vpop.eup %3779  ;;  %v5195_v47 = vpop.xlane.xlu1 %1778  ;;  %v1584_v33 = vmul.f32 1.442695, %v1574_v20 }
 0x37b   : > { %v1559_v8 = vpop.xlane.xlu0 %1558  ;;  %v1599_v45 = vsel %vm893_vm1, %v5187_v29, 0.0  ;;  %v5214_v15 = vpop.xlane.xlu2 %1775 }
 0x37c   : > { %v985_v16 = vpack.c.bf16 %v981_v18, %v980_v62  ;;  %3785 = vpow2.f32 %v1584_v33  ;;  %v1575_v63 = vsub.f32 %v4981_v39, %v1559_v8 }
 0x37e   : > { %v5189_v13 = vpop.eup %3781  ;;  %3266 = vmatmul.msk.bf16.gmra.mxu0 %vm893_vm1, %v985_v16  ;;  %v1586_v57 = vmul.f32 1.442695, %v1575_v63 }
 0x37f   : > { %v1608_v36 = vsel %vm893_vm1, %v5189_v13, 0.0  ;;  %v5205_v21 = vpop.eup %3783 }
 0x380   : > { %1600 = vadd.xlane.f32.xlu0 %v1599_v45  ;;  %1609 = vadd.xlane.f32.xlu2 %v1608_v36  ;;  %v1813_v30 = vsel %vm893_vm1, %v5205_v21, 0.0  ;;  %3787 = vpow2.f32 %v1586_v57  ;;  %v5226_v36 = vpop.f32.mrf.mxu1 }
 0x381   : > { %2068 = vrot.lane.b32.xlu1 %v5199_v4, %s4264_s18 }
 0x382   : > { %v5210_v26 = vpop.xlane.xlu1 %1781  ;;  %v5212_v32 = vpop.eup %3785 }
 0x383   : > { %v5203_v5 = vpop.xlane.xlu0 %1772  ;;  %v1602_v10 = vsel %vm893_vm1, %v5212_v32, 0.0  ;;  %v1568_v16 = vpop.xlane.xlu2 %1567 }
 0x386   : > { %v5219_v8 = vpop.eup %3787 }
 0x387   : > { %v1605_v20 = vsel %vm893_vm1, %v5219_v8, 0.0 }
 0x388   : > { %1814 = vadd.xlane.f32.xlu0 %v1813_v30 }
 0x38a   : > { %v1170_v62 = vpop.xlane.xlu1 %1169 }
 0x38b   : > { %v1565_v52 = vpop.xlane.xlu0 %1564 }
 0x38c   : > { %v1577_v22 = vsub.f32 %v5000_v0, %v1565_v52  ;;  %v1578_v0 = vsub.f32 %v5010_v48, %v1568_v16 }
 0x38e   : > { %v1590_v39 = vmul.f32 1.442695, %v1577_v22  ;;  %v1592_v63 = vmul.f32 1.442695, %v1578_v0  ;;  %v1981_v22 = vpop.xlane.xlu2 %1980 }
 0x38f   : > { %v2001_v16 = vsub.f32 %v5040_v58, %v1981_v22 }
 0x390   : > { %1603 = vadd.xlane.f32.xlu0 %v1602_v10  ;;  %3789 = vpow2.f32 %v1590_v39  ;;  %v5237_v39 = vpop.f32.mrf.mxu1 }
 0x391   : > { %3791 = vpow2.f32 %v1592_v63 }
 0x392   : > { %v1978_v30 = vpop.xlane.xlu1 %1977  ;;  %3793 = vrcp.f32 %v1170_v62  ;;  %v2010_v62 = vmul.f32 1.442695, %v2001_v16 }
 0x393   : > { %v1571_v18 = vpop.xlane.xlu0 %1570  ;;  %v2000_v63 = vsub.f32 %v5031_v59, %v1978_v30 }
 0x394   : > { %v1579_v57 = vsub.f32 %v5021_v17, %v1571_v18  ;;  %v2407_v18 = vsel %vm893_vm1, %v5237_v39, -inf }
 0x396   : > { %v5230_v33 = vpop.eup %3789  ;;  %v1594_v48 = vmul.f32 1.442695, %v1579_v57 }
 0x397   : > { %v1611_v52 = vsel %vm893_vm1, %v5230_v33, 0.0 }
 0x398   : > { %1856 = vrot.lane.b32.xlu2 %v5167_v40, %s4260_s9  ;;  %1606 = vadd.xlane.f32.xlu0 %v1605_v20  ;;  %v5240_v20 = vpop.eup %3791  ;;  %v2008_v40 = vmul.f32 1.442695, %v2000_v63 }
 0x399   : > { %v3794_v0 = vpop.eup %3793  ;;  %v1614_v22 = vsel %vm893_vm1, %v5240_v20, 0.0 }
 0x39a   : > { %v1384_v17 = vpop.xlane.xlu1 %1383  ;;  %v1200_v57 = vmul.f32 %v3794_v0, %v5035_v55 }
 0x39b   : > { %v5228_v45 = vpop.xlane.xlu0 %1784 }
 0x3a0   : > { %1854 = vrot.lane.b32.xlu2 %v5199_v4, %s4260_s9  ;;  %1612 = vadd.xlane.f32.xlu0 %v1611_v52  ;;  %v1984_v4 = vpop.xlane.xlu2 %1983 }
 0x3a1   : > { %v2002_v59 = vsub.f32 %v5049_v53, %v1984_v4 }
 0x3a3   : > { %v1173_v10 = vpop.xlane.xlu0 %1172  ;;  %v2012_v0 = vmul.f32 1.442695, %v2002_v59 }
 0x3a4   : > { %3795 = vrcp.f32 %v1173_v10 }
 0x3a5   : > { %3797 = vpow2.f32 %v1594_v48 }
 0x3a6   : > { %3799 = vrcp.f32 %v1384_v17  ;;  %v1788_v17 = vsub.f32 %v4984_v51, %v5155_v14 }
 0x3a8   : > { %2408 = vmax.xlane.f32.xlu0 %v2407_v18  ;;  %v1798_v51 = vmul.f32 1.442695, %v1788_v17 }
 0x3aa   : > { %v3796_v52 = vpop.eup %3795  ;;  %v1179_v30 = vpop.xlane.xlu1 %1178 }
 0x3ab   : > { %v1201_v10 = vmul.f32 %v3796_v52, %v5066_v25  ;;  %v1387_v58 = vpop.xlane.xlu0 %1386  ;;  %v5249_v48 = vpop.eup %3797  ;;  %1615 = vadd.xlane.f32.xlu1 %v1614_v22  ;;  %v2404_v52 = vsel %vm893_vm1, %v5226_v36, -inf }
 0x3ac   : > { %3801 = vrcp.f32 %v1387_v58  ;;  %v1617_v55 = vsel %vm893_vm1, %v5249_v48, 0.0  ;;  %v3800_v25 = vpop.eup %3799 }
 0x3ad   : > { %v1208_v18 = vpack.c.bf16 %v1201_v10, %v1200_v57  ;;  %3803 = vpow2.f32 %v2010_v62  ;;  %v1414_v63 = vmul.f32 %v3800_v25, %v5055_v28  ;;  %v5272_v57 = vpop.xlane.xlu2 %1181 }
 0x3ae   : > { %3805 = vpow2.f32 %v2008_v40  ;;  %v5265_v40 = vpop.f32.mrf.mxu3 }
 0x3af   : > { %3271 = vmatmul.msk.bf16.vlgmr.msrb.gmra.mxu2 %vm893_vm1, %v1208_v18  ;;  %3807 = vrcp.f32 %v1179_v30 }
 0x3b0   : > { %2096 = vmatpush.bf16.msrb.mxu2 %v4890_v56  ;;  %1618 = vadd.xlane.f32.xlu0 %v1617_v55 }
 0x3b2   : > { %v3802_v16 = vpop.eup %3801 }
 0x3b3   : > { %v1415_v53 = vmul.f32 %v3802_v16, %v5077_v6  ;;  %v1176_v4 = vpop.xlane.xlu0 %1175  ;;  %v5262_v62 = vpop.eup %3803  ;;  %2405 = vmax.xlane.f32.xlu1 %v2404_v52  ;;  %v2190_v52 = vsel %vm893_vm1, %v5265_v40, -inf }
 0x3b4   : > { %3809 = vrcp.f32 %v1176_v4  ;;  %2097 = vmatpush.bf16.msrb.mxu2 %v4853_v27  ;;  %v5267_v14 = vpop.eup %3805  ;;  %v2027_v28 = vsel %vm893_vm1, %v5262_v62, 0.0 }
 0x3b5   : > { %v1422_v56 = vpack.c.bf16 %v1415_v53, %v1414_v63  ;;  %3811 = vpow2.f32 %v2012_v0  ;;  %v3808_v6 = vpop.eup %3807  ;;  %v2024_v27 = vsel %vm893_vm1, %v5267_v14, 0.0  ;;  %v1789_v63 = vsub.f32 %v4994_v23, %v5203_v5 }
 0x3b6   : > { %3813 = vpow2.f32 %v1798_v51  ;;  %v1203_v18 = vmul.f32 %v3808_v6, %v5079_v24  ;;  %v5285_v16 = vpop.f32.mrf.mxu3 }
 0x3b7   : > { %3279 = vmatmul.msk.bf16.vlgmr.msra.gmra.mxu0 %vm893_vm1, %v1422_v56  ;;  %v5294_v56 = vpop.f32.mrf.mxu1 }
 0x3b8   : > { %2028 = vadd.xlane.f32.xlu0 %v2027_v28  ;;  %v1800_v28 = vmul.f32 1.442695, %v1789_v63 }
 0x3ba   : > { %v3810_v10 = vpop.eup %3809  ;;  %v1396_v17 = vpop.xlane.xlu2 %1395 }
 0x3bb   : > { %v1390_v58 = vpop.xlane.xlu0 %1389  ;;  %v1202_v22 = vmul.f32 %v3810_v10, %v5091_v31  ;;  %v5278_v59 = vpop.eup %3811  ;;  %2025 = vadd.xlane.f32.xlu1 %v2024_v27  ;;  %v2193_v27 = vsel %vm893_vm1, %v5285_v16, -inf }
 0x3bc   : > { %v2030_v55 = vsel %vm893_vm1, %v5278_v59, 0.0  ;;  %v5283_v25 = vpop.eup %3813  ;;  %v1399_v53 = vpop.xlane.xlu1 %1398 }
 0x3bd   : > { %v1209_v30 = vpack.c.bf16 %v1203_v18, %v1202_v22  ;;  %v1816_v31 = vsel %vm893_vm1, %v5283_v25, 0.0 }
 0x3be   : > { %v5296_v51 = vpop.f32.mrf.mxu3 }
 0x3bf   : > { %3272 = vmatmul.msk.bf16.gmra.mxu2 %vm893_vm1, %v1209_v30  ;;  %v5308_v30 = vpop.f32.mrf.mxu1 }
 0x3c0   : > { %2031 = vadd.xlane.f32.xlu0 %v2030_v55 }
 0x3c2   : > { %v1993_v6 = vpop.xlane.xlu2 %1992 }
 0x3c3   : > { %v1987_v0 = vpop.xlane.xlu0 %1986  ;;  %1817 = vadd.xlane.f32.xlu1 %v1816_v31  ;;  %v2196_v31 = vsel %vm893_vm1, %v5296_v51, -inf }
 0x3c4   : > { %v2003_v24 = vsub.f32 %v5085_v46, %v1987_v0  ;;  %v2410_v46 = vsel %vm893_vm1, %v5294_v56, -inf  ;;  %v5306_v18 = vpop.xlane.xlu1 %1187 }
 0x3c6   : > { %v2014_v4 = vmul.f32 1.442695, %v2003_v24 }
 0x3c8   : > { %3815 = vpow2.f32 %v2014_v4  ;;  %2191 = vmax.xlane.f32.xlu0 %v2190_v52  ;;  %v5316_v52 = vpop.f32.mrf.mxu3 }
 0x3c9   : > { %3817 = vrcp.f32 %v1390_v58 }
 0x3cb   : > { %v1393_v10 = vpop.xlane.xlu0 %1392  ;;  %2411 = vmax.xlane.f32.xlu1 %v2410_v46  ;;  %v1790_v46 = vsub.f32 %v5004_v34, %v5214_v15 }
 0x3cc   : > { %3819 = vrcp.f32 %v1393_v10  ;;  %v1996_v34 = vpop.xlane.xlu1 %1995 }
 0x3cd   : > { %3821 = vpow2.f32 %v1800_v28 }
 0x3ce   : > { %v5300_v23 = vpop.eup %3815  ;;  %3823 = vrcp.f32 %v1396_v17 }
 0x3cf   : > { %v2033_v5 = vsel %vm893_vm1, %v5300_v23, 0.0  ;;  %v3818_v22 = vpop.eup %3817  ;;  %3825 = vrcp.f32 %v1399_v53 }
 0x3d0   : > { %2034 = vadd.xlane.f32.xlu2 %v2033_v5  ;;  %2194 = vmax.xlane.f32.xlu0 %v2193_v27  ;;  %v1416_v24 = vmul.f32 %v3818_v22, %v5101_v35  ;;  %v1791_v27 = vsub.f32 %v5015_v41, %v5195_v47  ;;  %v2199_v35 = vsel %vm893_vm1, %v5316_v52, -inf  ;;  %v5329_v47 = vpop.f32.mrf.mxu1 }
 0x3d2   : > { %v3820_v58 = vpop.eup %3819  ;;  %v1191_v55 = vpop.xlane.xlu2 %1190  ;;  %v1804_v15 = vmul.f32 1.442695, %v1791_v27 }
 0x3d3   : > { %v1990_v0 = vpop.xlane.xlu0 %1989  ;;  %v1417_v63 = vmul.f32 %v3820_v58, %v5128_v43  ;;  %v5314_v4 = vpop.eup %3821  ;;  %2197 = vmax.xlane.f32.xlu1 %v2196_v31  ;;  %v2005_v58 = vsub.f32 %v5115_v54, %v1993_v6  ;;  %v2006_v31 = vsub.f32 %v5130_v11, %v1996_v34 }
 0x3d4   : > { %v2004_v28 = vsub.f32 %v5098_v49, %v1990_v0  ;;  %v1819_v43 = vsel %vm893_vm1, %v5314_v4, 0.0  ;;  %v1802_v49 = vmul.f32 1.442695, %v1790_v46  ;;  %v3824_v41 = vpop.eup %3823 }
 0x3d5   : > { %v1423_v10 = vpack.c.bf16 %v1417_v63, %v1416_v24  ;;  %v3826_v53 = vpop.eup %3825  ;;  %v2413_v24 = vsel %vm893_vm1, %v5308_v30, -inf  ;;  %v1418_v54 = vmul.f32 %v3824_v41, %v5103_v60  ;;  %v2020_v46 = vmul.f32 1.442695, %v2006_v31  ;;  %v5360_v41 = vpop.f32.mrf.mxu3 }
 0x3d6   : > { %v2016_v5 = vmul.f32 1.442695, %v2004_v28  ;;  %v1419_v6 = vmul.f32 %v3826_v53, %v5107_v44  ;;  %v5355_v44 = vpop.f32.mrf.mxu0 }
 0x3d7   : > { %3280 = vmatmul.msk.bf16.gmra.mxu0 %vm893_vm1, %v1423_v10  ;;  %v2018_v10 = vmul.f32 1.442695, %v2005_v58 }
 0x3d8   : > { %3827 = vpow2.f32 %v2016_v5  ;;  %2200 = vmax.xlane.f32.xlu2 %v2199_v35  ;;  %1820 = vadd.xlane.f32.xlu0 %v1819_v43  ;;  %v1424_v60 = vpack.c.bf16 %v1419_v6, %v1418_v54 }
 0x3d9   : > { %3829 = vrcp.f32 %v5272_v57  ;;  %v2416_v57 = vsel %vm893_vm1, %v5329_v47, -inf }
 0x3da   : > { %v1405_v22 = vpop.xlane.xlu2 %1404 }
 0x3db   : > { %v1185_v17 = vpop.xlane.xlu0 %1184 }
 0x3dc   : > { %3831 = vrcp.f32 %v1185_v17 }
 0x3dd   : > { %3833 = vpow2.f32 %v1802_v49 }
 0x3de   : > { %v5332_v0 = vpop.eup %3827  ;;  %3835 = vpow2.f32 %v1804_v15 }
 0x3df   : > { %v2036_v63 = vsel %vm893_vm1, %v5332_v0, 0.0  ;;  %v3830_v28 = vpop.eup %3829  ;;  %3837 = vpow2.f32 %v2018_v10  ;;  %v1792_v10 = vsub.f32 %v5025_v9, %v5210_v26  ;;  %v5377_v9 = vpop.f32.mrf.mxu0 }
 0x3e0   : > { %2417 = vmax.xlane.f32.xlu2 %v2416_v57  ;;  %2414 = vmax.xlane.f32.xlu0 %v2413_v24  ;;  %v1204_v35 = vmul.f32 %v3830_v28, %v5069_v2  ;;  %3839 = vpow2.f32 %v2020_v46 }
 0x3e1   : > { %2037 = vadd.xlane.f32.xlu1 %v2036_v63  ;;  %3841 = vrcp.f32 %v1191_v55 }
 0x3e2   : > { %v3832_v11 = vpop.eup %3831  ;;  %v5343_v27 = vpop.xlane.xlu2 %1597 }
 0x3e3   : > { %v1402_v5 = vpop.xlane.xlu0 %1401  ;;  %v1205_v43 = vmul.f32 %v3832_v11, %v5147_v3  ;;  %v5347_v49 = vpop.eup %3833 }
 0x3e4   : > { %v2071_v34 = vpop.permute.xlu1 %2070  ;;  %v5349_v15 = vpop.eup %3835  ;;  %v1822_v2 = vsel %vm893_vm1, %v5347_v49, 0.0  ;;  %3843 = vrcp.f32 %v1402_v5 }
 0x3e5   : > { %2098 = vmatpush.bf16.msrb.mxu2 %v2071_v34  ;;  %v1210_v17 = vpack.c.bf16 %v1205_v43, %v1204_v35  ;;  %v1825_v3 = vsel %vm893_vm1, %v5349_v15, 0.0  ;;  %3845 = vrcp.f32 %v5306_v18  ;;  %v5362_v55 = vpop.eup %3837  ;;  %v5371_v11 = vpop.f32.mrf.mxu1  ;;  %v1806_v35 = vmul.f32 1.442695, %v1792_v10 }
 0x3e6   : > { %3847 = vrcp.f32 %v1405_v22  ;;  %v5364_v31 = vpop.eup %3839  ;;  %v2039_v22 = vsel %vm893_vm1, %v5362_v55, 0.0 }
 0x3e7   : > { %3273 = vmatmul.msk.bf16.gmra.mxu2 %vm893_vm1, %v1210_v17  ;;  %3281 = vmatmul.msk.bf16.gmra.mxu0 %vm893_vm1, %v1424_v60  ;;  %v3842_v63 = vpop.eup %3841  ;;  %v5402_v10 = vpop.f32.mrf.mxu0 }
 0x3e8   : > { %1823 = vadd.xlane.f32.xlu0 %v1822_v2  ;;  %v1207_v46 = vmul.f32 %v3842_v63, %v5139_v61  ;;  %v5383_v2 = vpop.f32.mrf.mxu3  ;;  %v1793_v61 = vsub.f32 %v5057_v19, %v5228_v45 }
 0x3e9   : > { %1826 = vadd.xlane.f32.xlu1 %v1825_v3 }
 0x3ea   : > { %v1812_v58 = vpop.xlane.xlu2 %1811  ;;  %v3844_v28 = vpop.eup %3843  ;;  %v1808_v45 = vmul.f32 1.442695, %v1793_v61 }
 0x3eb   : > { %v1999_v53 = vpop.xlane.xlu0 %1998  ;;  %v3846_v54 = vpop.eup %3845  ;;  %v1420_v5 = vmul.f32 %v3844_v28, %v5158_v37  ;;  %v2205_v37 = vsel %vm893_vm1, %v5383_v2, -inf }
 0x3ec   : > { %v2007_v57 = vsub.f32 %v5172_v38, %v1999_v53  ;;  %v1859_v24 = vpop.permute.xlu1 %1858  ;;  %v3848_v6 = vpop.eup %3847  ;;  %v2042_v38 = vsel %vm893_vm1, %v5364_v31, 0.0  ;;  %v1206_v34 = vmul.f32 %v3846_v54, %v5117_v1 }
 0x3ed   : > { %1883 = vmatpush.bf16.msrb.mxu0 %v1859_v24  ;;  %v1421_v17 = vmul.f32 %v3848_v6, %v5149_v7  ;;  %v2419_v7 = vsel %vm893_vm1, %v5371_v11, -inf  ;;  %v5398_v19 = vpop.f32.mrf.mxu1 }
 0x3ee   : > { %v2022_v18 = vmul.f32 1.442695, %v2007_v57  ;;  %v1211_v3 = vpack.c.bf16 %v1207_v46, %v1206_v34 }
 0x3ef   : > { %v1425_v53 = vpack.c.bf16 %v1421_v17, %v1420_v5 }
 0x3f0   : > { %3849 = vpow2.f32 %v2022_v18  ;;  %2040 = vadd.xlane.f32.xlu0 %v2039_v22  ;;  %v2202_v22 = vsel %vm893_vm1, %v5360_v41, -inf }
 0x3f1   : > { %2043 = vadd.xlane.f32.xlu1 %v2042_v38  ;;  %3851 = vpow2.f32 %v1806_v35 }
 0x3f3   : > { %v1601_v26 = vpop.xlane.xlu0 %1600  ;;  %v5379_v43 = vpop.xlane.xlu2 %1609 }
 0x3f4   : > { %v2069_v60 = vpop.permute.xlu1 %2068  ;;  %3853 = vrcp.f32 %v1601_v26 }
 0x3f5   : > { %2099 = vmatpush.bf16.msrb.mxu2 %v2069_v60  ;;  %3855 = vrcp.f32 %v5343_v27 }
 0x3f6   : > { %v5385_v57 = vpop.eup %3849  ;;  %3857 = vrcp.f32 %v1812_v58  ;;  %v2422_v58 = vsel %vm893_vm1, %v5398_v19, -inf }
 0x3f7   : > { %3274 = vmatmul.msk.bf16.gmra.mxu2 %vm893_vm1, %v1211_v3  ;;  %3282 = vmatmul.msk.bf16.gmra.mxu0 %vm893_vm1, %v1425_v53  ;;  %v2045_v1 = vsel %vm893_vm1, %v5385_v57, 0.0  ;;  %v5400_v28 = vpop.eup %3851  ;;  %v5416_v3 = vpop.f32.mrf.mxu1 }
 0x3f8   : > { %2046 = vadd.xlane.f32.xlu2 %v2045_v1  ;;  %2420 = vmax.xlane.f32.xlu0 %v2419_v7  ;;  %v1828_v27 = vsel %vm893_vm1, %v5400_v28, 0.0  ;;  %v5418_v1 = vpop.f32.mrf.mxu0 }
 0x3f9   : > { %2206 = vmax.xlane.f32.xlu1 %v2205_v37 }
 0x3fa   : > { %v3854_v18 = vpop.eup %3853 }
 0x3fb   : > { %v1857_v24 = vpop.permute.xlu2 %1856  ;;  %v1815_v63 = vpop.xlane.xlu0 %1814  ;;  %v1629_v38 = vmul.f32 %v3854_v18, %v5187_v29  ;;  %v2425_v29 = vsel %vm893_vm1, %v5416_v3, -inf }
 0x3fc   : > { %3859 = vrcp.f32 %v1815_v63  ;;  %1884 = vmatpush.bf16.msrb.mxu0 %v1857_v24  ;;  %v3856_v54 = vpop.eup %3855 }
 0x3fd   : > { %3861 = vpow2.f32 %v1808_v45  ;;  %v3858_v6 = vpop.eup %3857  ;;  %v1628_v5 = vmul.f32 %v3856_v54, %v5160_v50 }
 0x3fe   : > { %v1842_v35 = vmul.f32 %v3858_v6, %v5174_v42  ;;  %v3970_v6 = vld [vmem:[#allocation3 + $0x10] sm:$0xff] }
 0x3ff   : > { %v1636_v53 = vpack.c.bf16 %v1629_v38, %v1628_v5  ;;  %v5437_v5 = vpop.f32.mrf.mxu3 }
 0x400   : > { %2203 = vmax.xlane.f32.xlu0 %v2202_v22  ;;  %1829 = vadd.xlane.f32.xlu2 %v1828_v27  ;;  %v5426_v7 = vpop.f32.mrf.mxu0 }
 0x401   : > { %2423 = vmax.xlane.f32.xlu1 %v2422_v58 }
 0x402   : > { %v3860_v46 = vpop.eup %3859 }
 0x403   : > { %v1843_v26 = vmul.f32 %v3860_v46, %v5205_v21  ;;  %v1855_v34 = vpop.permute.xlu2 %1854  ;;  %v1604_v17 = vpop.xlane.xlu0 %1603 }
 0x404   : > { %v5414_v60 = vpop.eup %3861  ;;  %1885 = vmatpush.bf16.msrb.mxu0 %v1855_v34  ;;  %3863 = vrcp.f32 %v1604_v17 }
 0x405   : > { %v1850_v61 = vpack.c.bf16 %v1843_v26, %v1842_v35  ;;  %v1831_v50 = vsel %vm893_vm1, %v5414_v60, 0.0 }
 0x407   : > { %3287 = vmatmul.msk.bf16.vlgmr.msra.gmra.mxu2 %vm893_vm1, %v1636_v53  ;;  %3295 = vmatmul.msk.bf16.vlgmr.msrb.gmra.mxu0 %vm893_vm1, %v1850_v61 }
 0x408   : > { %1832 = vadd.xlane.f32.xlu0 %v1831_v50  ;;  %2426 = vmax.xlane.f32.xlu2 %v2425_v29  ;;  %v5431_v54 = vpop.f32.mrf.mxu0  ;;  %v5449_v50 = vpop.f32.mrf.mxu3 }
 0x40a   : > { %v3864_v21 = vpop.eup %3863 }
 0x40b   : > { %v1607_v42 = vpop.xlane.xlu0 %1606  ;;  %v1630_v24 = vmul.f32 %v3864_v21, %v5212_v32 }
 0x40c   : > { %3865 = vrcp.f32 %v1607_v42 }
 0x410   : > { %v5439_v35 = vpop.f32.mrf.mxu0 }
 0x412   : > { %v3866_v37 = vpop.eup %3865 }
 0x413   : > { %v1613_v45 = vpop.xlane.xlu0 %1612  ;;  %v1631_v63 = vmul.f32 %v3866_v37, %v5219_v8  ;;  %v2211_v37 = vsel %vm893_vm1, %v5449_v50, -inf }
 0x414   : > { %3867 = vrcp.f32 %v1613_v45 }
 0x415   : > { %v1637_v18 = vpack.c.bf16 %v1631_v63, %v1630_v24  ;;  %3869 = vrcp.f32 %v5379_v43 }
 0x417   : > { %3288 = vmatmul.msk.bf16.gmra.mxu2 %vm893_vm1, %v1637_v18 }
 0x41a   : > { %v3868_v58 = vpop.eup %3867 }
 0x41b   : > { %v2409_v22 = vpop.xlane.xlu0 %2408  ;;  %v3870_v32 = vpop.eup %3869  ;;  %v1633_v8 = vmul.f32 %v3868_v58, %v5230_v33 }
 0x41c   : > { %v2429_v27 = vsub.f32 %v5237_v39, %v2409_v22  ;;  %2502 = vrot.lane.b32.xlu0 %v3970_v6, %s4265_s23  ;;  %v1632_v43 = vmul.f32 %v3870_v32, %v5189_v13  ;;  %v5451_v13 = vpop.f32.mrf.mxu0 }
 0x41e   : > { %v2438_v38 = vmul.f32 1.442695, %v2429_v27  ;;  %v1616_v46 = vpop.xlane.xlu1 %1615  ;;  %v1638_v39 = vpack.c.bf16 %v1633_v8, %v1632_v43 }
 0x420   : > { %3871 = vpow2.f32 %v2438_v38 }
 0x423   : > { %v1619_v26 = vpop.xlane.xlu0 %1618 }
 0x424   : > { %2288 = vrot.lane.b32.xlu0 %v3970_v6, %s4259_s30  ;;  %3873 = vrcp.f32 %v1619_v26 }
 0x425   : > { %3875 = vrcp.f32 %v1616_v46 }
 0x426   : > { %v5443_v34 = vpop.eup %3871  ;;  %v2406_v17 = vpop.xlane.xlu1 %2405 }
 0x427   : > { %3289 = vmatmul.msk.bf16.gmra.mxu2 %vm893_vm1, %v1638_v39  ;;  %v2455_v53 = vsel %vm893_vm1, %v5443_v34, 0.0  ;;  %v2428_v33 = vsub.f32 %v5226_v36, %v2406_v17 }
 0x428   : > { %2456 = vadd.xlane.f32.xlu2 %v2455_v53 }
 0x429   : > { %v2436_v61 = vmul.f32 1.442695, %v2428_v33 }
 0x42a   : > { %v3874_v42 = vpop.eup %3873 }
 0x42b   : > { %v2029_v29 = vpop.xlane.xlu0 %2028  ;;  %3877 = vpow2.f32 %v2436_v61  ;;  %v3876_v45 = vpop.eup %3875  ;;  %v1635_v24 = vmul.f32 %v3874_v42, %v5249_v48  ;;  %v2208_v48 = vsel %vm893_vm1, %v5437_v5, -inf }
 0x42c   : > { %v1634_v22 = vmul.f32 %v3876_v45, %v5240_v20 }
 0x42e   : > { %v2026_v21 = vpop.xlane.xlu1 %2025  ;;  %v1639_v6 = vpack.c.bf16 %v1635_v24, %v1634_v22 }
 0x42f   : > { %3879 = vrcp.f32 %v2026_v21 }
 0x430   : > { %2212 = vmax.xlane.f32.xlu2 %v2211_v37  ;;  %3881 = vrcp.f32 %v2029_v29 }
 0x431   : > { %v5456_v63 = vpop.eup %3877 }
 0x432   : > { %v2452_v18 = vsel %vm893_vm1, %v5456_v63, 0.0  ;;  %v5475_v29 = vpop.f32.mrf.mxu2 }
 0x433   : > { %v2032_v36 = vpop.xlane.xlu0 %2031  ;;  %2453 = vadd.xlane.f32.xlu1 %v2452_v18 }
 0x434   : > { %v5461_v27 = vpop.f32.mrf.mxu0 }
 0x435   : > { %v3880_v8 = vpop.eup %3879 }
 0x436   : > { %v1818_v58 = vpop.xlane.xlu1 %1817  ;;  %v3882_v39 = vpop.eup %3881  ;;  %v2056_v17 = vmul.f32 %v3880_v8, %v5267_v14 }
 0x437   : > { %3290 = vmatmul.msk.bf16.gmra.mxu2 %vm893_vm1, %v1639_v6  ;;  %v2057_v53 = vmul.f32 %v3882_v39, %v5262_v62 }
 0x439   : > { %v2064_v42 = vpack.c.bf16 %v2057_v53, %v2056_v17 }
 0x43b   : > { %v2192_v38 = vpop.xlane.xlu0 %2191  ;;  %2209 = vmax.xlane.f32.xlu1 %v2208_v48 }
 0x43c   : > { %v2214_v46 = vsub.f32 %v5265_v40, %v2192_v38  ;;  %v5467_v32 = vpop.f32.mrf.mxu0  ;;  %v5486_v38 = vpop.f32.mrf.mxu2 }
 0x43d   : > { %v3575_v20 = vpack.i.bf16 %v5467_v32, %v5461_v27 }
 0x43e   : > { %v2222_v26 = vmul.f32 1.442695, %v2214_v46  ;;  %v5471_v43 = vpop.xlane.xlu1 %2411 }
 0x440   : > { %3883 = vpow2.f32 %v2222_v26 }
 0x443   : > { %v2035_v33 = vpop.xlane.xlu2 %2034  ;;  %v2195_v61 = vpop.xlane.xlu0 %2194 }
 0x444   : > { %v2215_v40 = vsub.f32 %v5285_v16, %v2195_v61  ;;  %3885 = vrcp.f32 %v2035_v33 }
 0x446   : > { %v5478_v21 = vpop.eup %3883  ;;  %v2224_v37 = vmul.f32 1.442695, %v2215_v40  ;;  %v2198_v45 = vpop.xlane.xlu1 %2197 }
 0x447   : > { %3303 = vmatmul.msk.bf16.vlgmr.msrb.gmra.mxu2 %vm893_vm1, %v2064_v42  ;;  %v2238_v24 = vsel %vm893_vm1, %v5478_v21, 0.0  ;;  %v2216_v62 = vsub.f32 %v5296_v51, %v2198_v45 }
 0x448   : > { %3887 = vpow2.f32 %v2224_v37  ;;  %2239 = vadd.xlane.f32.xlu2 %v2238_v24  ;;  %v5507_v24 = vpop.f32.mrf.mxu2 }
 0x449   : > { %3889 = vrcp.f32 %v2032_v36  ;;  %v2226_v14 = vmul.f32 1.442695, %v2216_v62 }
 0x44a   : > { %3891 = vrcp.f32 %v1818_v58  ;;  %v3886_v22 = vpop.eup %3885 }
 0x44b   : > { %v2201_v18 = vpop.xlane.xlu2 %2200  ;;  %v1821_v16 = vpop.xlane.xlu0 %1820  ;;  %v2059_v36 = vmul.f32 %v3886_v22, %v5300_v23 }
 0x44c   : > { %3893 = vrcp.f32 %v1821_v16  ;;  %v2217_v48 = vsub.f32 %v5316_v52, %v2201_v18  ;;  %v5887_v16 = vld [vmem:[#allocation25_spill] sm:$0xff] }
 0x44d   : > { %3895 = vpow2.f32 %v2226_v14 }
 0x44e   : > { %v5484_v6 = vpop.eup %3887  ;;  %v2228_v58 = vmul.f32 1.442695, %v2217_v48 }
 0x44f   : > { %v2241_v46 = vsel %vm893_vm1, %v5484_v6, 0.0  ;;  %v3890_v8 = vpop.eup %3889 }
 0x450   : > { %2242 = vadd.xlane.f32.xlu0 %v2241_v46  ;;  %v3892_v51 = vpop.eup %3891  ;;  %v2058_v39 = vmul.f32 %v3890_v8, %v5278_v59  ;;  %3897 = vpow2.f32 %v2228_v58  ;;  %v5520_v48 = vpop.f32.mrf.mxu2 }
 0x451   : > { %v1844_v61 = vmul.f32 %v3892_v51, %v5283_v25 }
 0x452   : > { %v3894_v26 = vpop.eup %3893  ;;  %v2065_v23 = vpack.c.bf16 %v2059_v36, %v2058_v39  ;;  %v5888_v39 = vld [vmem:[#allocation26_spill] sm:$0xff] }
 0x453   : > { %v2418_v17 = vpop.xlane.xlu2 %2417  ;;  %v5493_v53 = vpop.xlane.xlu0 %2414  ;;  %v1845_v52 = vmul.f32 %v3894_v26, %v5314_v4 }
 0x454   : > { %v5495_v33 = vpop.eup %3895  ;;  %v2038_v40 = vpop.xlane.xlu1 %2037  ;;  %2500 = vrot.lane.b32.xlu1 %v5181_v12, %s4265_s23  ;;  %v2432_v59 = vsub.f32 %v5329_v47, %v2418_v17 }
 0x455   : > { %v5499_v42 = vpop.f32.mrf.mxu0  ;;  %v1851_v37 = vpack.c.bf16 %v1845_v52, %v1844_v61  ;;  %v2244_v45 = vsel %vm893_vm1, %v5495_v33, 0.0 }
 0x456   : > { %v2444_v25 = vmul.f32 1.442695, %v2432_v59  ;;  %v5510_v62 = vpop.eup %3897 }
 0x457   : > { %3304 = vmatmul.msk.bf16.gmra.mxu2 %vm893_vm1, %v2065_v23  ;;  %3296 = vmatmul.msk.bf16.gmra.mxu0 %vm893_vm1, %v1851_v37  ;;  %v2247_v47 = vsel %vm893_vm1, %v5510_v62, 0.0 }
 0x458   : > { %2245 = vadd.xlane.f32.xlu0 %v2244_v45 }
 0x45b   : > { %v1824_v4 = vpop.xlane.xlu0 %1823 }
 0x45c   : > { %3899 = vrcp.f32 %v1824_v4  ;;  %v1827_v14 = vpop.xlane.xlu1 %1826  ;;  %2286 = vrot.lane.b32.xlu1 %v5181_v12, %s4259_s30 }
 0x45d   : > { %v5512_v18 = vpop.f32.mrf.mxu0  ;;  %3901 = vrcp.f32 %v1827_v14 }
 0x45e   : > { %3903 = vpow2.f32 %v2444_v25 }
 0x45f   : > { %3905 = vrcp.f32 %v2038_v40 }
 0x460   : > { %2498 = vrot.lane.b32.xlu2 %v5887_v16, %s4265_s23  ;;  %2248 = vadd.xlane.f32.xlu0 %v2247_v47 }
 0x462   : > { %v3900_v22 = vpop.eup %3899 }
 0x463   : > { %v3902_v46 = vpop.eup %3901  ;;  %v1846_v8 = vmul.f32 %v3900_v22, %v5347_v49  ;;  %v2041_v51 = vpop.xlane.xlu0 %2040 }
 0x464   : > { %v1847_v36 = vmul.f32 %v3902_v46, %v5349_v15  ;;  %3907 = vrcp.f32 %v2041_v51  ;;  %v2044_v12 = vpop.xlane.xlu1 %2043  ;;  %v5526_v26 = vpop.eup %3903  ;;  %2496 = vrot.lane.b32.xlu1 %v5888_v39, %s4265_s23 }
 0x465   : > { %v5524_v58 = vpop.f32.mrf.mxu0  ;;  %v3906_v61 = vpop.eup %3905  ;;  %v2464_v49 = vsel %vm893_vm1, %v5526_v26, 0.0 }
 0x466   : > { %v1852_v17 = vpack.c.bf16 %v1847_v36, %v1846_v8  ;;  %v2060_v40 = vmul.f32 %v3906_v61, %v5332_v0 }
 0x468   : > { %3297 = vmatmul.msk.bf16.gmra.mxu0 %vm893_vm1, %v1852_v17  ;;  %2284 = vrot.lane.b32.xlu2 %v5887_v16, %s4259_s30 }
 0x469   : > { %2465 = vadd.xlane.f32.xlu0 %v2464_v49 }
 0x46a   : > { %v3908_v15 = vpop.eup %3907  ;;  %v5535_v52 = vpop.f32.mrf.mxu2 }
 0x46b   : > { %v2061_v23 = vmul.f32 %v3908_v15, %v5362_v55  ;;  %v2047_v37 = vpop.xlane.xlu2 %2046  ;;  %v2421_v59 = vpop.xlane.xlu0 %2420 }
 0x46c   : > { %v2433_v45 = vsub.f32 %v5371_v11, %v2421_v59  ;;  %v2207_v25 = vpop.xlane.xlu1 %2206  ;;  %2282 = vrot.lane.b32.xlu1 %v5888_v39, %s4259_s30  ;;  %3909 = vrcp.f32 %v2047_v37 }
 0x46d   : > { %v5540_v4 = vpop.f32.mrf.mxu0  ;;  %v2066_v47 = vpack.c.bf16 %v2061_v23, %v2060_v40 }
 0x46e   : > { %v3640_v14 = vpack.i.bf16 %v5540_v4, %v5524_v58  ;;  %v2446_v16 = vmul.f32 1.442695, %v2433_v45  ;;  %v3401_v58 = vld [vmem:[#allocation13 + $0x38] sm:$0xff] }
 0x46f   : > { %3305 = vmatmul.msk.bf16.gmra.mxu2 %vm893_vm1, %v2066_v47  ;;  %2906 = vmatpush.bf16.msra.mxu3 %v3401_v58 }
 0x470   : > { %3911 = vpow2.f32 %v2446_v16 }
 0x471   : > { %3913 = vrcp.f32 %v2044_v12 }
 0x472   : > { %v5547_v0 = vpop.f32.mrf.mxu2  ;;  %v3910_v8 = vpop.eup %3909 }
 0x473   : > { %v2204_v55 = vpop.xlane.xlu0 %2203  ;;  %v1830_v17 = vpop.xlane.xlu2 %1829  ;;  %v2063_v12 = vmul.f32 %v3910_v8, %v5385_v57  ;;  %v2430_v57 = vsub.f32 %v5294_v56, %v5471_v43  ;;  %v2431_v56 = vsub.f32 %v5308_v30, %v5493_v53 }
 0x474   : > { %v2218_v11 = vsub.f32 %v5360_v41, %v2204_v55  ;;  %v2424_v22 = vpop.xlane.xlu1 %2423 }
 0x475   : > { %v5550_v46 = vpop.f32.mrf.mxu0  ;;  %v2434_v39 = vsub.f32 %v5398_v19, %v2424_v22 }
 0x476   : > { %v5552_v51 = vpop.eup %3911  ;;  %v2230_v36 = vmul.f32 1.442695, %v2218_v11  ;;  %v2440_v11 = vmul.f32 1.442695, %v2430_v57 }
 0x477   : > { %v2467_v61 = vsel %vm893_vm1, %v5552_v51, 0.0  ;;  %v3914_v49 = vpop.eup %3913  ;;  %v2448_v41 = vmul.f32 1.442695, %v2434_v39  ;;  %v2219_v39 = vsub.f32 %v5383_v2, %v2207_v25 }
 0x478   : > { %3915 = vpow2.f32 %v2230_v36  ;;  %2468 = vadd.xlane.f32.xlu0 %v2467_v61  ;;  %v2062_v40 = vmul.f32 %v3914_v49, %v5364_v31  ;;  %v2442_v61 = vmul.f32 1.442695, %v2431_v56 }
 0x479   : > { %3917 = vrcp.f32 %v1830_v17 }
 0x47a   : > { %v5558_v15 = vpop.f32.mrf.mxu2  ;;  %v2067_v59 = vpack.c.bf16 %v2063_v12, %v2062_v40  ;;  %v2232_v12 = vmul.f32 1.442695, %v2219_v39 }
 0x47b   : > { %v1833_v23 = vpop.xlane.xlu0 %1832  ;;  %v2427_v49 = vpop.xlane.xlu2 %2426 }
 0x47c   : > { %3919 = vrcp.f32 %v1833_v23 }
 0x47d   : > { %v5561_v37 = vpop.f32.mrf.mxu0  ;;  %3921 = vpow2.f32 %v2448_v41  ;;  %v2435_v41 = vsub.f32 %v5416_v3, %v2427_v49 }
 0x47e   : > { %v3675_v19 = vpack.i.bf16 %v5561_v37, %v5550_v46  ;;  %v5565_v45 = vpop.eup %3915  ;;  %3923 = vpow2.f32 %v2440_v11 }
 0x47f   : > { %3306 = vmatmul.msk.bf16.gmra.mxu2 %vm893_vm1, %v2067_v59  ;;  %v2250_v47 = vsel %vm893_vm1, %v5565_v45, 0.0  ;;  %v3918_v31 = vpop.eup %3917  ;;  %3925 = vpow2.f32 %v2442_v61  ;;  %v2450_v53 = vmul.f32 1.442695, %v2435_v41 }
 0x480   : > { %2251 = vadd.xlane.f32.xlu0 %v2250_v47  ;;  %v1848_v22 = vmul.f32 %v3918_v31, %v5400_v28  ;;  %3927 = vpow2.f32 %v2232_v12 }
 0x481   : > { %3929 = vpow2.f32 %v2450_v53  ;;  %v3570_v53 = vpack.i.bf16 %v5486_v38, %v5475_v29 }
 0x482   : > { %v3920_v16 = vpop.eup %3919  ;;  %v5572_v55 = vpop.f32.mrf.mxu2 }
 0x483   : > { %v1849_v8 = vmul.f32 %v3920_v16, %v5414_v60  ;;  %v5576_v36 = vpop.eup %3921 }
 0x484   : > { %v2470_v17 = vsel %vm893_vm1, %v5576_v36, 0.0  ;;  %v5584_v60 = vpop.eup %3923 }
 0x485   : > { %v1853_v43 = vpack.c.bf16 %v1849_v8, %v1848_v22  ;;  %v2458_v2 = vsel %vm893_vm1, %v5584_v60, 0.0  ;;  %v5589_v40 = vpop.eup %3925  ;;  %v1887_v29 = vpop.f32.mrf.mxu0 }
 0x486   : > { %v5591_v23 = vpop.eup %3927  ;;  %v2461_v57 = vsel %vm893_vm1, %v5589_v40, 0.0 }
 0x487   : > { %3298 = vmatmul.msk.bf16.gmra.mxu0 %vm893_vm1, %v1853_v43  ;;  %v2253_v3 = vsel %vm893_vm1, %v5591_v23, 0.0  ;;  %v5599_v31 = vpop.eup %3929 }
 0x488   : > { %2471 = vadd.xlane.f32.xlu0 %v2470_v17  ;;  %v2473_v11 = vsel %vm893_vm1, %v5599_v31, 0.0 }
 0x48a   : > { %v1673_v28 = vpop.f32.mrf.mxu2 }
 0x48e   : > { %v2503_v30 = vpop.permute.xlu0 %2502 }
 0x48f   : > { %2524 = vmatpush.bf16.msra.mxu2 %v2503_v30 }
 0x491   : > { %2459 = vadd.xlane.f32.xlu2 %v2458_v2 }
 0x492   : > { %v1675_v25 = vpop.f32.mrf.mxu2 }
 0x496   : > { %v2289_v59 = vpop.permute.xlu0 %2288  ;;  %2462 = vadd.xlane.f32.xlu1 %v2461_v57 }
 0x497   : > { %2310 = vmatpush.bf16.msra.mxu0 %v2289_v59 }
 0x499   : > { %2254 = vadd.xlane.f32.xlu2 %v2253_v3  ;;  %v3580_v3 = vpack.i.bf16 %v5520_v48, %v5507_v24  ;;  %v1889_v24 = vpop.f32.mrf.mxu0 }
 0x49a   : > { %v5597_v47 = vpop.f32.mrf.mxu2 }
 0x49b   : > { %v2457_v16 = vpop.xlane.xlu2 %2456 }
 0x49e   : > { %2474 = vadd.xlane.f32.xlu1 %v2473_v11 }
 0x4a2   : > { %v5603_v22 = vpop.f32.mrf.mxu2 }
 0x4a3   : > { %v2213_v8 = vpop.xlane.xlu2 %2212 }
 0x4a4   : > { %v2221_v56 = vsub.f32 %v5449_v50, %v2213_v8  ;;  %v3585_v8 = vpack.i.bf16 %v1675_v25, %v1673_v28 }
 0x4a6   : > { %v2236_v43 = vmul.f32 1.442695, %v2221_v56  ;;  %v2454_v39 = vpop.xlane.xlu1 %2453 }
 0x4a8   : > { %3931 = vpow2.f32 %v2236_v43 }
 0x4aa   : > { %v5606_v17 = vpop.f32.mrf.mxu2 }
 0x4ae   : > { %v5608_v61 = vpop.eup %3931  ;;  %v2210_v49 = vpop.xlane.xlu1 %2209 }
 0x4af   : > { %v2259_v12 = vsel %vm893_vm1, %v5608_v61, 0.0  ;;  %v2220_v41 = vsub.f32 %v5437_v5, %v2210_v49 }
 0x4b0   : > { %2260 = vadd.xlane.f32.xlu0 %v2259_v12  ;;  %v3590_v12 = vpack.i.bf16 %v5512_v18, %v5499_v42 }
 0x4b1   : > { %v2234_v30 = vmul.f32 1.442695, %v2220_v41 }
 0x4b2   : > { %v5613_v2 = vpop.f32.mrf.mxu2 }
 0x4b3   : > { %v3650_v50 = vpack.i.bf16 %v5613_v2, %v5606_v17  ;;  %3933 = vpow2.f32 %v2234_v30 }
 0x4b4   : > { %3935 = vrcp.f32 %v2454_v39 }
 0x4b5   : > { %3937 = vrcp.f32 %v2457_v16 }
 0x4b7   : > { %3571 = vrot.lane.b32.xlu1 %v3570_v53, %s4265_s23 }
 0x4b9   : > { %v5620_v59 = vpop.eup %3933 }
 0x4ba   : > { %v5622_v57 = vpop.f32.mrf.mxu2  ;;  %v2256_v5 = vsel %vm893_vm1, %v5620_v59, 0.0  ;;  %v3936_v25 = vpop.eup %3935 }
 0x4bb   : > { %2257 = vadd.xlane.f32.xlu2 %v2256_v5  ;;  %v2240_v11 = vpop.xlane.xlu2 %2239  ;;  %v2484_v42 = vmul.f32 %v3936_v25, %v5456_v63 }
 0x4bf   : > { %3581 = vrot.lane.b32.xlu1 %v3580_v3, %s4265_s23  ;;  %v3938_v3 = vpop.eup %3937 }
 0x4c0   : > { %v2485_v16 = vmul.f32 %v3938_v3, %v5443_v34 }
 0x4c2   : > { %v5629_v56 = vpop.f32.mrf.mxu2 }
 0x4c3   : > { %v3685_v38 = vpack.i.bf16 %v5629_v56, %v5622_v57  ;;  %v2499_v49 = vpop.permute.xlu2 %2498  ;;  %v2243_v48 = vpop.xlane.xlu0 %2242 }
 0x4c4   : > { %3586 = vrot.lane.b32.xlu0 %v3585_v8, %s4264_s18  ;;  %3939 = vrcp.f32 %v2243_v48 }
 0x4c5   : > { %3941 = vrcp.f32 %v2240_v11 }
 0x4c6   : > { %v2501_v43 = vpop.permute.xlu1 %2500 }
 0x4c7   : > { %2525 = vmatpush.bf16.msra.mxu2 %v2501_v43  ;;  %v2492_v43 = vpack.c.bf16 %v2485_v16, %v2484_v42 }
 0x4ca   : > { %v2101_v41 = vpop.f32.mrf.mxu2 }
 0x4cb   : > { %2526 = vmatpush.bf16.msra.mxu2 %v2499_v49  ;;  %v2285_v53 = vpop.permute.xlu2 %2284  ;;  %v2246_v39 = vpop.xlane.xlu0 %2245 }
 0x4cc   : > { %3591 = vrot.lane.b32.xlu0 %v3590_v12, %s4259_s30  ;;  %v3940_v49 = vpop.eup %3939  ;;  %v3595_v12 = vpack.i.bf16 %v1889_v24, %v1887_v29  ;;  %v3600_v29 = vpack.i.bf16 %v5603_v22, %v5597_v47 }
 0x4cd   : > { %v2271_v27 = vmul.f32 %v3940_v49, %v5484_v6 }
 0x4ce   : > { %v2287_v28 = vpop.permute.xlu1 %2286 }
 0x4cf   : > { %2311 = vmatpush.bf16.msra.mxu0 %v2287_v28 }
 0x4d2   : > { %v2103_v30 = vpop.f32.mrf.mxu2 }
 0x4d3   : > { %v3605_v5 = vpack.i.bf16 %v2103_v30, %v2101_v41  ;;  %3576 = vrot.lane.b32.xlu2 %v3575_v20, %s4259_s30  ;;  %2312 = vmatpush.bf16.msra.mxu0 %v2285_v53  ;;  %v3942_v41 = vpop.eup %3941  ;;  %v2249_v28 = vpop.xlane.xlu0 %2248 }
 0x4d4   : > { %v1892_v18 = vpop.f32.mrf.mxu0  ;;  %v2270_v20 = vmul.f32 %v3942_v41, %v5478_v21  ;;  %3943 = vrcp.f32 %v2249_v28 }
 0x4d5   : > { %3606 = vrot.lane.b32.xlu1 %v3605_v5, %s4263_s15  ;;  %3945 = vrcp.f32 %v2246_v39 }
 0x4d6   : > { %v2497_v8 = vpop.permute.xlu1 %2496  ;;  %v2278_v34 = vpack.c.bf16 %v2271_v27, %v2270_v20 }
 0x4d7   : > { %2527 = vmatpush.bf16.msra.mxu2 %v2497_v8 }
 0x4da   : > { %3319 = vmatmul.msk.bf16.vlgmr.msra.gmra.mxu2 %vm893_vm1, %v2492_v43  ;;  %v5648_v48 = vpop.f32.mrf.mxu2  ;;  %v3944_v6 = vpop.eup %3943 }
 0x4db   : > { %3596 = vrot.lane.b32.xlu2 %v3595_v12, %s4260_s9  ;;  %v3946_v21 = vpop.eup %3945  ;;  %v2273_v25 = vmul.f32 %v3944_v6, %v5510_v62 }
 0x4dc   : > { %v1894_v63 = vpop.f32.mrf.mxu0  ;;  %v2272_v30 = vmul.f32 %v3946_v21, %v5495_v33  ;;  %v2466_v47 = vpop.xlane.xlu0 %2465 }
 0x4dd   : > { %v3610_v32 = vpack.i.bf16 %v1894_v63, %v1892_v18 }
 0x4de   : > { %v2283_v11 = vpop.permute.xlu1 %2282  ;;  %v2279_v53 = vpack.c.bf16 %v2273_v25, %v2272_v30 }
 0x4df   : > { %3611 = vrot.lane.b32.xlu1 %v3610_v32, %s4260_s9  ;;  %2313 = vmatpush.bf16.msra.mxu0 %v2283_v11 }
 0x4e2   : > { %3311 = vmatmul.msk.bf16.vlgmr.msra.gmra.mxu0 %vm893_vm1, %v2278_v34  ;;  %v5655_v24 = vpop.f32.mrf.mxu2 }
 0x4e3   : > { %3601 = vrot.lane.b32.xlu2 %v3600_v29, %s4264_s18 }
 0x4e5   : > { %v5659_v5 = vpop.f32.mrf.mxu0 }
 0x4eb   : > { %v2469_v16 = vpop.xlane.xlu0 %2468 }
 0x4ed   : > { %v5668_v18 = vpop.f32.mrf.mxu0 }
 0x4f2   : > { %v5661_v3 = vpop.f32.mrf.mxu2  ;;  %3312 = vmatmul.msk.bf16.gmra.mxu0 %vm893_vm1, %v2279_v53 }
 0x4f3   : > { %v2252_v33 = vpop.xlane.xlu0 %2251 }
 0x4fa   : > { %v5664_v22 = vpop.f32.mrf.mxu2 }
 0x4fb   : > { %v3660_v42 = vpack.i.bf16 %v5664_v22, %v5661_v3  ;;  %v3399_v3 = vld [vmem:[#allocation13 + $0x28] sm:$0xff] }
 0x504   : > { %v2460_v39 = vpop.xlane.xlu2 %2459  ;;  %v5670_v62 = vpop.f32.mrf.mxu0 }
 0x505   : > { %3947 = vrcp.f32 %v2460_v39 }
 0x506   : > { %3949 = vrcp.f32 %v2252_v33 }
 0x509   : > { %v2463_v8 = vpop.xlane.xlu1 %2462 }
 0x50a   : > { %3951 = vrcp.f32 %v2463_v8 }
 0x50b   : > { %v3948_v41 = vpop.eup %3947 }
 0x50c   : > { %v5672_v43 = vpop.f32.mrf.mxu0  ;;  %v2255_v49 = vpop.xlane.xlu2 %2254  ;;  %v2486_v32 = vmul.f32 %v3948_v41, %v5584_v60 }
 0x50d   : > { %v3690_v12 = vpack.i.bf16 %v5672_v43, %v5670_v62  ;;  %3953 = vrcp.f32 %v2255_v49  ;;  %v3950_v27 = vpop.eup %3949  ;;  %v3397_v62 = vld [vmem:[#allocation13 + $0x18] sm:$0xff]  ;;  %v3396_v43 = vld [vmem:[#allocation13 + $0x10] sm:$0xff] }
 0x50e   : > { %v2274_v34 = vmul.f32 %v3950_v27, %v5565_v45  ;;  %3955 = vrcp.f32 %v2469_v16 }
 0x50f   : > { %3957 = vrcp.f32 %v2466_v47 }
 0x510   : > { %v3952_v63 = vpop.eup %3951 }
 0x511   : > { %v2487_v20 = vmul.f32 %v3952_v63, %v5589_v40  ;;  %v2472_v40 = vpop.xlane.xlu0 %2471  ;;  %v2475_v53 = vpop.xlane.xlu1 %2474 }
 0x512   : > { %3959 = vrcp.f32 %v2475_v53 }
 0x513   : > { %v3954_v11 = vpop.eup %3953  ;;  %v2493_v29 = vpack.c.bf16 %v2487_v20, %v2486_v32  ;;  %3961 = vrcp.f32 %v2472_v40  ;;  %v5691_v32 = vpop.f32.mrf.mxu2  ;;  %v3395_v40 = vld [vmem:[#allocation13 + $0x8] sm:$0xff] }
 0x514   : > { %v2275_v28 = vmul.f32 %v3954_v11, %v5591_v23  ;;  %v3956_v21 = vpop.eup %3955 }
 0x515   : > { %3320 = vmatmul.msk.bf16.gmra.mxu2 %vm893_vm1, %v2493_v29  ;;  %v3958_v25 = vpop.eup %3957  ;;  %v2489_v30 = vmul.f32 %v3956_v21, %v5552_v51  ;;  %v3635_v21 = vpack.i.bf16 %v5547_v0, %v5535_v52  ;;  %v3670_v52 = vpack.i.bf16 %v5572_v55, %v5558_v15  ;;  %v3398_v15 = vld [vmem:[#allocation13 + $0x20] sm:$0xff] }
 0x516   : > { %v2280_v6 = vpack.c.bf16 %v2275_v28, %v2274_v34  ;;  %v2488_v60 = vmul.f32 %v3958_v25, %v5526_v26 }
 0x518   : > { %3313 = vmatmul.msk.bf16.gmra.mxu0 %vm893_vm1, %v2280_v6  ;;  %v2494_v39 = vpack.c.bf16 %v2489_v30, %v2488_v60  ;;  %v3960_v23 = vpop.eup %3959  ;;  %v3655_v30 = vpack.i.bf16 %v5668_v18, %v5659_v5 }
 0x519   : > { %v3962_v16 = vpop.eup %3961  ;;  %v2491_v47 = vmul.f32 %v3960_v23, %v5599_v31 }
 0x51a   : > { %v2490_v8 = vmul.f32 %v3962_v16, %v5576_v36 }
 0x51b   : > { %v5693_v20 = vpop.f32.mrf.mxu2 }
 0x51c   : > { %v2495_v49 = vpack.c.bf16 %v2491_v47, %v2490_v8 }
 0x523   : > { %v2261_v45 = vpop.xlane.xlu0 %2260 }
 0x524   : > { %3963 = vrcp.f32 %v2261_v45  ;;  %v3695_v45 = vpack.i.bf16 %v5693_v20, %v5691_v32 }
 0x525   : > { %3321 = vmatmul.msk.bf16.gmra.mxu2 %vm893_vm1, %v2494_v39 }
 0x529   : > { %v3572_v46 = vpop.permute.xlu1 %3571 }
 0x52a   : > { %v3964_v51 = vpop.eup %3963  ;;  %v3573_v56 = vunpack.i.l.bf16 %v3572_v46  ;;  %v3574_v16 = vunpack.i.h.bf16 %v3572_v46 }
 0x52b   : > { %v2277_v41 = vmul.f32 %v3964_v51, %v5608_v61 }
 0x52c   : > { %v2773_v51 = vsel %vm839_vm0, %v5355_v44, %v3573_v56 }
 0x52e   : > { %v2258_v33 = vpop.xlane.xlu2 %2257 }
 0x52f   : > { %3965 = vrcp.f32 %v2258_v33 }
 0x531   : > { %v3582_v57 = vpop.permute.xlu1 %3581 }
 0x535   : > { %v3966_v26 = vpop.eup %3965  ;;  %3322 = vmatmul.msk.bf16.gmra.mxu2 %vm893_vm1, %v2495_v49 }
 0x536   : > { %v2276_v27 = vmul.f32 %v3966_v26, %v5620_v59  ;;  %v3620_v59 = vpack.i.bf16 %v5655_v24, %v5648_v48  ;;  %v3577_v17 = vpop.permute.xlu2 %3576 }
 0x537   : > { %v3578_v33 = vunpack.i.l.bf16 %v3577_v17  ;;  %v3579_v8 = vunpack.i.h.bf16 %v3577_v17 }
 0x538   : > { %v2281_v63 = vpack.c.bf16 %v2277_v41, %v2276_v27  ;;  %v2774_v41 = vsel %vm839_vm0, %v5377_v9, %v3574_v16 }
 0x539   : > { %v2783_v20 = vsel %vm2781_vm2, %v2774_v41, %v3579_v8 }
 0x53a   : > { %3314 = vmatmul.msk.bf16.gmra.mxu0 %vm893_vm1, %v2281_v63  ;;  %v2782_v63 = vsel %vm2781_vm2, %v2773_v51, %v3578_v33 }
 0x53e   : > { %v3597_v37 = vpop.permute.xlu2 %3596 }
 0x53f   : > { %v3598_v32 = vunpack.i.l.bf16 %v3597_v37 }
 0x547   : > { %v3607_v26 = vpop.permute.xlu1 %3606 }
 0x55d   : > { %v2529_v31 = vpop.f32.mrf.mxu2 }
 0x55f   : > { %v2315_v11 = vpop.f32.mrf.mxu0 }
 0x565   : > { %v2531_v34 = vpop.f32.mrf.mxu2 }
 0x566   : > { %v3625_v36 = vpack.i.bf16 %v2531_v34, %v2529_v31  ;;  %v3599_v31 = vunpack.i.h.bf16 %v3597_v37  ;;  %v3608_v34 = vunpack.i.l.bf16 %v3607_v26 }
 0x567   : > { %v2317_v28 = vpop.f32.mrf.mxu0 }
 0x568   : > { %v3615_v29 = vpack.i.bf16 %v2317_v28, %v2315_v11  ;;  %3626 = vrot.lane.b32.xlu2 %v3625_v36, %s4261_s21  ;;  %v3609_v11 = vunpack.i.h.bf16 %v3607_v26 }
 0x56a   : > { %3616 = vrot.lane.b32.xlu0 %v3615_v29, %s4262_s22 }
 0x56f   : > { %v2320_v61 = vpop.f32.mrf.mxu0 }
 0x572   : > { %3621 = vrot.lane.b32.xlu0 %v3620_v59, %s4263_s15 }
 0x577   : > { %v2322_v6 = vpop.f32.mrf.mxu0 }
 0x578   : > { %v3630_v25 = vpack.i.bf16 %v2322_v6, %v2320_v61 }
 0x57a   : > { %3636 = vrot.lane.b32.xlu0 %v3635_v21, %s4265_s23  ;;  %3631 = vrot.lane.b32.xlu2 %v3630_v25, %s4262_s22 }
 0x582   : > { %3656 = vrot.lane.b32.xlu0 %v3655_v30, %s4260_s9  ;;  %3641 = vrot.lane.b32.xlu2 %v3640_v14, %s4259_s30  ;;  %v3400_v14 = vld [vmem:[#allocation13 + $0x30] sm:$0xff] }
 0x583   : > { %2907 = vmatpush.bf16.msra.mxu3 %v3400_v14 }
 0x587   : > { %2908 = vmatpush.bf16.msra.mxu3 %v3399_v3  ;;  %v3584_v3 = vunpack.i.h.bf16 %v3582_v57 }
 0x58a   : > { %3661 = vrot.lane.b32.xlu2 %v3660_v42, %s4263_s15 }
 0x58b   : > { %2909 = vmatpush.bf16.msra.mxu3 %v3398_v15  ;;  %v3583_v15 = vunpack.i.l.bf16 %v3582_v57 }
 0x58d   : > { %v2775_v17 = vsel %vm839_vm0, %v5402_v10, %v3583_v15 }
 0x58f   : > { %2910 = vmatpush.bf16.msra.mxu3 %v3397_v62 }
 0x592   : > { %3671 = vrot.lane.b32.xlu2 %v3670_v52, %s4265_s23 }
 0x593   : > { %2911 = vmatpush.bf16.msra.mxu3 %v3396_v43 }
 0x595   : > { %v2325_v4 = vpop.f32.mrf.mxu0 }
 0x597   : > { %2912 = vmatpush.bf16.msra.mxu3 %v3395_v40  ;;  %v2776_v40 = vsel %vm839_vm0, %v5418_v1, %v3584_v3 }
 0x598   : > { %v2534_v0 = vpop.f32.mrf.mxu2 }
 0x59a   : > { %3691 = vrot.lane.b32.xlu2 %v3690_v12, %s4260_s9  ;;  %s4171_s9 = scalar_lea.hbm %s5855_s7, 128 }
 0x59b   : > { %p4173_p12 = scmp.lt.s32.totalorder %s4171_s9, %s4167_s20 }
 0x59d   : > { %v2327_v55 = vpop.f32.mrf.mxu0  ;;  %p4174_p13 = por %p4173_p12, %p4172_p10 }
 0x59e   : > { %v3665_v42 = vpack.i.bf16 %v2327_v55, %v2325_v4  ;;  %v3612_v55 = vpop.permute.xlu1 %3611 }
 0x59f   : > { %p4175_p0 = pnand %p4174_p13, %p4170_p8 }
 0x5a0   : > { %v2536_v48 = vpop.f32.mrf.mxu2 }
 0x5a1   : > { %v3645_v24 = vpack.i.bf16 %v2536_v48, %v2534_v0 }
 0x5a3   : > { %3646 = vrot.lane.b32.xlu1 %v3645_v24, %s4261_s21 }
 0x5a8   : > { %v2539_v5 = vpop.f32.mrf.mxu2 }
 0x5ab   : > { %3651 = vrot.lane.b32.xlu1 %v3650_v50, %s4264_s18  ;;  %v3394_v50 = vld [vmem:[#allocation13] sm:$0xff] }
 0x5ac   : > { %2913 = vmatpush.bf16.msra.mxu3 %v3394_v50 }
 0x5b0   : > { %v2541_v22 = vpop.f32.mrf.mxu2 }
 0x5b1   : > { %v3680_v18 = vpack.i.bf16 %v2541_v22, %v2539_v5 }
 0x5b3   : > { %3666 = vrot.lane.b32.xlu1 %v3665_v42, %s4262_s22  ;;  %3681 = vrot.lane.b32.xlu0 %v3680_v18, %s4261_s21 }
 0x5b7   : > { %v2330_v12 = vpop.f32.mrf.mxu0 }
 0x5b8   : > { %v2544_v60 = vpop.f32.mrf.mxu2 }
 0x5bb   : > { %3676 = vrot.lane.b32.xlu1 %v3675_v19, %s4259_s30  ;;  %3686 = vrot.lane.b32.xlu0 %v3685_v38, %s4264_s18  ;;  %v3587_v19 = vpop.permute.xlu0 %3586  ;;  %v3602_v38 = vpop.permute.xlu2 %3601 }
 0x5bc   : > { %v3588_v49 = vunpack.i.l.bf16 %v3587_v19  ;;  %v3589_v27 = vunpack.i.h.bf16 %v3587_v19  ;;  %v3604_v18 = vunpack.i.h.bf16 %v3602_v38  ;;  %v3603_v62 = vunpack.i.l.bf16 %v3602_v38 }
 0x5be   : > { %v2791_v36 = vsel %vm2790_vm3, %v2782_v63, %v3588_v49  ;;  %v2792_v44 = vsel %vm2790_vm3, %v2783_v20, %v3589_v27 }
 0x5bf   : > { %v2332_v2 = vpop.f32.mrf.mxu0  ;;  %v2799_v29 = vsel %vm893_vm1, %v2791_v36, %v3598_v32  ;;  %v2800_v9 = vsel %vm893_vm1, %v2792_v44, %v3599_v31 }
 0x5c0   : > { %v3700_v53 = vpack.i.bf16 %v2332_v2, %v2330_v12  ;;  %v2546_v39 = vpop.f32.mrf.mxu2  ;;  %v2808_v21 = vsel %vm2807_vm4, %v2799_v29, %v3608_v34  ;;  %v2809_v25 = vsel %vm2807_vm4, %v2800_v9, %v3609_v11  ;;  %v3614_v12 = vunpack.i.h.bf16 %v3612_v55 }
 0x5c1   : > { %v3705_v23 = vpack.i.bf16 %v2546_v39, %v2544_v60  ;;  %v3613_v60 = vunpack.i.l.bf16 %v3612_v55 }
 0x5c3   : > { %3696 = vrot.lane.b32.xlu1 %v3695_v45, %s4263_s15  ;;  %3701 = vrot.lane.b32.xlu0 %v3700_v53, %s4262_s22  ;;  %v3592_v47 = vpop.permute.xlu0 %3591  ;;  %v3627_v28 = vpop.permute.xlu2 %3626 }
 0x5c4   : > { %3706 = vrot.lane.b32.xlu2 %v3705_v23, %s4261_s21  ;;  %v3629_v30 = vunpack.i.h.bf16 %v3627_v28  ;;  %v3628_v52 = vunpack.i.l.bf16 %v3627_v28  ;;  %v3594_v22 = vunpack.i.h.bf16 %v3592_v47  ;;  %v3593_v42 = vunpack.i.l.bf16 %v3592_v47 }
 0x5c6   : > { %v2784_v53 = vsel %vm2781_vm2, %v2775_v17, %v3593_v42  ;;  %v2785_v39 = vsel %vm2781_vm2, %v2776_v40, %v3594_v22 }
 0x5c7   : > { %v2793_v45 = vsel %vm2790_vm3, %v2784_v53, %v3603_v62  ;;  %v2794_v23 = vsel %vm2790_vm3, %v2785_v39, %v3604_v18 }
 0x5c8   : > { %v2801_v46 = vsel %vm893_vm1, %v2793_v45, %v3613_v60  ;;  %v2802_v37 = vsel %vm893_vm1, %v2794_v23, %v3614_v12 }
 0x5d4   : > { %v3632_v14 = vpop.permute.xlu2 %3631 }
 0x5d5   : > { %v3634_v10 = vunpack.i.h.bf16 %v3632_v14  ;;  %v3633_v56 = vunpack.i.l.bf16 %v3632_v14 }
 0x5dc   : > { %v3617_v61 = vpop.permute.xlu0 %3616  ;;  %v3642_v43 = vpop.permute.xlu2 %3641 }
 0x5dd   : > { %v3619_v59 = vunpack.i.h.bf16 %v3617_v61  ;;  %v3618_v6 = vunpack.i.l.bf16 %v3617_v61  ;;  %v3644_v34 = vunpack.i.h.bf16 %v3642_v43  ;;  %v3643_v36 = vunpack.i.l.bf16 %v3642_v43 }
 0x5df   : > { %v2817_v0 = vsel %vm2816_vm5, %v2808_v21, %v3618_v6  ;;  %v2818_v48 = vsel %vm2816_vm5, %v2809_v25, %v3619_v59 }
 0x5e0   : > { %v2826_v24 = vsel %vm2825_vm6, %v2817_v0, %v3628_v52  ;;  %v2827_v58 = vsel %vm2825_vm6, %v2818_v48, %v3629_v30 }
 0x5e1   : > { %v2834_v4 = vpack.c.bf16 %v2827_v58, %v2826_v24 }
 0x5e3   : > { %2914 = vmatmul.bf16.vlgmr.msra.gmra.mxu3 %v2834_v4 }
 0x5e4   : > { %v3622_v5 = vpop.permute.xlu0 %3621  ;;  %v3662_v51 = vpop.permute.xlu2 %3661 }
 0x5e5   : > { %v3624_v2 = vunpack.i.h.bf16 %v3622_v5  ;;  %v3623_v50 = vunpack.i.l.bf16 %v3622_v5  ;;  %v3664_v30 = vunpack.i.h.bf16 %v3662_v51  ;;  %v3663_v52 = vunpack.i.l.bf16 %v3662_v51 }
 0x5e7   : > { %v2810_v1 = vsel %vm2807_vm4, %v2801_v46, %v3623_v50  ;;  %v2811_v57 = vsel %vm2807_vm4, %v2802_v37, %v3624_v2 }
 0x5e8   : > { %v2819_v47 = vsel %vm2816_vm5, %v2810_v1, %v3633_v56  ;;  %v2820_v8 = vsel %vm2816_vm5, %v2811_v57, %v3634_v10 }
 0x5ec   : > { %v3637_v19 = vpop.permute.xlu0 %3636  ;;  %v3672_v6 = vpop.permute.xlu2 %3671 }
 0x5ed   : > { %v3639_v41 = vunpack.i.h.bf16 %v3637_v19  ;;  %v3638_v27 = vunpack.i.l.bf16 %v3637_v19  ;;  %v3674_v62 = vunpack.i.h.bf16 %v3672_v6  ;;  %v3673_v43 = vunpack.i.l.bf16 %v3672_v6 }
 0x5ef   : > { %v2778_v32 = vsel %vm839_vm0, %v5431_v54, %v3639_v41  ;;  %v2777_v20 = vsel %vm839_vm0, %v5426_v7, %v3638_v27  ;;  %v2780_v50 = vsel %vm839_vm0, %v5451_v13, %v3674_v62  ;;  %v2779_v53 = vsel %vm839_vm0, %v5439_v35, %v3673_v43 }
 0x5f0   : > { %v2786_v29 = vsel %vm2781_vm2, %v2777_v20, %v3643_v36  ;;  %v2787_v61 = vsel %vm2781_vm2, %v2778_v32, %v3644_v34 }
 0x5f4   : > { %v3657_v31 = vpop.permute.xlu0 %3656  ;;  %v3692_v12 = vpop.permute.xlu2 %3691 }
 0x5f5   : > { %v3659_v21 = vunpack.i.h.bf16 %v3657_v31  ;;  %v3658_v54 = vunpack.i.l.bf16 %v3657_v31  ;;  %v3694_v57 = vunpack.i.h.bf16 %v3692_v12  ;;  %v3693_v10 = vunpack.i.l.bf16 %v3692_v12 }
 0x615   : > { %v3647_v38 = vpop.permute.xlu1 %3646 }
 0x616   : > { %v3649_v16 = vunpack.i.h.bf16 %v3647_v38  ;;  %v3648_v33 = vunpack.i.l.bf16 %v3647_v38 }
 0x618   : > { %v2828_v49 = vsel %vm2825_vm6, %v2819_v47, %v3648_v33  ;;  %v2829_v26 = vsel %vm2825_vm6, %v2820_v8, %v3649_v16 }
 0x619   : > { %v2835_v63 = vpack.c.bf16 %v2829_v26, %v2828_v49 }
 0x61b   : > { %2919 = vmatmul.bf16.gmra.mxu3 %v2835_v63 }
 0x61d   : > { %v3652_v11 = vpop.permute.xlu1 %3651 }
 0x61e   : > { %v3654_v28 = vunpack.i.h.bf16 %v3652_v11  ;;  %v3653_v44 = vunpack.i.l.bf16 %v3652_v11  ;;  %v3707_v37 = vpop.permute.xlu2 %3706  ;;  %v3710_v11 = vld [vmem:[%s5854_s6] ss:$0 sm:$0xff] }
 0x61f   : > { %v3709_v51 = vunpack.i.h.bf16 %v3707_v37  ;;  %v3708_v49 = vunpack.i.l.bf16 %v3707_v37 }
 0x620   : > { %v2796_v9 = vsel %vm2790_vm3, %v2787_v61, %v3654_v28  ;;  %v2795_v59 = vsel %vm2790_vm3, %v2786_v29, %v3653_v44 }
 0x621   : > { %v2804_v25 = vsel %vm893_vm1, %v2796_v9, %v3659_v21  ;;  %v2803_v7 = vsel %vm893_vm1, %v2795_v59, %v3658_v54 }
 0x622   : > { %v2812_v5 = vsel %vm2807_vm4, %v2803_v7, %v3663_v52  ;;  %v2813_v3 = vsel %vm2807_vm4, %v2804_v25, %v3664_v30 }
 0x625   : > { %v3682_v0 = vpop.permute.xlu0 %3681  ;;  %v3667_v48 = vpop.permute.xlu1 %3666 }
 0x626   : > { %v3684_v24 = vunpack.i.h.bf16 %v3682_v0  ;;  %v3683_v58 = vunpack.i.l.bf16 %v3682_v0  ;;  %v3669_v4 = vunpack.i.h.bf16 %v3667_v48  ;;  %v3668_v14 = vunpack.i.l.bf16 %v3667_v48 }
 0x628   : > { %v2821_v15 = vsel %vm2816_vm5, %v2812_v5, %v3668_v14  ;;  %v2822_v55 = vsel %vm2816_vm5, %v2813_v3, %v3669_v4 }
 0x629   : > { %v2830_v22 = vsel %vm2825_vm6, %v2821_v15, %v3683_v58  ;;  %v2831_v42 = vsel %vm2825_vm6, %v2822_v55, %v3684_v24 }
 0x62a   : > { %v2836_v18 = vpack.c.bf16 %v2831_v42, %v2830_v22 }
 0x62c   : > { %2924 = vmatmul.bf16.gmra.mxu3 %v2836_v18 }
 0x62d   : > { %v3687_v60 = vpop.permute.xlu0 %3686  ;;  %v3677_v40 = vpop.permute.xlu1 %3676 }
 0x62e   : > { %v3679_v17 = vunpack.i.h.bf16 %v3677_v40  ;;  %v3678_v2 = vunpack.i.l.bf16 %v3677_v40  ;;  %v3689_v39 = vunpack.i.h.bf16 %v3687_v60  ;;  %v3688_v45 = vunpack.i.l.bf16 %v3687_v60 }
 0x630   : > { %v2789_v23 = vsel %vm2781_vm2, %v2780_v50, %v3679_v17  ;;  %v2788_v46 = vsel %vm2781_vm2, %v2779_v53, %v3678_v2 }
 0x631   : > { %v2798_v19 = vsel %vm2790_vm3, %v2789_v23, %v3689_v39  ;;  %v2797_v1 = vsel %vm2790_vm3, %v2788_v46, %v3688_v45 }
 0x632   : > { %v2805_v35 = vsel %vm893_vm1, %v2797_v1, %v3693_v10  ;;  %v2806_v8 = vsel %vm893_vm1, %v2798_v19, %v3694_v57 }
 0x635   : > { %v3702_v56 = vpop.permute.xlu0 %3701  ;;  %v3697_v38 = vpop.permute.xlu1 %3696 }
 0x636   : > { %v3704_v16 = vunpack.i.h.bf16 %v3702_v56  ;;  %v3703_v13 = vunpack.i.l.bf16 %v3702_v56  ;;  %v3699_v33 = vunpack.i.h.bf16 %v3697_v38  ;;  %v3698_v47 = vunpack.i.l.bf16 %v3697_v38 }
 0x638   : > { %v2814_v26 = vsel %vm2807_vm4, %v2805_v35, %v3698_v47  ;;  %v2815_v41 = vsel %vm2807_vm4, %v2806_v8, %v3699_v33 }
 0x639   : > { %v2823_v27 = vsel %vm2816_vm5, %v2814_v26, %v3703_v13  ;;  %v2824_v63 = vsel %vm2816_vm5, %v2815_v41, %v3704_v16 }
 0x63a   : > { %v2832_v32 = vsel %vm2825_vm6, %v2823_v27, %v3708_v49  ;;  %v2833_v20 = vsel %vm2825_vm6, %v2824_v63, %v3709_v51 }
 0x63b   : > { %v2837_v31 = vpack.c.bf16 %v2833_v20, %v2832_v32 }
 0x63d   : > { %2929 = vmatmul.bf16.gmra.mxu3 %v2837_v31 }
 0x666   : > { %v2915_v34 = vpop.f32.mrf.mxu3 }
 0x667   : > { %v2916_v36 = vadd.f32 %v3710_v11, %v2915_v34 }
 0x669   : > { %2935 = vst [vmem:[%s424_s19] sm:$0xff] %v2916_v36 }
 0x66e   : > { %v2917_v28 = vpop.f32.mrf.mxu3 }
 0x66f   : > { %v2918_v44 = vadd.f32 %v3710_v11, %v2917_v28 }
 0x671   : > { %2936 = vst [vmem:[%s424_s19 + $0x8] sm:$0xff] %v2918_v44 }
 0x69e   : > { %v2920_v29 = vpop.f32.mrf.mxu3 }
 0x69f   : > { %v2921_v61 = vadd.f32 %v3710_v11, %v2920_v29 }
 0x6a1   : > { %2937 = vst [vmem:[%s424_s19 + $0x10] sm:$0xff] %v2921_v61 }
 0x6a6   : > { %v2922_v9 = vpop.f32.mrf.mxu3 }
 0x6a7   : > { %v2923_v59 = vadd.f32 %v3710_v11, %v2922_v9 }
 0x6a9   : > { %2938 = vst [vmem:[%s424_s19 + $0x18] sm:$0xff] %v2923_v59 }
 0x6af   : > { %v2925_v6 = vpop.f32.mrf.mxu3 }
 0x6b0   : > { %v2926_v21 = vadd.f32 %v3710_v11, %v2925_v6 }
 0x6b2   : > { %2939 = vst [vmem:[%s424_s19 + $0x20] sm:$0xff] %v2926_v21 }
 0x6b7   : > { %v2927_v54 = vpop.f32.mrf.mxu3 }
 0x6b8   : > { %v2928_v25 = vadd.f32 %v3710_v11, %v2927_v54 }
 0x6ba   : > { %2940 = vst [vmem:[%s424_s19 + $0x28] sm:$0xff] %v2928_v25 }
 0x6c0   : > { %v2930_v7 = vpop.f32.mrf.mxu3 }
 0x6c1   : > { %v2931_v30 = vadd.f32 %v3710_v11, %v2930_v7 }
 0x6c3   : > { %2941 = vst [vmem:[%s424_s19 + $0x30] sm:$0xff] %v2931_v30 }
 0x6c8   : > { %v2932_v52 = vpop.f32.mrf.mxu3 }
 0x6c9   : > { %v2933_v0 = vadd.f32 %v3710_v11, %v2932_v52 }
 0x6cb   : > { %2942 = vst [vmem:[%s424_s19 + $0x38] sm:$0xff] %v2933_v0 }
 0x6cc   : > { %4178 = shalt.err (!%p4175_p0)
}
 0x6cd   : > { %s4266_s12 = smov 128   ;;  %s4267_s15 = smov 8  }
 0x6ce   : > { %3469 = dma.vmem_to_hbm [thread:$0]  (%p4405_p7), %s2959_s3, 1024, %s2961_s5, %s2944_s28, %s4266_s12, %s4266_s12, %s4267_s15  }
 0x6cf PF: > { %s2975_s18 = sand.u32 1, %s4229_s24   ;;  %p3492_p3 = pnand %p3116_p11, %p4353_p6 }
 0x6d0   : > { %s2976_s23 = scalar_lea.sflag [#allocation6], %s2975_s18 }
 0x6d1   : > { %p3493_p5 = pneg %p3492_p3 }
 0x6d3   : > { %4224 = dma.done.wait (%p3493_p5), %s2976_s23, 1024  }
 0x6d4   : > { %4226 = vsyncadd (%p3493_p5), %s2976_s23, 4294966272  ;;  %s28_s29 = sadd.s32 1, %s4249_s29   ;;  %s5889_s17 = sld [smem:[#allocation24_spill]] }
 0x6d5   : > { %p25_p9 = scmp.ge.s32.totalorder %s28_s29, 4   ;;  %s5890_s27 = sld [smem:[#allocation22_spill]] }
 0x6d6   : > { %s5891_s28 = sld [smem:[#allocation23_spill]]  ;;  %s5892_s24 = smov %s4233_s25 }
 0x6d7   : > { %s5893_s25 = smov %s4237_s26  ;;  %27 = sbr.rel (!%p25_p9) target bundleno = 15 (0xf), region = 126 }
 0x6da   : > { %s5894_s26 = smov %s5889_s17 }
 0x6dc   :  { %2982 = vsyncpa [#allocation5], 1 }
 0x6dd   :  { %2984 = vsyncpa [#allocation5 + $0x1], 1 }
 0x6de   :  { %2985 = vsyncpa [#allocation8], 1 }
 0x6df   :  { %2987 = vsyncpa [#allocation8 + $0x1], 1 }
 0x6e0   :  { %2988 = vsyncpa [#allocation11], 1 }
 0x6e1   :  { %2989 = vsyncpa [#allocation14], 1 }
 0x6e2   :  { %2990 = vsyncpa [#allocation6], 1 }
 0x6e3   :  { %2992 = vsyncpa [#allocation6 + $0x1], 1 }

</bundles_post_ra>
